<compile_context>
chip_gen: v5e
topology: v5e:2x2
jax: 0.10.0
libtpu: 0.0.40
codegen_flags: <defaults>
</compile_context>

<pallas_src>
import functools

import jax
import jax.numpy as jnp
from jax.experimental import pallas as pl
from jax.experimental.pallas import tpu as pltpu

EPS = 1e-5
LANE = 128


def _round_up(x, m):
    return (x + m - 1) // m * m


# --------------------------------------------------------------------------
# Phase 1: conv (9 on-chip taps -> MXU) + per-image channel sum / sumsq
# --------------------------------------------------------------------------
def _conv_stats_kernel(xp_ref, w_ref, y_ref, psum_ref, psumsq_ref, *, ho, wo):
    # xp_ref : (1, Hp, Wp, Cin_p)  bf16  spatially + channel padded image
    # w_ref  : (9, Cin_p, Cout_p)  bf16  tap-major (ky, kx) weights
    # y_ref  : (1, Ho*Wo, Cout_p)  f32   pre-BN conv output for this image
    # psum_ref / psumsq_ref : (1, 1, Cout_p) f32 per-image channel partials
    cin_p = xp_ref.shape[3]
    cout_p = y_ref.shape[2]

    acc = jnp.zeros((ho * wo, cout_p), jnp.float32)
    for t in range(9):                       # static unroll over the 3x3 taps
        ky, kx = divmod(t, 3)
        tap = xp_ref[0, ky:ky + ho, kx:kx + wo, :]        # (Ho, Wo, Cin_p) bf16
        tap = tap.reshape(ho * wo, cin_p)                 # lane dim (128) intact
        acc = acc + jnp.dot(tap, w_ref[t],
                            preferred_element_type=jnp.float32)

    y_ref[...] = acc[None]                                # (1, Ho*Wo, Cout_p)
    psum_ref[...] = jnp.sum(acc, axis=0, keepdims=True)[None]
    psumsq_ref[...] = jnp.sum(acc * acc, axis=0, keepdims=True)[None]


# --------------------------------------------------------------------------
# Phase 2: y * scale + shift, ReLU  (scale/shift pre-folded per channel)
# --------------------------------------------------------------------------
def _bn_relu_kernel(y_ref, scale_ref, shift_ref, o_ref):
    y = y_ref[...]                                        # (1, TM, Cout_p) f32
    s = scale_ref[...][:, None, :]                        # (1, 1, Cout_p)
    b = shift_ref[...][:, None, :]
    o_ref[...] = jnp.maximum(y * s + b, 0.0).astype(o_ref.dtype)


# --------------------------------------------------------------------------
# One Conv+BN+ReLU layer (training-mode BN: batch stats, biased var, eps=1e-5)
# --------------------------------------------------------------------------
def _conv_bn_relu_layer(x_nhwc, w_hwio, gamma, beta, padding=1,
                        out_dtype=jnp.float32):
    n, h, w, c_act = x_nhwc.shape
    kh, kw, c_w, cout = w_hwio.shape
    assert (kh, kw) == (3, 3)
    ho = h + 2 * padding - 2
    wo = w + 2 * padding - 2
    hp, wp = h + 2 * padding, w + 2 * padding
    m = ho * wo

    cin_p = _round_up(c_act, LANE)            # lane-dense input channels
    cout_p = _round_up(cout, LANE)            # lane-dense output channels

    # bf16 MXU inputs; zero channel padding is exact (extra taps contribute 0).
    xp = jnp.pad(x_nhwc.astype(jnp.bfloat16),
                 ((0, 0), (padding, padding), (padding, padding),
                  (0, cin_p - c_act)))
    wt = jnp.pad(w_hwio.astype(jnp.bfloat16),
                 ((0, 0), (0, 0), (0, cin_p - c_w), (0, cout_p - cout)))
    wt = wt.reshape(9, cin_p, cout_p)

    kernel_a = functools.partial(_conv_stats_kernel, ho=ho, wo=wo)
    y, psum, psumsq = pl.pallas_call(
        kernel_a,
        out_shape=(jax.ShapeDtypeStruct((n, m, cout_p), jnp.float32),
                   jax.ShapeDtypeStruct((n, 1, cout_p), jnp.float32),
                   jax.ShapeDtypeStruct((n, 1, cout_p), jnp.float32)),
        grid=(n,),
        in_specs=[pl.BlockSpec((1, hp, wp, cin_p), lambda i: (i, 0, 0, 0)),
                  pl.BlockSpec((9, cin_p, cout_p), lambda i: (0, 0, 0))],
        out_specs=(pl.BlockSpec((1, m, cout_p), lambda i: (i, 0, 0)),
                   pl.BlockSpec((1, 1, cout_p), lambda i: (i, 0, 0)),
                   pl.BlockSpec((1, 1, cout_p), lambda i: (i, 0, 0))),
        compiler_params=pltpu.CompilerParams(
            dimension_semantics=("parallel",)),
    )(xp, wt)

    # Tiny (N, Cout_p) combine in plain JAX: one-pass stats + folded scale/shift.
    cnt = float(n * m)
    mean = jnp.sum(psum[:, 0, :], axis=0, keepdims=True) / cnt       # (1, Cp)
    var = jnp.sum(psumsq[:, 0, :], axis=0, keepdims=True) / cnt - mean * mean
    gamma_p = jnp.pad(gamma, (0, cout_p - cout)).reshape(1, cout_p)
    beta_p = jnp.pad(beta, (0, cout_p - cout)).reshape(1, cout_p)
    scale = gamma_p * jax.lax.rsqrt(var + EPS)
    shift = beta_p - mean * scale

    # Phase 2: M-tiled, lane-dense normalize + ReLU.
    tm = m
    for cand in (1024, 512, 256, 128):
        if m % cand == 0:
            tm = cand
            break
    out = pl.pallas_call(
        _bn_relu_kernel,
        out_shape=jax.ShapeDtypeStruct((n, m, cout_p), out_dtype),
        grid=(n, m // tm),
        in_specs=[pl.BlockSpec((1, tm, cout_p), lambda i, j: (i, j, 0)),
                  pl.BlockSpec((1, cout_p), lambda i, j: (0, 0)),
                  pl.BlockSpec((1, cout_p), lambda i, j: (0, 0))],
        out_specs=pl.BlockSpec((1, tm, cout_p), lambda i, j: (i, j, 0)),
        compiler_params=pltpu.CompilerParams(
            dimension_semantics=("parallel", "parallel")),
    )(y, scale.astype(jnp.float32), shift.astype(jnp.float32))

    return out.reshape(n, ho, wo, cout_p)


def double_conv(x_nchw, params, padding=1):
    cout = params["w1"].shape[3]
    x = jnp.transpose(x_nchw, (0, 2, 3, 1)).astype(jnp.float32)  # NCHW -> NHWC
    # Layer-1 output stays bf16 + lane-padded: it is consumed directly as the
    # bf16 MXU input of layer 2 (zero extra channels multiply zero weights).
    h1 = _conv_bn_relu_layer(x, params["w1"], params["g1"], params["bt1"],
                             padding, out_dtype=jnp.bfloat16)
    h2 = _conv_bn_relu_layer(h1, params["w2"], params["g2"], params["bt2"],
                             padding, out_dtype=jnp.float32)
    h2 = h2[..., :cout]                            # drop lane padding
    return jnp.transpose(h2, (0, 3, 1, 2))         # NHWC -> NCHW


def init_params(key, cin, cout):
    # Conv2d-like uniform fan-in init; BN gamma=1, beta=0 (PyTorch defaults).
    # Conv biases are generated for interface parity but are mathematically
    # no-ops under training-mode BN (cancelled by mean subtraction).
    k1, k2, k3, k4 = jax.random.split(key, 4)
    s1 = 1.0 / (cin * 9) ** 0.5
    s2 = 1.0 / (cout * 9) ** 0.5
    return dict(
        w1=jax.random.uniform(k1, (3, 3, cin, cout), jnp.float32, -s1, s1),
        b1=jax.random.uniform(k2, (cout,), jnp.float32, -s1, s1),
        g1=jnp.ones((cout,), jnp.float32),
        bt1=jnp.zeros((cout,), jnp.float32),
        w2=jax.random.uniform(k3, (3, 3, cout, cout), jnp.float32, -s2, s2),
        b2=jax.random.uniform(k4, (cout,), jnp.float32, -s2, s2),
        g2=jnp.ones((cout,), jnp.float32),
        bt2=jnp.zeros((cout,), jnp.float32),
    )


def _ref_layer(x_nhwc, w_hwio, b, g, bt, padding=1):
    # Pure-JAX f32 reference with the conv bias included (PyTorch semantics).
    y = jax.lax.conv_general_dilated(
        x_nhwc, w_hwio, window_strides=(1, 1),
        padding=[(padding, padding), (padding, padding)],
        dimension_numbers=("NHWC", "HWIO", "NHWC"))
    y = y + b
    mean = jnp.mean(y, axis=(0, 1, 2), keepdims=True)
    var = jnp.mean(jnp.square(y - mean), axis=(0, 1, 2), keepdims=True)
    y = (y - mean) * jax.lax.rsqrt(var + EPS) * g + bt
    return jnp.maximum(y, 0.0)


if __name__ == "__main__":
    key = jax.random.PRNGKey(0)
    kx_, kp = jax.random.split(key)
    N, Cin, Cout, H, W = 2, 4, 8, 16, 16
    x = jax.random.normal(kx_, (N, Cin, H, W), jnp.float32)   # NCHW like PyTorch
    params = init_params(kp, Cin, Cout)

    out = jax.block_until_ready(jax.jit(double_conv)(x, params))
    assert out.shape == (N, Cout, H, W)

    xh = jnp.transpose(x, (0, 2, 3, 1))
    r = _ref_layer(xh, params["w1"], params["b1"], params["g1"], params["bt1"])
    r = _ref_layer(r, params["w2"], params["b2"], params["g2"], params["bt2"])
    ref = jnp.transpose(r, (0, 3, 1, 2))
    err = float(jnp.max(jnp.abs(out - ref)))
    # bf16 MXU inputs (f32 accumulation, f32 BN stats) -> loosened tolerance.
    assert err < 5e-2, f"max abs err {err}"
    print("KERNEL_OK")
</pallas_src>

<mosaic_0001>
module attributes {stable_mosaic.version = 11 : i64} {
  func.func @_conv_stats_kernel(%arg0: i32, %arg1: memref<1x18x18x128xbf16, #tpu.memory_space<vmem>>, %arg2: memref<9x128x128xbf16, #tpu.memory_space<vmem>>, %arg3: memref<1x256x128xf32, #tpu.memory_space<vmem>>, %arg4: memref<1x1x128xf32, #tpu.memory_space<vmem>>, %arg5: memref<1x1x128xf32, #tpu.memory_space<vmem>>) attributes {dimension_semantics = [#tpu.dimension_semantics<parallel>], iteration_bounds = array<i64: 2>, scalar_prefetch = 0 : i64, scratch_operands = 0 : i64, tpu.core_type = #tpu.core_type<tc>, window_params = [{transform_indices = @transform_0, window_bounds = array<i64: 1, 18, 18, 128>}, {pipeline_mode = #tpu.pipeline_mode<synchronous>, transform_indices = @transform_1, window_bounds = array<i64: 9, 128, 128>}, {transform_indices = @transform_2, window_bounds = array<i64: 1, 256, 128>}, {transform_indices = @transform_3, window_bounds = array<i64: 1, 1, 128>}, {transform_indices = @transform_4, window_bounds = array<i64: 1, 1, 128>}]} {
    %cst = arith.constant 0.000000e+00 : f32
    %0 = vector.broadcast %cst : f32 to vector<256x128xf32>
    %c0 = arith.constant 0 : index
    %c0_0 = arith.constant 0 : index
    %c0_1 = arith.constant 0 : index
    %c0_2 = arith.constant 0 : index
    %1 = vector.load %arg1[%c0, %c0_0, %c0_1, %c0_2] : memref<1x18x18x128xbf16, #tpu.memory_space<vmem>>, vector<1x16x16x128xbf16>
    %2 = vector.shape_cast %1 : vector<1x16x16x128xbf16> to vector<16x16x128xbf16>
    %3 = vector.shape_cast %2 : vector<16x16x128xbf16> to vector<256x128xbf16>
    %c0_3 = arith.constant 0 : index
    %c0_4 = arith.constant 0 : index
    %c0_5 = arith.constant 0 : index
    %4 = vector.load %arg2[%c0_3, %c0_4, %c0_5] : memref<9x128x128xbf16, #tpu.memory_space<vmem>>, vector<1x128x128xbf16>
    %5 = vector.shape_cast %4 : vector<1x128x128xbf16> to vector<128x128xbf16>
    %cst_6 = arith.constant dense<0.000000e+00> : vector<256x128xf32>
    %6 = tpu.matmul %3, %5, %cst_6 {dimension_numbers = #tpu.dot_dimension_numbers<[1], [0], [0], [1], [0, 0, 1, 1], [], []>} : vector<256x128xbf16>, vector<128x128xbf16>, vector<256x128xf32> -> vector<256x128xf32>
    %7 = arith.addf %0, %6 : vector<256x128xf32>
    %c0_7 = arith.constant 0 : index
    %c0_8 = arith.constant 0 : index
    %c1 = arith.constant 1 : index
    %c0_9 = arith.constant 0 : index
    %8 = vector.load %arg1[%c0_7, %c0_8, %c1, %c0_9] : memref<1x18x18x128xbf16, #tpu.memory_space<vmem>>, vector<1x16x16x128xbf16>
    %9 = vector.shape_cast %8 : vector<1x16x16x128xbf16> to vector<16x16x128xbf16>
    %10 = vector.shape_cast %9 : vector<16x16x128xbf16> to vector<256x128xbf16>
    %c1_10 = arith.constant 1 : index
    %c0_11 = arith.constant 0 : index
    %c0_12 = arith.constant 0 : index
    %11 = vector.load %arg2[%c1_10, %c0_11, %c0_12] : memref<9x128x128xbf16, #tpu.memory_space<vmem>>, vector<1x128x128xbf16>
    %12 = vector.shape_cast %11 : vector<1x128x128xbf16> to vector<128x128xbf16>
    %cst_13 = arith.constant dense<0.000000e+00> : vector<256x128xf32>
    %13 = tpu.matmul %10, %12, %cst_13 {dimension_numbers = #tpu.dot_dimension_numbers<[1], [0], [0], [1], [0, 0, 1, 1], [], []>} : vector<256x128xbf16>, vector<128x128xbf16>, vector<256x128xf32> -> vector<256x128xf32>
    %14 = arith.addf %7, %13 : vector<256x128xf32>
    %c0_14 = arith.constant 0 : index
    %c0_15 = arith.constant 0 : index
    %c2 = arith.constant 2 : index
    %c0_16 = arith.constant 0 : index
    %15 = vector.load %arg1[%c0_14, %c0_15, %c2, %c0_16] : memref<1x18x18x128xbf16, #tpu.memory_space<vmem>>, vector<1x16x16x128xbf16>
    %16 = vector.shape_cast %15 : vector<1x16x16x128xbf16> to vector<16x16x128xbf16>
    %17 = vector.shape_cast %16 : vector<16x16x128xbf16> to vector<256x128xbf16>
    %c2_17 = arith.constant 2 : index
    %c0_18 = arith.constant 0 : index
    %c0_19 = arith.constant 0 : index
    %18 = vector.load %arg2[%c2_17, %c0_18, %c0_19] : memref<9x128x128xbf16, #tpu.memory_space<vmem>>, vector<1x128x128xbf16>
    %19 = vector.shape_cast %18 : vector<1x128x128xbf16> to vector<128x128xbf16>
    %cst_20 = arith.constant dense<0.000000e+00> : vector<256x128xf32>
    %20 = tpu.matmul %17, %19, %cst_20 {dimension_numbers = #tpu.dot_dimension_numbers<[1], [0], [0], [1], [0, 0, 1, 1], [], []>} : vector<256x128xbf16>, vector<128x128xbf16>, vector<256x128xf32> -> vector<256x128xf32>
    %21 = arith.addf %14, %20 : vector<256x128xf32>
    %c0_21 = arith.constant 0 : index
    %c1_22 = arith.constant 1 : index
    %c0_23 = arith.constant 0 : index
    %c0_24 = arith.constant 0 : index
    %22 = vector.load %arg1[%c0_21, %c1_22, %c0_23, %c0_24] : memref<1x18x18x128xbf16, #tpu.memory_space<vmem>>, vector<1x16x16x128xbf16>
    %23 = vector.shape_cast %22 : vector<1x16x16x128xbf16> to vector<16x16x128xbf16>
    %24 = vector.shape_cast %23 : vector<16x16x128xbf16> to vector<256x128xbf16>
    %c3 = arith.constant 3 : index
    %c0_25 = arith.constant 0 : index
    %c0_26 = arith.constant 0 : index
    %25 = vector.load %arg2[%c3, %c0_25, %c0_26] : memref<9x128x128xbf16, #tpu.memory_space<vmem>>, vector<1x128x128xbf16>
    %26 = vector.shape_cast %25 : vector<1x128x128xbf16> to vector<128x128xbf16>
    %cst_27 = arith.constant dense<0.000000e+00> : vector<256x128xf32>
    %27 = tpu.matmul %24, %26, %cst_27 {dimension_numbers = #tpu.dot_dimension_numbers<[1], [0], [0], [1], [0, 0, 1, 1], [], []>} : vector<256x128xbf16>, vector<128x128xbf16>, vector<256x128xf32> -> vector<256x128xf32>
    %28 = arith.addf %21, %27 : vector<256x128xf32>
    %c0_28 = arith.constant 0 : index
    %c1_29 = arith.constant 1 : index
    %c1_30 = arith.constant 1 : index
    %c0_31 = arith.constant 0 : index
    %29 = vector.load %arg1[%c0_28, %c1_29, %c1_30, %c0_31] : memref<1x18x18x128xbf16, #tpu.memory_space<vmem>>, vector<1x16x16x128xbf16>
    %30 = vector.shape_cast %29 : vector<1x16x16x128xbf16> to vector<16x16x128xbf16>
    %31 = vector.shape_cast %30 : vector<16x16x128xbf16> to vector<256x128xbf16>
    %c4 = arith.constant 4 : index
    %c0_32 = arith.constant 0 : index
    %c0_33 = arith.constant 0 : index
    %32 = vector.load %arg2[%c4, %c0_32, %c0_33] : memref<9x128x128xbf16, #tpu.memory_space<vmem>>, vector<1x128x128xbf16>
    %33 = vector.shape_cast %32 : vector<1x128x128xbf16> to vector<128x128xbf16>
    %cst_34 = arith.constant dense<0.000000e+00> : vector<256x128xf32>
    %34 = tpu.matmul %31, %33, %cst_34 {dimension_numbers = #tpu.dot_dimension_numbers<[1], [0], [0], [1], [0, 0, 1, 1], [], []>} : vector<256x128xbf16>, vector<128x128xbf16>, vector<256x128xf32> -> vector<256x128xf32>
    %35 = arith.addf %28, %34 : vector<256x128xf32>
    %c0_35 = arith.constant 0 : index
    %c1_36 = arith.constant 1 : index
    %c2_37 = arith.constant 2 : index
    %c0_38 = arith.constant 0 : index
    %36 = vector.load %arg1[%c0_35, %c1_36, %c2_37, %c0_38] : memref<1x18x18x128xbf16, #tpu.memory_space<vmem>>, vector<1x16x16x128xbf16>
    %37 = vector.shape_cast %36 : vector<1x16x16x128xbf16> to vector<16x16x128xbf16>
    %38 = vector.shape_cast %37 : vector<16x16x128xbf16> to vector<256x128xbf16>
    %c5 = arith.constant 5 : index
    %c0_39 = arith.constant 0 : index
    %c0_40 = arith.constant 0 : index
    %39 = vector.load %arg2[%c5, %c0_39, %c0_40] : memref<9x128x128xbf16, #tpu.memory_space<vmem>>, vector<1x128x128xbf16>
    %40 = vector.shape_cast %39 : vector<1x128x128xbf16> to vector<128x128xbf16>
    %cst_41 = arith.constant dense<0.000000e+00> : vector<256x128xf32>
    %41 = tpu.matmul %38, %40, %cst_41 {dimension_numbers = #tpu.dot_dimension_numbers<[1], [0], [0], [1], [0, 0, 1, 1], [], []>} : vector<256x128xbf16>, vector<128x128xbf16>, vector<256x128xf32> -> vector<256x128xf32>
    %42 = arith.addf %35, %41 : vector<256x128xf32>
    %c0_42 = arith.constant 0 : index
    %c2_43 = arith.constant 2 : index
    %c0_44 = arith.constant 0 : index
    %c0_45 = arith.constant 0 : index
    %43 = vector.load %arg1[%c0_42, %c2_43, %c0_44, %c0_45] : memref<1x18x18x128xbf16, #tpu.memory_space<vmem>>, vector<1x16x16x128xbf16>
    %44 = vector.shape_cast %43 : vector<1x16x16x128xbf16> to vector<16x16x128xbf16>
    %45 = vector.shape_cast %44 : vector<16x16x128xbf16> to vector<256x128xbf16>
    %c6 = arith.constant 6 : index
    %c0_46 = arith.constant 0 : index
    %c0_47 = arith.constant 0 : index
    %46 = vector.load %arg2[%c6, %c0_46, %c0_47] : memref<9x128x128xbf16, #tpu.memory_space<vmem>>, vector<1x128x128xbf16>
    %47 = vector.shape_cast %46 : vector<1x128x128xbf16> to vector<128x128xbf16>
    %cst_48 = arith.constant dense<0.000000e+00> : vector<256x128xf32>
    %48 = tpu.matmul %45, %47, %cst_48 {dimension_numbers = #tpu.dot_dimension_numbers<[1], [0], [0], [1], [0, 0, 1, 1], [], []>} : vector<256x128xbf16>, vector<128x128xbf16>, vector<256x128xf32> -> vector<256x128xf32>
    %49 = arith.addf %42, %48 : vector<256x128xf32>
    %c0_49 = arith.constant 0 : index
    %c2_50 = arith.constant 2 : index
    %c1_51 = arith.constant 1 : index
    %c0_52 = arith.constant 0 : index
    %50 = vector.load %arg1[%c0_49, %c2_50, %c1_51, %c0_52] : memref<1x18x18x128xbf16, #tpu.memory_space<vmem>>, vector<1x16x16x128xbf16>
    %51 = vector.shape_cast %50 : vector<1x16x16x128xbf16> to vector<16x16x128xbf16>
    %52 = vector.shape_cast %51 : vector<16x16x128xbf16> to vector<256x128xbf16>
    %c7 = arith.constant 7 : index
    %c0_53 = arith.constant 0 : index
    %c0_54 = arith.constant 0 : index
    %53 = vector.load %arg2[%c7, %c0_53, %c0_54] : memref<9x128x128xbf16, #tpu.memory_space<vmem>>, vector<1x128x128xbf16>
    %54 = vector.shape_cast %53 : vector<1x128x128xbf16> to vector<128x128xbf16>
    %cst_55 = arith.constant dense<0.000000e+00> : vector<256x128xf32>
    %55 = tpu.matmul %52, %54, %cst_55 {dimension_numbers = #tpu.dot_dimension_numbers<[1], [0], [0], [1], [0, 0, 1, 1], [], []>} : vector<256x128xbf16>, vector<128x128xbf16>, vector<256x128xf32> -> vector<256x128xf32>
    %56 = arith.addf %49, %55 : vector<256x128xf32>
    %c0_56 = arith.constant 0 : index
    %c2_57 = arith.constant 2 : index
    %c2_58 = arith.constant 2 : index
    %c0_59 = arith.constant 0 : index
    %57 = vector.load %arg1[%c0_56, %c2_57, %c2_58, %c0_59] : memref<1x18x18x128xbf16, #tpu.memory_space<vmem>>, vector<1x16x16x128xbf16>
    %58 = vector.shape_cast %57 : vector<1x16x16x128xbf16> to vector<16x16x128xbf16>
    %59 = vector.shape_cast %58 : vector<16x16x128xbf16> to vector<256x128xbf16>
    %c8 = arith.constant 8 : index
    %c0_60 = arith.constant 0 : index
    %c0_61 = arith.constant 0 : index
    %60 = vector.load %arg2[%c8, %c0_60, %c0_61] : memref<9x128x128xbf16, #tpu.memory_space<vmem>>, vector<1x128x128xbf16>
    %61 = vector.shape_cast %60 : vector<1x128x128xbf16> to vector<128x128xbf16>
    %cst_62 = arith.constant dense<0.000000e+00> : vector<256x128xf32>
    %62 = tpu.matmul %59, %61, %cst_62 {dimension_numbers = #tpu.dot_dimension_numbers<[1], [0], [0], [1], [0, 0, 1, 1], [], []>} : vector<256x128xbf16>, vector<128x128xbf16>, vector<256x128xf32> -> vector<256x128xf32>
    %63 = arith.addf %56, %62 : vector<256x128xf32>
    %64 = vector.shape_cast %63 : vector<256x128xf32> to vector<1x256x128xf32>
    %c0_63 = arith.constant 0 : index
    %c0_64 = arith.constant 0 : index
    %c0_65 = arith.constant 0 : index
    %65 = vector.load %arg3[%c0_63, %c0_64, %c0_65] : memref<1x256x128xf32, #tpu.memory_space<vmem>>, vector<1x256x128xf32>
    tpu.vector_store %arg3[%c0_63, %c0_64, %c0_65], %64 {strides = array<i32>} : memref<1x256x128xf32, #tpu.memory_space<vmem>>, vector<1x256x128xf32>,
    %cst_66 = arith.constant dense<0.000000e+00> : vector<128xf32>
    %66 = vector.multi_reduction <add>, %63, %cst_66 [0] : vector<256x128xf32> to vector<128xf32>
    %67 = vector.shape_cast %66 : vector<128xf32> to vector<1x128xf32>
    %68 = vector.shape_cast %67 : vector<1x128xf32> to vector<1x1x128xf32>
    %c0_67 = arith.constant 0 : index
    %c0_68 = arith.constant 0 : index
    %c0_69 = arith.constant 0 : index
    %69 = vector.load %arg4[%c0_67, %c0_68, %c0_69] : memref<1x1x128xf32, #tpu.memory_space<vmem>>, vector<1x1x128xf32>
    tpu.vector_store %arg4[%c0_67, %c0_68, %c0_69], %68 {strides = array<i32>} : memref<1x1x128xf32, #tpu.memory_space<vmem>>, vector<1x1x128xf32>,
    %70 = arith.mulf %63, %63 : vector<256x128xf32>
    %cst_70 = arith.constant dense<0.000000e+00> : vector<128xf32>
    %71 = vector.multi_reduction <add>, %70, %cst_70 [0] : vector<256x128xf32> to vector<128xf32>
    %72 = vector.shape_cast %71 : vector<128xf32> to vector<1x128xf32>
    %73 = vector.shape_cast %72 : vector<1x128xf32> to vector<1x1x128xf32>
    %c0_71 = arith.constant 0 : index
    %c0_72 = arith.constant 0 : index
    %c0_73 = arith.constant 0 : index
    %74 = vector.load %arg5[%c0_71, %c0_72, %c0_73] : memref<1x1x128xf32, #tpu.memory_space<vmem>>, vector<1x1x128xf32>
    tpu.vector_store %arg5[%c0_71, %c0_72, %c0_73], %73 {strides = array<i32>} : memref<1x1x128xf32, #tpu.memory_space<vmem>>, vector<1x1x128xf32>,
    return
  }
  func.func @transform_0(%arg0: i32) -> (i32, i32, i32, i32) {
    %c0_i32 = arith.constant 0 : i32
    %c0_i32_0 = arith.constant 0 : i32
    %c0_i32_1 = arith.constant 0 : i32
    %c0_i32_2 = arith.constant 0 : i32
    return %arg0, %c0_i32, %c0_i32_0, %c0_i32_1 : i32, i32, i32, i32
  }
  func.func @transform_1(%arg0: i32) -> (i32, i32, i32) {
    %c0_i32 = arith.constant 0 : i32
    %c0_i32_0 = arith.constant 0 : i32
    %c0_i32_1 = arith.constant 0 : i32
    %c0_i32_2 = arith.constant 0 : i32
    return %c0_i32, %c0_i32_0, %c0_i32_1 : i32, i32, i32
  }
  func.func @transform_2(%arg0: i32) -> (i32, i32, i32) {
    %c0_i32 = arith.constant 0 : i32
    %c0_i32_0 = arith.constant 0 : i32
    %c0_i32_1 = arith.constant 0 : i32
    return %arg0, %c0_i32, %c0_i32_0 : i32, i32, i32
  }
  func.func @transform_3(%arg0: i32) -> (i32, i32, i32) {
    %c0_i32 = arith.constant 0 : i32
    %c0_i32_0 = arith.constant 0 : i32
    %c0_i32_1 = arith.constant 0 : i32
    return %arg0, %c0_i32, %c0_i32_0 : i32, i32, i32
  }
  func.func @transform_4(%arg0: i32) -> (i32, i32, i32) {
    %c0_i32 = arith.constant 0 : i32
    %c0_i32_0 = arith.constant 0 : i32
    %c0_i32_1 = arith.constant 0 : i32
    return %arg0, %c0_i32, %c0_i32_0 : i32, i32, i32
  }
}

module attributes {stable_mosaic.version = 11 : i64} {
  func.func @_bn_relu_kernel(%arg0: i32, %arg1: i32, %arg2: memref<1x256x128xf32, #tpu.memory_space<vmem>>, %arg3: memref<1x128xf32, #tpu.memory_space<vmem>>, %arg4: memref<1x128xf32, #tpu.memory_space<vmem>>, %arg5: memref<1x256x128xbf16, #tpu.memory_space<vmem>>) attributes {dimension_semantics = [#tpu.dimension_semantics<parallel>, #tpu.dimension_semantics<parallel>], iteration_bounds = array<i64: 2, 1>, scalar_prefetch = 0 : i64, scratch_operands = 0 : i64, tpu.core_type = #tpu.core_type<tc>, window_params = [{transform_indices = @transform_0, window_bounds = array<i64: 1, 256, 128>}, {pipeline_mode = #tpu.pipeline_mode<synchronous>, transform_indices = @transform_1, window_bounds = array<i64: 1, 128>}, {pipeline_mode = #tpu.pipeline_mode<synchronous>, transform_indices = @transform_2, window_bounds = array<i64: 1, 128>}, {transform_indices = @transform_3, window_bounds = array<i64: 1, 256, 128>}]} {
    %c0 = arith.constant 0 : index
    %c0_0 = arith.constant 0 : index
    %c0_1 = arith.constant 0 : index
    %0 = vector.load %arg2[%c0, %c0_0, %c0_1] : memref<1x256x128xf32, #tpu.memory_space<vmem>>, vector<1x256x128xf32>
    %c0_2 = arith.constant 0 : index
    %c0_3 = arith.constant 0 : index
    %1 = vector.load %arg3[%c0_2, %c0_3] : memref<1x128xf32, #tpu.memory_space<vmem>>, vector<1x128xf32>
    %2 = vector.shape_cast %1 : vector<1x128xf32> to vector<1x1x128xf32>
    %c0_4 = arith.constant 0 : index
    %c0_5 = arith.constant 0 : index
    %3 = vector.load %arg4[%c0_4, %c0_5] : memref<1x128xf32, #tpu.memory_space<vmem>>, vector<1x128xf32>
    %4 = vector.shape_cast %3 : vector<1x128xf32> to vector<1x1x128xf32>
    %5 = vector.broadcast %2 : vector<1x1x128xf32> to vector<1x256x128xf32>
    %6 = arith.mulf %0, %5 : vector<1x256x128xf32>
    %7 = vector.broadcast %4 : vector<1x1x128xf32> to vector<1x256x128xf32>
    %8 = arith.addf %6, %7 : vector<1x256x128xf32>
    %cst = arith.constant 0.000000e+00 : f32
    %9 = vector.broadcast %cst : f32 to vector<1x256x128xf32>
    %10 = arith.maximumf %8, %9 : vector<1x256x128xf32>
    %11 = arith.truncf %10 : vector<1x256x128xf32> to vector<1x256x128xbf16>
    %c0_6 = arith.constant 0 : index
    %c0_7 = arith.constant 0 : index
    %c0_8 = arith.constant 0 : index
    %12 = vector.load %arg5[%c0_6, %c0_7, %c0_8] : memref<1x256x128xbf16, #tpu.memory_space<vmem>>, vector<1x256x128xbf16>
    tpu.vector_store %arg5[%c0_6, %c0_7, %c0_8], %11 {strides = array<i32>} : memref<1x256x128xbf16, #tpu.memory_space<vmem>>, vector<1x256x128xbf16>,
    return
  }
  func.func @transform_0(%arg0: i32, %arg1: i32) -> (i32, i32, i32) {
    %c0_i32 = arith.constant 0 : i32
    %c0_i32_0 = arith.constant 0 : i32
    return %arg0, %arg1, %c0_i32 : i32, i32, i32
  }
  func.func @transform_1(%arg0: i32, %arg1: i32) -> (i32, i32) {
    %c0_i32 = arith.constant 0 : i32
    %c0_i32_0 = arith.constant 0 : i32
    %c0_i32_1 = arith.constant 0 : i32
    return %c0_i32, %c0_i32_0 : i32, i32
  }
  func.func @transform_2(%arg0: i32, %arg1: i32) -> (i32, i32) {
    %c0_i32 = arith.constant 0 : i32
    %c0_i32_0 = arith.constant 0 : i32
    %c0_i32_1 = arith.constant 0 : i32
    return %c0_i32, %c0_i32_0 : i32, i32
  }
  func.func @transform_3(%arg0: i32, %arg1: i32) -> (i32, i32, i32) {
    %c0_i32 = arith.constant 0 : i32
    %c0_i32_0 = arith.constant 0 : i32
    return %arg0, %arg1, %c0_i32 : i32, i32, i32
  }
}

module attributes {stable_mosaic.version = 11 : i64} {
  func.func @_bn_relu_kernel(%arg0: i32, %arg1: i32, %arg2: memref<1x256x128xf32, #tpu.memory_space<vmem>>, %arg3: memref<1x128xf32, #tpu.memory_space<vmem>>, %arg4: memref<1x128xf32, #tpu.memory_space<vmem>>, %arg5: memref<1x256x128xf32, #tpu.memory_space<vmem>>) attributes {dimension_semantics = [#tpu.dimension_semantics<parallel>, #tpu.dimension_semantics<parallel>], iteration_bounds = array<i64: 2, 1>, scalar_prefetch = 0 : i64, scratch_operands = 0 : i64, tpu.core_type = #tpu.core_type<tc>, window_params = [{transform_indices = @transform_0, window_bounds = array<i64: 1, 256, 128>}, {pipeline_mode = #tpu.pipeline_mode<synchronous>, transform_indices = @transform_1, window_bounds = array<i64: 1, 128>}, {pipeline_mode = #tpu.pipeline_mode<synchronous>, transform_indices = @transform_2, window_bounds = array<i64: 1, 128>}, {transform_indices = @transform_3, window_bounds = array<i64: 1, 256, 128>}]} {
    %c0 = arith.constant 0 : index
    %c0_0 = arith.constant 0 : index
    %c0_1 = arith.constant 0 : index
    %0 = vector.load %arg2[%c0, %c0_0, %c0_1] : memref<1x256x128xf32, #tpu.memory_space<vmem>>, vector<1x256x128xf32>
    %c0_2 = arith.constant 0 : index
    %c0_3 = arith.constant 0 : index
    %1 = vector.load %arg3[%c0_2, %c0_3] : memref<1x128xf32, #tpu.memory_space<vmem>>, vector<1x128xf32>
    %2 = vector.shape_cast %1 : vector<1x128xf32> to vector<1x1x128xf32>
    %c0_4 = arith.constant 0 : index
    %c0_5 = arith.constant 0 : index
    %3 = vector.load %arg4[%c0_4, %c0_5] : memref<1x128xf32, #tpu.memory_space<vmem>>, vector<1x128xf32>
    %4 = vector.shape_cast %3 : vector<1x128xf32> to vector<1x1x128xf32>
    %5 = vector.broadcast %2 : vector<1x1x128xf32> to vector<1x256x128xf32>
    %6 = arith.mulf %0, %5 : vector<1x256x128xf32>
    %7 = vector.broadcast %4 : vector<1x1x128xf32> to vector<1x256x128xf32>
    %8 = arith.addf %6, %7 : vector<1x256x128xf32>
    %cst = arith.constant 0.000000e+00 : f32
    %9 = vector.broadcast %cst : f32 to vector<1x256x128xf32>
    %10 = arith.maximumf %8, %9 : vector<1x256x128xf32>
    %c0_6 = arith.constant 0 : index
    %c0_7 = arith.constant 0 : index
    %c0_8 = arith.constant 0 : index
    %11 = vector.load %arg5[%c0_6, %c0_7, %c0_8] : memref<1x256x128xf32, #tpu.memory_space<vmem>>, vector<1x256x128xf32>
    tpu.vector_store %arg5[%c0_6, %c0_7, %c0_8], %10 {strides = array<i32>} : memref<1x256x128xf32, #tpu.memory_space<vmem>>, vector<1x256x128xf32>,
    return
  }
  func.func @transform_0(%arg0: i32, %arg1: i32) -> (i32, i32, i32) {
    %c0_i32 = arith.constant 0 : i32
    %c0_i32_0 = arith.constant 0 : i32
    return %arg0, %arg1, %c0_i32 : i32, i32, i32
  }
  func.func @transform_1(%arg0: i32, %arg1: i32) -> (i32, i32) {
    %c0_i32 = arith.constant 0 : i32
    %c0_i32_0 = arith.constant 0 : i32
    %c0_i32_1 = arith.constant 0 : i32
    return %c0_i32, %c0_i32_0 : i32, i32
  }
  func.func @transform_2(%arg0: i32, %arg1: i32) -> (i32, i32) {
    %c0_i32 = arith.constant 0 : i32
    %c0_i32_0 = arith.constant 0 : i32
    %c0_i32_1 = arith.constant 0 : i32
    return %c0_i32, %c0_i32_0 : i32, i32
  }
  func.func @transform_3(%arg0: i32, %arg1: i32) -> (i32, i32, i32) {
    %c0_i32 = arith.constant 0 : i32
    %c0_i32_0 = arith.constant 0 : i32
    return %arg0, %arg1, %c0_i32 : i32, i32, i32
  }
}

</mosaic_0001>

<bundles_post_ra>
// kernel: double_conv.5
= control target key start
LH: loop header
LB: loop body
LE: loop exit
PB: predicated region body
PF: predicated region fallthrough
CT: control target
= control target key end

     0   :  { %s675_s12 = smov 0   ;;  %s677_s13 = smov 0   ;;  %s838_s0 = inlined_call_operand.vmem [shape: f32[2,256,128], index: 0, kind: input, shape index: {}]   ;;  %s839_s1 = inlined_call_operand.vmem [shape: f32[1,128], index: 1, kind: input, shape index: {}]   ;;  %s840_s2 = inlined_call_operand.vmem [shape: f32[1,128], index: 2, kind: input, shape index: {}]   ;;  %s841_s3 = inlined_call_operand.vmem [shape: bf16[2,256,128], index: 3, kind: output, shape index: {}]  }
   0x1   :  { %s679_s14 = smov 0  }
   0x2 LB: > { %s25_s15 = sadd.s32 1, %s649_s13  ;;  %p501_p0 = scmp.ge.s32.totalorder %s653_s14, 1  ;;  %s653_s14 = sphi %s679_s14, %s13_s14   ;;  %s649_s13 = sphi %s677_s13, %s843_s13   ;;  %s645_s12 = sphi %s675_s12, %s842_s12  }
   0x3   : > { %p27_p1 = scmp.ge.s32.totalorder %s25_s15, 2  ;;  %p158_p2 = scmp.lt.s32.totalorder %s653_s14, 3 }
   0x5   : > { %s845_s15 = smov (%p27_p1, %s25_s15), 0  ;;  %p159_p3 = pnand %p501_p0, %p158_p2 }
   0x6   : > { %p191_p4 = scmp.lt.s32.totalorder (!%p159_p3), %s645_s12, 1 }
   0x7   : > { %162 = sbr.rel (%p159_p3) target bundleno = 50 (0x32), region = 32 }
   0xc   : > { %s847_s12 = smov (!%p191_p4, %s645_s12), 1  ;;  %v698_v0 = vld [vmem:[%s839_s1] ss:$0 sm:$0xff] }
   0xd   : > { %s508_s18 = sshll.u32 %s847_s12, 8  ;;  %v709_v1 = vld [vmem:[%s840_s2] ss:$0 sm:$0xff]  ;;  %s509_s24 = sshll.u32 %s847_s12, 7 }
   0xe   : > { %s704_s21 = scalar_lea.vmem %s838_s0, %s508_s18  ;;  %s741_s27 = scalar_lea.vmem %s841_s3, %s509_s24 }
   0xf   : > { %v210_v2 = vld [vmem:[%s704_s21] sm:$0xff]  ;;  %v211_v3 = vld [vmem:[%s704_s21 + $0x8] sm:$0xff]  ;;  %v212_v4 = vld [vmem:[%s704_s21 + $0x10] sm:$0xff] }
  0x10   : > { %v247_v5 = vmul.f32 %v698_v0, %v210_v2  ;;  %v248_v6 = vmul.f32 %v698_v0, %v211_v3  ;;  %v213_v7 = vld [vmem:[%s704_s21 + $0x18] sm:$0xff]  ;;  %v249_v8 = vmul.f32 %v698_v0, %v212_v4  ;;  %v214_v9 = vld [vmem:[%s704_s21 + $0x20] sm:$0xff]  ;;  %v215_v10 = vld [vmem:[%s704_s21 + $0x28] sm:$0xff] }
  0x11   : > { %v250_v11 = vmul.f32 %v698_v0, %v213_v7  ;;  %v251_v12 = vmul.f32 %v698_v0, %v214_v9  ;;  %v252_v13 = vmul.f32 %v698_v0, %v215_v10  ;;  %v216_v14 = vld [vmem:[%s704_s21 + $0x30] sm:$0xff]  ;;  %v217_v15 = vld [vmem:[%s704_s21 + $0x38] sm:$0xff]  ;;  %v218_v24 = vld [vmem:[%s704_s21 + $0x40] sm:$0xff] }
  0x12   : > { %v282_v16 = vadd.f32 %v709_v1, %v247_v5  ;;  %v283_v17 = vadd.f32 %v709_v1, %v248_v6  ;;  %v284_v18 = vadd.f32 %v709_v1, %v249_v8  ;;  %v253_v19 = vmul.f32 %v698_v0, %v216_v14  ;;  %v219_v25 = vld [vmem:[%s704_s21 + $0x48] sm:$0xff]  ;;  %v220_v30 = vld [vmem:[%s704_s21 + $0x50] sm:$0xff]  ;;  %v221_v35 = vld [vmem:[%s704_s21 + $0x58] sm:$0xff] }
  0x13   : > { %v285_v20 = vadd.f32 %v709_v1, %v250_v11  ;;  %v286_v21 = vadd.f32 %v709_v1, %v251_v12  ;;  %v287_v22 = vadd.f32 %v709_v1, %v252_v13  ;;  %v254_v23 = vmul.f32 %v698_v0, %v217_v15  ;;  %v222_v36 = vld [vmem:[%s704_s21 + $0x60] sm:$0xff]  ;;  %v223_v41 = vld [vmem:[%s704_s21 + $0x68] sm:$0xff]  ;;  %v224_v42 = vld [vmem:[%s704_s21 + $0x70] sm:$0xff] }
  0x14   : > { %v314_v26 = vmax.f32 %v282_v16, 0.0  ;;  %v315_v27 = vmax.f32 %v283_v17, 0.0  ;;  %v316_v28 = vmax.f32 %v284_v18, 0.0  ;;  %v288_v29 = vadd.f32 %v709_v1, %v253_v19  ;;  %v225_v51 = vld [vmem:[%s704_s21 + $0x78] sm:$0xff]  ;;  %v226_v56 = vld [vmem:[%s704_s21 + $0x80] sm:$0xff]  ;;  %v227_v61 = vld [vmem:[%s704_s21 + $0x88] sm:$0xff] }
  0x15   : > { %v317_v31 = vmax.f32 %v285_v20, 0.0  ;;  %v318_v32 = vmax.f32 %v286_v21, 0.0  ;;  %v319_v33 = vmax.f32 %v287_v22, 0.0  ;;  %v289_v34 = vadd.f32 %v709_v1, %v254_v23  ;;  %v228_v4 = vld [vmem:[%s704_s21 + $0x90] sm:$0xff]  ;;  %v229_v5 = vld [vmem:[%s704_s21 + $0x98] sm:$0xff]  ;;  %v230_v10 = vld [vmem:[%s704_s21 + $0xa0] sm:$0xff] }
  0x16   : > { %v513_v37 = vpack.c.bf16 %v315_v27, %v314_v26  ;;  %v320_v38 = vmax.f32 %v288_v29, 0.0  ;;  %v255_v39 = vmul.f32 %v698_v0, %v218_v24  ;;  %v256_v40 = vmul.f32 %v698_v0, %v219_v25  ;;  %v231_v15 = vld [vmem:[%s704_s21 + $0xa8] sm:$0xff]  ;;  %v232_v20 = vld [vmem:[%s704_s21 + $0xb0] sm:$0xff]  ;;  %v233_v25 = vld [vmem:[%s704_s21 + $0xb8] sm:$0xff] }
  0x17   : > { %v518_v43 = vpack.c.bf16 %v317_v31, %v316_v28  ;;  %v523_v44 = vpack.c.bf16 %v319_v33, %v318_v32  ;;  %v321_v45 = vmax.f32 %v289_v34, 0.0  ;;  %v257_v46 = vmul.f32 %v698_v0, %v220_v30  ;;  %v234_v30 = vld [vmem:[%s704_s21 + $0xc0] sm:$0xff] }
  0x18   : > { %514 = vst [vmem:[%s741_s27] sm:$0xff] %v513_v37   ;;  %v290_v47 = vadd.f32 %v709_v1, %v255_v39  ;;  %v291_v48 = vadd.f32 %v709_v1, %v256_v40  ;;  %v258_v49 = vmul.f32 %v698_v0, %v221_v35  ;;  %v259_v50 = vmul.f32 %v698_v0, %v222_v36  ;;  %v235_v35 = vld [vmem:[%s704_s21 + $0xc8] sm:$0xff]  ;;  %v236_v40 = vld [vmem:[%s704_s21 + $0xd0] sm:$0xff] }
  0x19   : > { %590 = vst [vmem:[%s741_s27 + $0x8] sm:$0xff] %v518_v43   ;;  %v528_v52 = vpack.c.bf16 %v321_v45, %v320_v38  ;;  %v292_v53 = vadd.f32 %v709_v1, %v257_v46  ;;  %v260_v54 = vmul.f32 %v698_v0, %v223_v41  ;;  %v261_v55 = vmul.f32 %v698_v0, %v224_v42  ;;  %v237_v41 = vld [vmem:[%s704_s21 + $0xd8] sm:$0xff]  ;;  %v238_v46 = vld [vmem:[%s704_s21 + $0xe0] sm:$0xff] }
  0x1a   : > { %591 = vst [vmem:[%s741_s27 + $0x10] sm:$0xff] %v523_v44   ;;  %v322_v57 = vmax.f32 %v290_v47, 0.0  ;;  %v323_v58 = vmax.f32 %v291_v48, 0.0  ;;  %v293_v59 = vadd.f32 %v709_v1, %v258_v49  ;;  %v294_v60 = vadd.f32 %v709_v1, %v259_v50 }
  0x1b   : > { %592 = vst [vmem:[%s741_s27 + $0x18] sm:$0xff] %v528_v52   ;;  %v324_v62 = vmax.f32 %v292_v53, 0.0  ;;  %v295_v63 = vadd.f32 %v709_v1, %v260_v54  ;;  %v262_v2 = vmul.f32 %v698_v0, %v225_v51  ;;  %v296_v3 = vadd.f32 %v709_v1, %v261_v55  ;;  %v239_v51 = vld [vmem:[%s704_s21 + $0xe8] sm:$0xff] }
  0x1c   : > { %v533_v6 = vpack.c.bf16 %v323_v58, %v322_v57  ;;  %v325_v7 = vmax.f32 %v293_v59, 0.0  ;;  %v326_v8 = vmax.f32 %v294_v60, 0.0  ;;  %v263_v9 = vmul.f32 %v698_v0, %v226_v56  ;;  %v240_v56 = vld [vmem:[%s704_s21 + $0xf0] sm:$0xff] }
  0x1d   : > { %v327_v11 = vmax.f32 %v295_v63, 0.0  ;;  %v297_v12 = vadd.f32 %v709_v1, %v262_v2  ;;  %v328_v13 = vmax.f32 %v296_v3, 0.0  ;;  %v264_v14 = vmul.f32 %v698_v0, %v227_v61  ;;  %v241_v61 = vld [vmem:[%s704_s21 + $0xf8] sm:$0xff] }
  0x1e   : > { %593 = vst [vmem:[%s741_s27 + $0x20] sm:$0xff] %v533_v6   ;;  %v538_v16 = vpack.c.bf16 %v325_v7, %v324_v62  ;;  %v298_v17 = vadd.f32 %v709_v1, %v263_v9  ;;  %v265_v18 = vmul.f32 %v698_v0, %v228_v4  ;;  %v266_v19 = vmul.f32 %v698_v0, %v229_v5 }
  0x1f   : > { %v543_v21 = vpack.c.bf16 %v327_v11, %v326_v8  ;;  %v329_v22 = vmax.f32 %v297_v12, 0.0  ;;  %v299_v23 = vadd.f32 %v709_v1, %v264_v14  ;;  %v267_v24 = vmul.f32 %v698_v0, %v230_v10 }
  0x20   : > { %594 = vst [vmem:[%s741_s27 + $0x28] sm:$0xff] %v538_v16   ;;  %v330_v26 = vmax.f32 %v298_v17, 0.0  ;;  %v300_v27 = vadd.f32 %v709_v1, %v265_v18  ;;  %v301_v28 = vadd.f32 %v709_v1, %v266_v19  ;;  %v268_v29 = vmul.f32 %v698_v0, %v231_v15 }
  0x21   : > { %595 = vst [vmem:[%s741_s27 + $0x30] sm:$0xff] %v543_v21   ;;  %v548_v31 = vpack.c.bf16 %v329_v22, %v328_v13  ;;  %v331_v32 = vmax.f32 %v299_v23, 0.0  ;;  %v302_v33 = vadd.f32 %v709_v1, %v267_v24  ;;  %v269_v34 = vmul.f32 %v698_v0, %v232_v20 }
  0x22   : > { %v332_v36 = vmax.f32 %v300_v27, 0.0  ;;  %v333_v37 = vmax.f32 %v301_v28, 0.0  ;;  %v303_v38 = vadd.f32 %v709_v1, %v268_v29  ;;  %v270_v39 = vmul.f32 %v698_v0, %v233_v25 }
  0x23   : > { %596 = vst [vmem:[%s741_s27 + $0x38] sm:$0xff] %v548_v31   ;;  %v553_v42 = vpack.c.bf16 %v331_v32, %v330_v26  ;;  %v334_v43 = vmax.f32 %v302_v33, 0.0  ;;  %v304_v44 = vadd.f32 %v709_v1, %v269_v34  ;;  %v271_v45 = vmul.f32 %v698_v0, %v234_v30 }
  0x24   : > { %v558_v47 = vpack.c.bf16 %v333_v37, %v332_v36  ;;  %v335_v48 = vmax.f32 %v303_v38, 0.0  ;;  %v305_v49 = vadd.f32 %v709_v1, %v270_v39  ;;  %v272_v50 = vmul.f32 %v698_v0, %v235_v35 }
  0x25   : > { %597 = vst [vmem:[%s741_s27 + $0x40] sm:$0xff] %v553_v42   ;;  %v336_v52 = vmax.f32 %v304_v44, 0.0  ;;  %v306_v53 = vadd.f32 %v709_v1, %v271_v45  ;;  %v273_v54 = vmul.f32 %v698_v0, %v236_v40  ;;  %v274_v55 = vmul.f32 %v698_v0, %v237_v41 }
  0x26   : > { %598 = vst [vmem:[%s741_s27 + $0x48] sm:$0xff] %v558_v47   ;;  %v563_v57 = vpack.c.bf16 %v335_v48, %v334_v43  ;;  %v337_v58 = vmax.f32 %v305_v49, 0.0  ;;  %v307_v59 = vadd.f32 %v709_v1, %v272_v50  ;;  %v275_v60 = vmul.f32 %v698_v0, %v238_v46 }
  0x27   : > { %v338_v62 = vmax.f32 %v306_v53, 0.0  ;;  %v308_v63 = vadd.f32 %v709_v1, %v273_v54  ;;  %v309_v2 = vadd.f32 %v709_v1, %v274_v55  ;;  %v276_v3 = vmul.f32 %v698_v0, %v239_v51 }
  0x28   : > { %599 = vst [vmem:[%s741_s27 + $0x50] sm:$0xff] %v563_v57   ;;  %v568_v4 = vpack.c.bf16 %v337_v58, %v336_v52  ;;  %v339_v5 = vmax.f32 %v307_v59, 0.0  ;;  %v310_v6 = vadd.f32 %v709_v1, %v275_v60  ;;  %v277_v7 = vmul.f32 %v698_v0, %v240_v56 }
  0x29   : > { %v340_v8 = vmax.f32 %v308_v63, 0.0  ;;  %v341_v9 = vmax.f32 %v309_v2, 0.0  ;;  %v311_v10 = vadd.f32 %v709_v1, %v276_v3  ;;  %v278_v11 = vmul.f32 %v698_v0, %v241_v61 }
  0x2a   : > { %600 = vst [vmem:[%s741_s27 + $0x58] sm:$0xff] %v568_v4   ;;  %v573_v12 = vpack.c.bf16 %v339_v5, %v338_v62  ;;  %v342_v13 = vmax.f32 %v310_v6, 0.0  ;;  %v312_v14 = vadd.f32 %v709_v1, %v277_v7 }
  0x2b   : > { %v578_v15 = vpack.c.bf16 %v341_v9, %v340_v8  ;;  %v343_v16 = vmax.f32 %v311_v10, 0.0  ;;  %v313_v17 = vadd.f32 %v709_v1, %v278_v11 }
  0x2c   : > { %601 = vst [vmem:[%s741_s27 + $0x60] sm:$0xff] %v573_v12   ;;  %v344_v18 = vmax.f32 %v312_v14, 0.0 }
  0x2d   : > { %602 = vst [vmem:[%s741_s27 + $0x68] sm:$0xff] %v578_v15   ;;  %v583_v19 = vpack.c.bf16 %v343_v16, %v342_v13  ;;  %v345_v20 = vmax.f32 %v313_v17, 0.0 }
  0x2f   : > { %603 = vst [vmem:[%s741_s27 + $0x70] sm:$0xff] %v583_v19   ;;  %v588_v21 = vpack.c.bf16 %v345_v20, %v344_v18 }
  0x31   : > { %604 = vst [vmem:[%s741_s27 + $0x78] sm:$0xff] %v588_v21  }
  0x32 PF: > { %s13_s14 = sadd.s32 1, %s653_s14   ;;  %s842_s12 = smov %s649_s13 }
  0x33   : > { %p10_p5 = scmp.ge.s32.totalorder %s13_s14, 4   ;;  %s843_s13 = smov %s845_s15 }
  0x35   :  { %12 = sbr.rel (!%p10_p5) target bundleno = 2 (0x2), region = 62 }

// kernel: double_conv.7
= control target key start
LH: loop header
LB: loop body
LE: loop exit
PB: predicated region body
PF: predicated region fallthrough
CT: control target
= control target key end

     0   :  { %s548_s12 = smov 0   ;;  %s550_s13 = smov 0   ;;  %s723_s0 = inlined_call_operand.vmem [shape: f32[2,256,128], index: 0, kind: input, shape index: {}]   ;;  %s724_s1 = inlined_call_operand.vmem [shape: f32[1,128], index: 1, kind: input, shape index: {}]   ;;  %s725_s2 = inlined_call_operand.vmem [shape: f32[1,128], index: 2, kind: input, shape index: {}]   ;;  %s726_s3 = inlined_call_operand.vmem [shape: f32[2,256,128], index: 3, kind: output, shape index: {}]  }
   0x1   :  { %s552_s14 = smov 0  }
   0x2 LB: > { %s25_s15 = sadd.s32 1, %s522_s13  ;;  %p469_p0 = scmp.ge.s32.totalorder %s526_s14, 1  ;;  %s526_s14 = sphi %s552_s14, %s13_s14   ;;  %s522_s13 = sphi %s550_s13, %s728_s13   ;;  %s518_s12 = sphi %s548_s12, %s727_s12  }
   0x3   : > { %p27_p1 = scmp.ge.s32.totalorder %s25_s15, 2  ;;  %p158_p2 = scmp.lt.s32.totalorder %s526_s14, 3 }
   0x5   : > { %s730_s15 = smov (%p27_p1, %s25_s15), 0  ;;  %p159_p3 = pnand %p469_p0, %p158_p2 }
   0x6   : > { %p191_p4 = scmp.lt.s32.totalorder (!%p159_p3), %s518_s12, 1 }
   0x7   : > { %162 = sbr.rel (%p159_p3) target bundleno = 54 (0x36), region = 32 }
   0xc   : > { %s732_s12 = smov (!%p191_p4, %s518_s12), 1  ;;  %v569_v0 = vld [vmem:[%s724_s1] ss:$0 sm:$0xff] }
   0xd   : > { %s476_s18 = sshll.u32 %s732_s12, 8  ;;  %v579_v1 = vld [vmem:[%s725_s2] ss:$0 sm:$0xff] }
   0xe   : > { %s574_s21 = scalar_lea.vmem %s723_s0, %s476_s18  ;;  %s602_s26 = scalar_lea.vmem %s726_s3, %s476_s18 }
   0xf   : > { %v210_v2 = vld [vmem:[%s574_s21] sm:$0xff]  ;;  %v211_v3 = vld [vmem:[%s574_s21 + $0x8] sm:$0xff]  ;;  %v212_v4 = vld [vmem:[%s574_s21 + $0x10] sm:$0xff] }
  0x10   : > { %v247_v5 = vmul.f32 %v569_v0, %v210_v2  ;;  %v248_v6 = vmul.f32 %v569_v0, %v211_v3  ;;  %v249_v7 = vmul.f32 %v569_v0, %v212_v4  ;;  %v213_v8 = vld [vmem:[%s574_s21 + $0x18] sm:$0xff]  ;;  %v214_v9 = vld [vmem:[%s574_s21 + $0x20] sm:$0xff]  ;;  %v215_v10 = vld [vmem:[%s574_s21 + $0x28] sm:$0xff] }
  0x11   : > { %v250_v11 = vmul.f32 %v569_v0, %v213_v8  ;;  %v251_v12 = vmul.f32 %v569_v0, %v214_v9  ;;  %v252_v13 = vmul.f32 %v569_v0, %v215_v10  ;;  %v216_v14 = vld [vmem:[%s574_s21 + $0x30] sm:$0xff]  ;;  %v217_v15 = vld [vmem:[%s574_s21 + $0x38] sm:$0xff]  ;;  %v218_v24 = vld [vmem:[%s574_s21 + $0x40] sm:$0xff] }
  0x12   : > { %v282_v16 = vadd.f32 %v579_v1, %v247_v5  ;;  %v283_v17 = vadd.f32 %v579_v1, %v248_v6  ;;  %v284_v18 = vadd.f32 %v579_v1, %v249_v7  ;;  %v253_v19 = vmul.f32 %v569_v0, %v216_v14  ;;  %v219_v25 = vld [vmem:[%s574_s21 + $0x48] sm:$0xff]  ;;  %v220_v26 = vld [vmem:[%s574_s21 + $0x50] sm:$0xff]  ;;  %v221_v31 = vld [vmem:[%s574_s21 + $0x58] sm:$0xff] }
  0x13   : > { %v285_v20 = vadd.f32 %v579_v1, %v250_v11  ;;  %v286_v21 = vadd.f32 %v579_v1, %v251_v12  ;;  %v287_v22 = vadd.f32 %v579_v1, %v252_v13  ;;  %v254_v23 = vmul.f32 %v569_v0, %v217_v15  ;;  %v222_v32 = vld [vmem:[%s574_s21 + $0x60] sm:$0xff]  ;;  %v223_v33 = vld [vmem:[%s574_s21 + $0x68] sm:$0xff]  ;;  %v224_v37 = vld [vmem:[%s574_s21 + $0x70] sm:$0xff] }
  0x14   : > { %v314_v27 = vmax.f32 %v282_v16, 0.0  ;;  %v315_v28 = vmax.f32 %v283_v17, 0.0  ;;  %v316_v29 = vmax.f32 %v284_v18, 0.0  ;;  %v288_v30 = vadd.f32 %v579_v1, %v253_v19  ;;  %v225_v42 = vld [vmem:[%s574_s21 + $0x78] sm:$0xff]  ;;  %v226_v54 = vld [vmem:[%s574_s21 + $0x80] sm:$0xff]  ;;  %v227_v55 = vld [vmem:[%s574_s21 + $0x88] sm:$0xff] }
  0x15   : > { %v317_v34 = vmax.f32 %v285_v20, 0.0  ;;  %v318_v35 = vmax.f32 %v286_v21, 0.0  ;;  %v289_v36 = vadd.f32 %v579_v1, %v254_v23  ;;  %v319_v38 = vmax.f32 %v287_v22, 0.0  ;;  %v228_v56 = vld [vmem:[%s574_s21 + $0x90] sm:$0xff]  ;;  %v229_v59 = vld [vmem:[%s574_s21 + $0x98] sm:$0xff]  ;;  %v230_v63 = vld [vmem:[%s574_s21 + $0xa0] sm:$0xff] }
  0x16   : > { %346 = vst [vmem:[%s602_s26] sm:$0xff] %v314_v27  ;;  %v255_v39 = vmul.f32 %v569_v0, %v218_v24  ;;  %v256_v40 = vmul.f32 %v569_v0, %v219_v25  ;;  %v257_v41 = vmul.f32 %v569_v0, %v220_v26  ;;  %v320_v43 = vmax.f32 %v288_v30, 0.0  ;;  %v231_v6 = vld [vmem:[%s574_s21 + $0xa8] sm:$0xff]  ;;  %v232_v10 = vld [vmem:[%s574_s21 + $0xb0] sm:$0xff]  ;;  %v233_v14 = vld [vmem:[%s574_s21 + $0xb8] sm:$0xff] }
  0x17   : > { %347 = vst [vmem:[%s602_s26 + $0x8] sm:$0xff] %v315_v28  ;;  %v258_v44 = vmul.f32 %v569_v0, %v221_v31  ;;  %v259_v45 = vmul.f32 %v569_v0, %v222_v32  ;;  %v260_v46 = vmul.f32 %v569_v0, %v223_v33  ;;  %v261_v50 = vmul.f32 %v569_v0, %v224_v37  ;;  %v234_v18 = vld [vmem:[%s574_s21 + $0xc0] sm:$0xff]  ;;  %v235_v22 = vld [vmem:[%s574_s21 + $0xc8] sm:$0xff]  ;;  %v236_v26 = vld [vmem:[%s574_s21 + $0xd0] sm:$0xff] }
  0x18   : > { %348 = vst [vmem:[%s602_s26 + $0x10] sm:$0xff] %v316_v29  ;;  %v290_v47 = vadd.f32 %v579_v1, %v255_v39  ;;  %v291_v48 = vadd.f32 %v579_v1, %v256_v40  ;;  %v292_v49 = vadd.f32 %v579_v1, %v257_v41  ;;  %v321_v51 = vmax.f32 %v289_v36, 0.0  ;;  %v237_v30 = vld [vmem:[%s574_s21 + $0xd8] sm:$0xff] }
  0x19   : > { %349 = vst [vmem:[%s602_s26 + $0x18] sm:$0xff] %v317_v34  ;;  %v293_v52 = vadd.f32 %v579_v1, %v258_v44  ;;  %v262_v53 = vmul.f32 %v569_v0, %v225_v42  ;;  %v294_v58 = vadd.f32 %v579_v1, %v259_v45  ;;  %v295_v62 = vadd.f32 %v579_v1, %v260_v46  ;;  %v238_v34 = vld [vmem:[%s574_s21 + $0xe0] sm:$0xff]  ;;  %v240_v42 = vld [vmem:[%s574_s21 + $0xf0] sm:$0xff]  ;;  %v241_v46 = vld [vmem:[%s574_s21 + $0xf8] sm:$0xff] }
  0x1a   : > { %350 = vst [vmem:[%s602_s26 + $0x20] sm:$0xff] %v318_v35  ;;  %v322_v57 = vmax.f32 %v290_v47, 0.0  ;;  %v323_v60 = vmax.f32 %v291_v48, 0.0  ;;  %v324_v61 = vmax.f32 %v292_v49, 0.0  ;;  %v296_v2 = vadd.f32 %v579_v1, %v261_v50 }
  0x1b   : > { %351 = vst [vmem:[%s602_s26 + $0x28] sm:$0xff] %v319_v38  ;;  %v263_v3 = vmul.f32 %v569_v0, %v226_v54  ;;  %v264_v4 = vmul.f32 %v569_v0, %v227_v55  ;;  %v265_v5 = vmul.f32 %v569_v0, %v228_v56  ;;  %v325_v7 = vmax.f32 %v293_v52, 0.0  ;;  %v239_v38 = vld [vmem:[%s574_s21 + $0xe8] sm:$0xff] }
  0x1c   : > { %352 = vst [vmem:[%s602_s26 + $0x30] sm:$0xff] %v320_v43  ;;  %v297_v8 = vadd.f32 %v579_v1, %v262_v53  ;;  %v266_v9 = vmul.f32 %v569_v0, %v229_v59  ;;  %v326_v11 = vmax.f32 %v294_v58, 0.0  ;;  %v267_v13 = vmul.f32 %v569_v0, %v230_v63 }
  0x1d   : > { %353 = vst [vmem:[%s602_s26 + $0x38] sm:$0xff] %v321_v51  ;;  %v298_v12 = vadd.f32 %v579_v1, %v263_v3  ;;  %v327_v15 = vmax.f32 %v295_v62, 0.0  ;;  %v299_v16 = vadd.f32 %v579_v1, %v264_v4  ;;  %v268_v17 = vmul.f32 %v569_v0, %v231_v6 }
  0x1e   : > { %354 = vst [vmem:[%s602_s26 + $0x40] sm:$0xff] %v322_v57  ;;  %v328_v19 = vmax.f32 %v296_v2, 0.0  ;;  %v300_v20 = vadd.f32 %v579_v1, %v265_v5  ;;  %v269_v21 = vmul.f32 %v569_v0, %v232_v10  ;;  %v329_v23 = vmax.f32 %v297_v8, 0.0 }
  0x1f   : > { %355 = vst [vmem:[%s602_s26 + $0x48] sm:$0xff] %v323_v60  ;;  %v301_v24 = vadd.f32 %v579_v1, %v266_v9  ;;  %v270_v25 = vmul.f32 %v569_v0, %v233_v14  ;;  %v330_v27 = vmax.f32 %v298_v12, 0.0  ;;  %v302_v28 = vadd.f32 %v579_v1, %v267_v13 }
  0x20   : > { %356 = vst [vmem:[%s602_s26 + $0x50] sm:$0xff] %v324_v61  ;;  %v271_v29 = vmul.f32 %v569_v0, %v234_v18  ;;  %v331_v31 = vmax.f32 %v299_v16, 0.0  ;;  %v303_v32 = vadd.f32 %v579_v1, %v268_v17  ;;  %v272_v33 = vmul.f32 %v569_v0, %v235_v22 }
  0x21   : > { %357 = vst [vmem:[%s602_s26 + $0x58] sm:$0xff] %v325_v7  ;;  %v332_v35 = vmax.f32 %v300_v20, 0.0  ;;  %v304_v36 = vadd.f32 %v579_v1, %v269_v21  ;;  %v273_v37 = vmul.f32 %v569_v0, %v236_v26  ;;  %v333_v39 = vmax.f32 %v301_v24, 0.0 }
  0x22   : > { %358 = vst [vmem:[%s602_s26 + $0x60] sm:$0xff] %v326_v11  ;;  %v305_v40 = vadd.f32 %v579_v1, %v270_v25  ;;  %v274_v41 = vmul.f32 %v569_v0, %v237_v30  ;;  %v334_v43 = vmax.f32 %v302_v28, 0.0  ;;  %v306_v44 = vadd.f32 %v579_v1, %v271_v29 }
  0x23   : > { %359 = vst [vmem:[%s602_s26 + $0x68] sm:$0xff] %v327_v15  ;;  %v275_v45 = vmul.f32 %v569_v0, %v238_v34  ;;  %v335_v47 = vmax.f32 %v303_v32, 0.0  ;;  %v307_v48 = vadd.f32 %v579_v1, %v272_v33  ;;  %v276_v49 = vmul.f32 %v569_v0, %v239_v38 }
  0x24   : > { %360 = vst [vmem:[%s602_s26 + $0x70] sm:$0xff] %v328_v19  ;;  %v336_v50 = vmax.f32 %v304_v36, 0.0  ;;  %v308_v51 = vadd.f32 %v579_v1, %v273_v37  ;;  %v277_v52 = vmul.f32 %v569_v0, %v240_v42  ;;  %v337_v53 = vmax.f32 %v305_v40, 0.0 }
  0x25   : > { %361 = vst [vmem:[%s602_s26 + $0x78] sm:$0xff] %v329_v23  ;;  %v309_v54 = vadd.f32 %v579_v1, %v274_v41  ;;  %v278_v55 = vmul.f32 %v569_v0, %v241_v46  ;;  %v338_v56 = vmax.f32 %v306_v44, 0.0  ;;  %v310_v57 = vadd.f32 %v579_v1, %v275_v45 }
  0x26   : > { %362 = vst [vmem:[%s602_s26 + $0x80] sm:$0xff] %v330_v27  ;;  %v339_v58 = vmax.f32 %v307_v48, 0.0  ;;  %v311_v59 = vadd.f32 %v579_v1, %v276_v49  ;;  %v340_v60 = vmax.f32 %v308_v51, 0.0  ;;  %v312_v61 = vadd.f32 %v579_v1, %v277_v52 }
  0x27   : > { %363 = vst [vmem:[%s602_s26 + $0x88] sm:$0xff] %v331_v31  ;;  %v341_v0 = vmax.f32 %v309_v54, 0.0  ;;  %v313_v62 = vadd.f32 %v579_v1, %v278_v55  ;;  %v342_v63 = vmax.f32 %v310_v57, 0.0 }
  0x28   : > { %364 = vst [vmem:[%s602_s26 + $0x90] sm:$0xff] %v332_v35  ;;  %v343_v2 = vmax.f32 %v311_v59, 0.0  ;;  %v344_v3 = vmax.f32 %v312_v61, 0.0 }
  0x29   : > { %365 = vst [vmem:[%s602_s26 + $0x98] sm:$0xff] %v333_v39  ;;  %v345_v4 = vmax.f32 %v313_v62, 0.0 }
  0x2a   : > { %366 = vst [vmem:[%s602_s26 + $0xa0] sm:$0xff] %v334_v43 }
  0x2b   : > { %367 = vst [vmem:[%s602_s26 + $0xa8] sm:$0xff] %v335_v47 }
  0x2c   : > { %368 = vst [vmem:[%s602_s26 + $0xb0] sm:$0xff] %v336_v50 }
  0x2d   : > { %369 = vst [vmem:[%s602_s26 + $0xb8] sm:$0xff] %v337_v53 }
  0x2e   : > { %370 = vst [vmem:[%s602_s26 + $0xc0] sm:$0xff] %v338_v56 }
  0x2f   : > { %371 = vst [vmem:[%s602_s26 + $0xc8] sm:$0xff] %v339_v58 }
  0x30   : > { %372 = vst [vmem:[%s602_s26 + $0xd0] sm:$0xff] %v340_v60 }
  0x31   : > { %373 = vst [vmem:[%s602_s26 + $0xd8] sm:$0xff] %v341_v0 }
  0x32   : > { %374 = vst [vmem:[%s602_s26 + $0xe0] sm:$0xff] %v342_v63 }
  0x33   : > { %375 = vst [vmem:[%s602_s26 + $0xe8] sm:$0xff] %v343_v2 }
  0x34   : > { %376 = vst [vmem:[%s602_s26 + $0xf0] sm:$0xff] %v344_v3 }
  0x35   : > { %377 = vst [vmem:[%s602_s26 + $0xf8] sm:$0xff] %v345_v4 }
  0x36 PF: > { %s13_s14 = sadd.s32 1, %s526_s14   ;;  %s727_s12 = smov %s522_s13 }
  0x37   : > { %p10_p5 = scmp.ge.s32.totalorder %s13_s14, 4   ;;  %s728_s13 = smov %s730_s15 }
  0x39   :  { %12 = sbr.rel (!%p10_p5) target bundleno = 2 (0x2), region = 62 }

// kernel: double_conv.4
= control target key start
LH: loop header
LB: loop body
LE: loop exit
PB: predicated region body
PF: predicated region fallthrough
CT: control target
= control target key end

     0   :  { %s5719_s15 = smov 0   ;;  %s7130_s0 = inlined_call_operand.vmem [shape: bf16[2,18,18,128], index: 0, kind: input, shape index: {}]   ;;  %s7131_s1 = inlined_call_operand.vmem [shape: bf16[9,128,128], index: 1, kind: input, shape index: {}]   ;;  %s7132_s2 = inlined_call_operand.vmem [shape: f32[2,256,128], index: 2, kind: output, shape index: {0}]   ;;  %s7133_s3 = inlined_call_operand.vmem [shape: f32[2,1,128], index: 3, kind: output, shape index: {1}]   ;;  %s7134_s4 = inlined_call_operand.vmem [shape: f32[2,1,128], index: 4, kind: output, shape index: {2}]  }
   0x1 LB: > { %s4621_s16 = sadd.s32 4294967295, %s5692_s15   ;;  %p4625_p0 = scmp.ge.s32.totalorder %s5692_s15, 1  ;;  %s5692_s15 = sphi %s5719_s15, %s15_s15  }
   0x2   : > { %p167_p1 = scmp.lt.s32.totalorder %s5692_s15, 3 }
   0x4   : > { %p168_p2 = pnand %p4625_p0, %p167_p1 }
   0x6   : > { %171 = sbr.rel (%p168_p2) target bundleno = 770 (0x302), region = 28 }
   0xb   : > { %v5511_v0 = vld [vmem:[%s7131_s1 + $0x78] sm:$0xff]  ;;  %p199_p3 = scmp.lt.s32.totalorder %s4621_s16, 1  ;;  %v5510_v1 = vld [vmem:[%s7131_s1 + $0x70] sm:$0xff]  ;;  %v5509_v2 = vld [vmem:[%s7131_s1 + $0x68] sm:$0xff]  ;;  %vm279_vm0 = vsmask.f32 3328 }
   0xc   : > { %5600 = vmatpush.bf16.msra.mxu1 %v5511_v0  ;;  %5601 = vmatpush.bf16.msra.mxu2 %v5511_v0  ;;  %vm280_vm1 = vsmask.f32 7440  ;;  %v5508_v6 = vld [vmem:[%s7131_s1 + $0x60] sm:$0xff]  ;;  %v5507_v35 = vld [vmem:[%s7131_s1 + $0x58] sm:$0xff]  ;;  %v5506_v54 = vld [vmem:[%s7131_s1 + $0x50] sm:$0xff]  ;;  %vm1165_vm3 = vcmask 1042432  }
   0xd   : > { %s7144_s16 = smov (!%p199_p3, %s4621_s16), 1  ;;  %5602 = vmatpush.bf16.msra.mxu3 %v5511_v0  ;;  %795 = vmatpush.bf16.msra.mxu0 %v5511_v0  ;;  %vm5757_vm2 = vmor %vm279_vm0, %vm280_vm1  ;;  %vm1166_vm4 = vcmask 1046532  }
   0xe   : > { %s5624_s21 = smul.u32 216, %s7144_s16  ;;  %vm6057_vm5 = vmor %vm1165_vm3, %vm1166_vm4  ;;  %s5479_s27 = sshll.u32 %s7144_s16, 8 }
   0xf   : > { %s6893_s30 = scalar_lea.vmem %s7132_s2, %s5479_s27  ;;  %s211_s6 = scalar_lea.vmem %s7133_s3, %s7144_s16 }
  0x10   : > { %5603 = vmatpush.bf16.msra.mxu1 %v5510_v1  ;;  %5604 = vmatpush.bf16.msra.mxu2 %v5510_v1  ;;  %s5742_s26 = scalar_lea.vmem %s7130_s0, %s5624_s21  ;;  %s214_s9 = scalar_lea.vmem %s7134_s4, %s7144_s16 }
  0x11   : > { %5605 = vmatpush.bf16.msra.mxu3 %v5510_v1  ;;  %796 = vmatpush.bf16.msra.mxu0 %v5510_v1  ;;  %v223_v3 = vld [vmem:[%s5742_s26 + $0x30] sm:$0xf]  ;;  %v224_v4 = vld [vmem:[%s5742_s26 + $0x34] sm:$0xf]  ;;  %v267_v5 = vld [vmem:[%s5742_s26 + $0x38] sm:$0x1] }
  0x12   : > { %v379_v7 = vshrl.u32 %v223_v3, 16  ;;  %v382_v8 = vshll.u32 %v223_v3, 16  ;;  %v388_v9 = vshll.u32 %v224_v4, 16  ;;  %v392_v10 = vshrl.u32 %v224_v4, 16  ;;  %v231_v11 = vld [vmem:[%s5742_s26 + $0x60] sm:$0xf] }
  0x13   : > { %v398_v12 = vshll.u32 %v267_v5, 16  ;;  %v232_v13 = vld [vmem:[%s5742_s26 + $0x64] sm:$0xf]  ;;  %v271_v14 = vld [vmem:[%s5742_s26 + $0x68] sm:$0x1]  ;;  %v475_v15 = vshrl.u32 %v231_v11, 16 }
  0x14   : > { %5606 = vmatpush.bf16.msra.mxu1 %v5509_v2  ;;  %5607 = vmatpush.bf16.msra.mxu2 %v5509_v2  ;;  %v381_v16 = vrot.slane %v379_v7, 4  ;;  %v384_v17 = vrot.slane %v382_v8, 5  ;;  %v390_v18 = vrot.slane %v388_v9, 5  ;;  %v394_v19 = vrot.slane %v392_v10, 4  ;;  %v239_v20 = vld [vmem:[%s5742_s26 + $0x90] sm:$0xf] }
  0x15   : > { %5608 = vmatpush.bf16.msra.mxu3 %v5509_v2  ;;  %797 = vmatpush.bf16.msra.mxu0 %v5509_v2  ;;  %v400_v21 = vrot.slane %v398_v12, 5  ;;  %v477_v22 = vrot.slane %v475_v15, 4  ;;  %v478_v23 = vshll.u32 %v231_v11, 16  ;;  %v484_v24 = vshll.u32 %v232_v13, 16  ;;  %v240_v29 = vld [vmem:[%s5742_s26 + $0x94] sm:$0xf] }
  0x16   : > { %v385_v25 = vor.u32 %v384_v17, %v381_v16  ;;  %v395_v26 = vor.u32 %v394_v19, %v390_v18  ;;  %v488_v27 = vshrl.u32 %v232_v13, 16  ;;  %v494_v28 = vshll.u32 %v271_v14, 16  ;;  %v275_v41 = vld [vmem:[%s5742_s26 + $0x98] sm:$0x1]  ;;  %v215_v49 = vld [vmem:[%s5742_s26] sm:$0xf] }
  0x17   : > { %v480_v31 = vrot.slane %v478_v23, 5  ;;  %v486_v32 = vrot.slane %v484_v24, 5  ;;  %v571_v33 = vshrl.u32 %v239_v20, 16  ;;  %v574_v34 = vshll.u32 %v239_v20, 16  ;;  %v5782_v62 = vld [vmem:[%s5742_s26 + $0x4] sm:$0xf] }
  0x18   : > { %5609 = vmatpush.bf16.msra.mxu1 %v5508_v6  ;;  %5610 = vmatpush.bf16.msra.mxu2 %v5508_v6  ;;  %v386_v36 = vrot.slane %v385_v25, 4  ;;  %v396_v37 = vrot.slane %v395_v26, 4  ;;  %v490_v38 = vrot.slane %v488_v27, 4  ;;  %v496_v39 = vrot.slane %v494_v28, 5  ;;  %v5789_v4 = vld [vmem:[%s5742_s26 + $0x8] sm:$0x1] }
  0x19   : > { %5611 = vmatpush.bf16.msra.mxu3 %v5508_v6  ;;  %798 = vmatpush.bf16.msra.mxu0 %v5508_v6  ;;  %v481_v40 = vor.u32 %v480_v31, %v477_v22  ;;  %v573_v42 = vrot.slane %v571_v33, 4  ;;  %v576_v43 = vrot.slane %v574_v34, 5  ;;  %v580_v44 = vshll.u32 %v240_v29, 16  ;;  %v225_v5 = vld [vmem:[%s5742_s26 + $0x3c] sm:$0xf]  ;;  %v5505_v10 = vld [vmem:[%s7131_s1 + $0x48] sm:$0xff] }
  0x1a   : > { %v391_v45 = vsel %vm5757_vm2, %v386_v36, %v390_v18  ;;  %v401_v46 = vsel %vm5757_vm2, %v396_v37, %v400_v21  ;;  %v491_v47 = vor.u32 %v490_v38, %v486_v32  ;;  %v584_v48 = vshrl.u32 %v240_v29, 16  ;;  %v226_v15 = vld [vmem:[%s5742_s26 + $0x40] sm:$0xf]  ;;  %v268_v19 = vld [vmem:[%s5742_s26 + $0x44] sm:$0x1]  ;;  %v5519_v37 = vld [vmem:[%s7131_s1 + $0xb8] sm:$0xff] }
  0x1b   : > { %v5770_v50 = vunpack.c.l.b16 %v391_v45  ;;  %v5772_v51 = vunpack.c.l.b16 %v401_v46  ;;  %v482_v52 = vrot.slane %v481_v40, 4  ;;  %v577_v53 = vor.u32 %v576_v43, %v573_v42  ;;  %v233_v25 = vld [vmem:[%s5742_s26 + $0x6c] sm:$0xf]  ;;  %v5504_v31 = vld [vmem:[%s7131_s1 + $0x40] sm:$0xff]  ;;  %v234_v40 = vld [vmem:[%s5742_s26 + $0x70] sm:$0xf] }
  0x1c   : > { %5612 = vmatpush.bf16.msra.mxu1 %v5507_v35  ;;  %5613 = vmatpush.bf16.msra.mxu2 %v5507_v35  ;;  %v492_v55 = vrot.slane %v491_v47, 4  ;;  %v582_v56 = vrot.slane %v580_v44, 5  ;;  %v586_v57 = vrot.slane %v584_v48, 4  ;;  %v590_v58 = vshll.u32 %v275_v41, 16  ;;  %v5543_v43 = vld [vmem:[%s7131_s1 + $0xf8] sm:$0xff] }
  0x1d   : > { %5614 = vmatpush.bf16.msra.mxu3 %v5507_v35  ;;  %799 = vmatpush.bf16.msra.mxu0 %v5507_v35  ;;  %v719_v59 = vpack.c.b16 %v5772_v51, %v5770_v50  ;;  %v487_v60 = vsel %vm5757_vm2, %v482_v52, %v486_v32  ;;  %v578_v61 = vrot.slane %v577_v53, 4  ;;  %v283_v63 = vshrl.u32 %v215_v49, 16  ;;  %v272_v47 = vld [vmem:[%s5742_s26 + $0x74] sm:$0x1] }
  0x1e   : > { %v497_v0 = vsel %vm5757_vm2, %v492_v55, %v496_v39  ;;  %v5786_v1 = vunpack.c.l.b16 %v487_v60  ;;  %v587_v2 = vor.u32 %v586_v57, %v582_v56  ;;  %v592_v3 = vrot.slane %v590_v58, 5  ;;  %v5503_v57 = vld [vmem:[%s7131_s1 + $0x38] sm:$0xff] }
  0x1f   : > { %v5792_v6 = vunpack.c.l.b16 %v497_v0  ;;  %v583_v7 = vsel %vm5757_vm2, %v578_v61, %v582_v56  ;;  %v285_v8 = vrot.slane %v283_v63, 4  ;;  %v286_v9 = vshll.u32 %v215_v49, 16  ;;  %v5518_v63 = vld [vmem:[%s7131_s1 + $0xb0] sm:$0xff] }
  0x20   : > { %5615 = vmatpush.bf16.msra.mxu1 %v5506_v54  ;;  %5616 = vmatpush.bf16.msra.mxu2 %v5506_v54  ;;  %v588_v11 = vrot.slane %v587_v2, 4  ;;  %v5799_v12 = vunpack.c.l.b16 %v583_v7  ;;  %v292_v13 = vshll.u32 %v5782_v62, 16  ;;  %v296_v14 = vshrl.u32 %v5782_v62, 16 }
  0x21   : > { %5617 = vmatpush.bf16.msra.mxu3 %v5506_v54  ;;  %800 = vmatpush.bf16.msra.mxu0 %v5506_v54  ;;  %v723_v16 = vpack.c.b16 %v5792_v6, %v5786_v1  ;;  %v288_v17 = vrot.slane %v286_v9, 5  ;;  %v302_v18 = vshll.u32 %v5789_v4, 16  ;;  %v403_v20 = vshrl.u32 %v225_v5, 16  ;;  %v241_v54 = vld [vmem:[%s5742_s26 + $0x9c] sm:$0xf] }
  0x22   : > { %v593_v21 = vsel %vm5757_vm2, %v588_v11, %v592_v3  ;;  %v294_v22 = vrot.slane %v292_v13, 5  ;;  %v298_v23 = vrot.slane %v296_v14, 4  ;;  %v406_v24 = vshll.u32 %v225_v5, 16  ;;  %v5542_v3 = vld [vmem:[%s7131_s1 + $0xf0] sm:$0xff]  ;;  %v5551_v11 = vld [vmem:[%s7131_s1 + $0x138] sm:$0xff] }
  0x23   : > { %v708_v26 = vunpack.c.l.b16 %v593_v21  ;;  %v289_v27 = vor.u32 %v288_v17, %v285_v8  ;;  %v304_v28 = vrot.slane %v302_v18, 5  ;;  %v405_v29 = vrot.slane %v403_v20, 4  ;;  %v242_v8 = vld [vmem:[%s5742_s26 + $0xa0] sm:$0xf]  ;;  %v217_v17 = vld [vmem:[%s5742_s26 + $0xc] sm:$0xf] }
  0x24   : > { %5618 = vmatpush.bf16.msra.mxu1 %v5505_v10  ;;  %5619 = vmatpush.bf16.msra.mxu2 %v5505_v10  ;;  %v299_v32 = vor.u32 %v298_v23, %v294_v22  ;;  %v408_v33 = vrot.slane %v406_v24, 5  ;;  %v412_v34 = vshll.u32 %v226_v15, 16  ;;  %v416_v35 = vshrl.u32 %v226_v15, 16  ;;  %v276_v15 = vld [vmem:[%s5742_s26 + $0xa4] sm:$0x1]  ;;  %v5502_v18 = vld [vmem:[%s7131_s1 + $0x30] sm:$0xff] }
  0x25   : > { %5620 = vmatpush.bf16.msra.mxu3 %v5505_v10  ;;  %801 = vmatpush.bf16.msra.mxu0 %v5505_v10  ;;  %v727_v36 = vpack.c.b16 %v708_v26, %v5799_v12  ;;  %v290_v38 = vrot.slane %v289_v27, 4  ;;  %v422_v39 = vshll.u32 %v268_v19, 16  ;;  %v499_v41 = vshrl.u32 %v233_v25, 16  ;;  %v5517_v23 = vld [vmem:[%s7131_s1 + $0xa8] sm:$0xff]  ;;  %v5861_v27 = vld [vmem:[%s5742_s26 + $0x10] sm:$0xf] }
  0x26   : > { %v300_v42 = vrot.slane %v299_v32, 4  ;;  %v409_v44 = vor.u32 %v408_v33, %v405_v29  ;;  %v414_v45 = vrot.slane %v412_v34, 5  ;;  %v418_v46 = vrot.slane %v416_v35, 4  ;;  %v5541_v29 = vld [vmem:[%s7131_s1 + $0xe8] sm:$0xff]  ;;  %v5871_v35 = vld [vmem:[%s5742_s26 + $0x14] sm:$0x1] }
  0x27   : > { %v295_v48 = vsel %vm5757_vm2, %v290_v38, %v294_v22  ;;  %v424_v49 = vrot.slane %v422_v39, 5  ;;  %v501_v52 = vrot.slane %v499_v41, 4  ;;  %v502_v53 = vshll.u32 %v233_v25, 16  ;;  %v5501_v41 = vld [vmem:[%s7131_s1 + $0x28] sm:$0xff] }
  0x28   : > { %5621 = vmatpush.bf16.msra.mxu1 %v5504_v31  ;;  %5622 = vmatpush.bf16.msra.mxu2 %v5504_v31  ;;  %v305_v55 = vsel %vm5757_vm2, %v300_v42, %v304_v28  ;;  %v683_v56 = vunpack.c.l.b16 %v295_v48  ;;  %v410_v58 = vrot.slane %v409_v44, 4  ;;  %v419_v60 = vor.u32 %v418_v46, %v414_v45  ;;  %v227_v46 = vld [vmem:[%s5742_s26 + $0x48] sm:$0xf] }
  0x29   : > { %5623 = vmatpush.bf16.msra.mxu3 %v5504_v31  ;;  %802 = vmatpush.bf16.msra.mxu0 %v5504_v31  ;;  %v684_v61 = vunpack.c.l.b16 %v305_v55  ;;  %v504_v0 = vrot.slane %v502_v53, 5  ;;  %v508_v1 = vshll.u32 %v234_v40, 16  ;;  %v512_v2 = vshrl.u32 %v234_v40, 16  ;;  %v5516_v53 = vld [vmem:[%s7131_s1 + $0xa0] sm:$0xff] }
  0x2a   : > { %v415_v5 = vsel %vm5757_vm2, %v410_v58, %v414_v45  ;;  %v420_v6 = vrot.slane %v419_v60, 4  ;;  %v518_v7 = vshll.u32 %v272_v47, 16  ;;  %v595_v9 = vshrl.u32 %v241_v54, 16  ;;  %v5549_v60 = vld [vmem:[%s7131_s1 + $0x128] sm:$0xff] }
  0x2b   : > { %823 = vmatmul.bf16.vlgmr.msra.gmra.mxu1 %v719_v59  ;;  %843 = vmatmul.bf16.vlgmr.msra.gmra.mxu2 %v723_v16  ;;  %v715_v10 = vpack.c.b16 %v684_v61, %v683_v56  ;;  %v5846_v12 = vunpack.c.l.b16 %v415_v5  ;;  %v505_v13 = vor.u32 %v504_v0, %v501_v52  ;;  %v510_v14 = vrot.slane %v508_v1, 5  ;;  %v5500_v61 = vld [vmem:[%s7131_s1 + $0x20] sm:$0xff] }
  0x2c   : > { %1409 = vmatpush.bf16.msrb.mxu2 %v5519_v37  ;;  %863 = vmatmul.bf16.vlgmr.msra.gmra.mxu3 %v727_v36  ;;  %v425_v50 = vsel %vm5757_vm2, %v420_v6, %v424_v49  ;;  %v514_v51 = vrot.slane %v512_v2, 4  ;;  %v520_v59 = vrot.slane %v518_v7, 5  ;;  %v597_v16 = vrot.slane %v595_v9, 4  ;;  %v5550_v36 = vld [vmem:[%s7131_s1 + $0x130] sm:$0xff]  ;;  %v5900_v2 = vld [vmem:[%s5742_s26 + $0x4c] sm:$0xf] }
  0x2d   : > { %1724 = vmatpush.bf16.msrb.mxu3 %v5543_v43  ;;  %1028 = vmatpush.bf16.msrb.mxu1 %v5503_v57  ;;  %v5855_v19 = vunpack.c.l.b16 %v425_v50  ;;  %v506_v20 = vrot.slane %v505_v13, 4  ;;  %v598_v21 = vshll.u32 %v241_v54, 16  ;;  %v604_v22 = vshll.u32 %v242_v8, 16  ;;  %v5540_v54 = vld [vmem:[%s7131_s1 + $0xe0] sm:$0xff] }
  0x2e   : > { %803 = vmatmul.bf16.vlgmr.msra.gmra.mxu0 %v715_v10  ;;  %v515_v24 = vor.u32 %v514_v51, %v510_v14  ;;  %v608_v25 = vshrl.u32 %v242_v8, 16  ;;  %v614_v26 = vshll.u32 %v276_v15, 16  ;;  %v307_v28 = vshrl.u32 %v217_v17, 16  ;;  %v269_v8 = vld [vmem:[%s5742_s26 + $0x50] sm:$0x1] }
  0x2f   : > { %2406 = vmatpush.bf16.msrb.mxu0 %v5551_v11  ;;  %v720_v31 = vpack.c.b16 %v5855_v19, %v5846_v12  ;;  %v511_v32 = vsel %vm5757_vm2, %v506_v20, %v510_v14  ;;  %v600_v33 = vrot.slane %v598_v21, 5  ;;  %v606_v34 = vrot.slane %v604_v22, 5  ;;  %v235_v10 = vld [vmem:[%s5742_s26 + $0x78] sm:$0xf] }
  0x30   : > { %1410 = vmatpush.bf16.msrb.mxu2 %v5518_v63  ;;  %v516_v37 = vrot.slane %v515_v24, 4  ;;  %v5876_v38 = vunpack.c.l.b16 %v511_v32  ;;  %v610_v39 = vrot.slane %v608_v25, 4  ;;  %v616_v40 = vrot.slane %v614_v26, 5  ;;  %v5548_v24 = vld [vmem:[%s7131_s1 + $0x120] sm:$0xff]  ;;  %v236_v32 = vld [vmem:[%s5742_s26 + $0x7c] sm:$0xf] }
  0x31   : > { %1725 = vmatpush.bf16.msrb.mxu3 %v5542_v3  ;;  %1029 = vmatpush.bf16.msrb.mxu1 %v5502_v18  ;;  %v601_v42 = vor.u32 %v600_v33, %v597_v16  ;;  %v309_v43 = vrot.slane %v307_v28, 4  ;;  %v310_v44 = vshll.u32 %v217_v17, 16  ;;  %v316_v45 = vshll.u32 %v5861_v27, 16  ;;  %v5515_v17 = vld [vmem:[%s7131_s1 + $0x98] sm:$0xff]  ;;  %v273_v33 = vld [vmem:[%s5742_s26 + $0x80] sm:$0x1] }
  0x32   : > { %v521_v47 = vsel %vm5757_vm2, %v516_v37, %v520_v59  ;;  %v611_v48 = vor.u32 %v610_v39, %v606_v34  ;;  %v320_v49 = vshrl.u32 %v5861_v27, 16  ;;  %v326_v52 = vshll.u32 %v5871_v35, 16  ;;  %v5539_v18 = vld [vmem:[%s7131_s1 + $0xd8] sm:$0xff] }
  0x33   : > { %v702_v55 = vunpack.c.l.b16 %v521_v47  ;;  %v602_v56 = vrot.slane %v601_v42, 4  ;;  %v312_v57 = vrot.slane %v310_v44, 5  ;;  %v318_v58 = vrot.slane %v316_v45, 5  ;;  %2407 = vmatpush.bf16.msrb.mxu0 %v5550_v36  ;;  %v5538_v42 = vld [vmem:[%s7131_s1 + $0xd0] sm:$0xff] }
  0x34   : > { %1411 = vmatpush.bf16.msrb.mxu2 %v5517_v23  ;;  %v612_v63 = vrot.slane %v611_v48, 4  ;;  %v322_v0 = vrot.slane %v320_v49, 4  ;;  %v328_v1 = vrot.slane %v326_v52, 5  ;;  %v427_v3 = vshrl.u32 %v227_v46, 16 }
  0x35   : > { %1726 = vmatpush.bf16.msrb.mxu3 %v5541_v29  ;;  %1030 = vmatpush.bf16.msrb.mxu1 %v5501_v41  ;;  %v724_v5 = vpack.c.b16 %v702_v55, %v5876_v38  ;;  %v607_v6 = vsel %vm5757_vm2, %v602_v56, %v606_v34  ;;  %v313_v7 = vor.u32 %v312_v57, %v309_v43  ;;  %v430_v9 = vshll.u32 %v227_v46, 16  ;;  %v5499_v34 = vld [vmem:[%s7131_s1 + $0x18] sm:$0xff]  ;;  %v5514_v41 = vld [vmem:[%s7131_s1 + $0x90] sm:$0xff] }
  0x36   : > { %v617_v11 = vsel %vm5757_vm2, %v612_v63, %v616_v40  ;;  %v709_v13 = vunpack.c.l.b16 %v607_v6  ;;  %v323_v14 = vor.u32 %v322_v0, %v318_v58  ;;  %v429_v15 = vrot.slane %v427_v3, 4  ;;  %v243_v40 = vld [vmem:[%s5742_s26 + $0xa8] sm:$0xf]  ;;  %v5498_v56 = vld [vmem:[%s7131_s1 + $0x10] sm:$0xff]  ;;  %v219_v6 = vld [vmem:[%s5742_s26 + $0x18] sm:$0xf] }
  0x37   : > { %v710_v50 = vunpack.c.l.b16 %v617_v11  ;;  %v314_v51 = vrot.slane %v313_v7, 4  ;;  %2408 = vmatpush.bf16.msrb.mxu0 %v5549_v60  ;;  %v432_v59 = vrot.slane %v430_v9, 5  ;;  %v436_v16 = vshll.u32 %v5900_v2, 16  ;;  %v277_v63 = vld [vmem:[%s5742_s26 + $0xb0] sm:$0x1] }
  0x38   : > { %1412 = vmatpush.bf16.msrb.mxu2 %v5516_v53  ;;  %v324_v20 = vrot.slane %v323_v14, 4  ;;  %v440_v21 = vshrl.u32 %v5900_v2, 16  ;;  %v446_v22 = vshll.u32 %v269_v8, 16  ;;  %v523_v23 = vshrl.u32 %v235_v10, 16  ;;  %v5547_v53 = vld [vmem:[%s7131_s1 + $0x118] sm:$0xff] }
  0x39   : > { %1727 = vmatpush.bf16.msrb.mxu3 %v5540_v54  ;;  %1031 = vmatpush.bf16.msrb.mxu1 %v5500_v61  ;;  %v728_v25 = vpack.c.b16 %v710_v50, %v709_v13  ;;  %v319_v26 = vsel %vm5757_vm2, %v314_v51, %v318_v58  ;;  %v433_v28 = vor.u32 %v432_v59, %v429_v15  ;;  %v438_v29 = vrot.slane %v436_v16, 5  ;;  %v5958_v59 = vld [vmem:[%s5742_s26 + $0x1c] sm:$0xf] }
  0x3a   : > { %v329_v36 = vsel %vm5757_vm2, %v324_v20, %v328_v1  ;;  %v685_v37 = vunpack.c.l.b16 %v319_v26  ;;  %v442_v38 = vrot.slane %v440_v21, 4  ;;  %v448_v39 = vrot.slane %v446_v22, 5 }
  0x3b   : > { %828 = vmatmul.bf16.gmra.mxu1 %v720_v31  ;;  %848 = vmatmul.bf16.gmra.mxu2 %v724_v5  ;;  %v686_v43 = vunpack.c.l.b16 %v329_v36  ;;  %v434_v44 = vrot.slane %v433_v28, 4  ;;  %v525_v45 = vrot.slane %v523_v23, 4  ;;  %v526_v46 = vshll.u32 %v235_v10, 16  ;;  %v244_v31 = vld [vmem:[%s5742_s26 + $0xac] sm:$0xf] }
  0x3c   : > { %1413 = vmatpush.bf16.msrb.mxu2 %v5515_v17  ;;  %868 = vmatmul.bf16.gmra.mxu3 %v728_v25  ;;  %v443_v47 = vor.u32 %v442_v38, %v438_v29  ;;  %v532_v48 = vshll.u32 %v236_v32, 16  ;;  %v536_v49 = vshrl.u32 %v236_v32, 16  ;;  %v542_v52 = vshll.u32 %v273_v33, 16  ;;  %v5513_v17 = vld [vmem:[%s7131_s1 + $0x88] sm:$0xff]  ;;  %v229_v25 = vld [vmem:[%s5742_s26 + $0x54] sm:$0xf] }
  0x3d   : > { %1728 = vmatpush.bf16.msrb.mxu3 %v5539_v18  ;;  %2409 = vmatpush.bf16.msrb.mxu0 %v5548_v24  ;;  %v716_v54 = vpack.c.b16 %v686_v43, %v685_v37  ;;  %v439_v12 = vsel %vm5757_vm2, %v434_v44, %v438_v29  ;;  %v528_v19 = vrot.slane %v526_v46, 5  ;;  %v619_v55 = vshrl.u32 %v243_v40, 16  ;;  %v5964_v24 = vld [vmem:[%s5742_s26 + $0x20] sm:$0x1]  ;;  %v5537_v38 = vld [vmem:[%s7131_s1 + $0xc8] sm:$0xff] }
  0x3e   : > { %1032 = vmatpush.bf16.msrb.mxu1 %v5499_v34  ;;  %v444_v57 = vrot.slane %v443_v47, 4  ;;  %v5948_v58 = vunpack.c.l.b16 %v439_v12  ;;  %v534_v60 = vrot.slane %v532_v48, 5  ;;  %v538_v61 = vrot.slane %v536_v49, 4 }
  0x3f   : > { %808 = vmatmul.bf16.gmra.mxu0 %v716_v54  ;;  %v529_v0 = vor.u32 %v528_v19, %v525_v45  ;;  %v544_v1 = vrot.slane %v542_v52, 5  ;;  %v621_v3 = vrot.slane %v619_v55, 4  ;;  %v622_v5 = vshll.u32 %v243_v40, 16  ;;  %v5497_v40 = vld [vmem:[%s7131_s1 + $0x8] sm:$0xff]  ;;  %v5512_v45 = vld [vmem:[%s7131_s1 + $0x80] sm:$0xff] }
  0x40   : > { %1414 = vmatpush.bf16.msrb.mxu2 %v5514_v41  ;;  %v449_v7 = vsel %vm5757_vm2, %v444_v57, %v448_v39  ;;  %v539_v8 = vor.u32 %v538_v61, %v534_v60  ;;  %v628_v9 = vshll.u32 %v244_v31, 16  ;;  %v632_v10 = vshrl.u32 %v244_v31, 16  ;;  %v5546_v39 = vld [vmem:[%s7131_s1 + $0x110] sm:$0xff]  ;;  %v5987_v52 = vld [vmem:[%s5742_s26 + $0x58] sm:$0xf]  ;;  %v5545_v57 = vld [vmem:[%s7131_s1 + $0x108] sm:$0xff] }
  0x41   : > { %1729 = vmatpush.bf16.msrb.mxu3 %v5538_v42  ;;  %2410 = vmatpush.bf16.msrb.mxu0 %v5547_v53  ;;  %v696_v11 = vunpack.c.l.b16 %v449_v7  ;;  %v530_v13 = vrot.slane %v529_v0, 4  ;;  %v624_v14 = vrot.slane %v622_v5, 5  ;;  %v638_v15 = vshll.u32 %v277_v63, 16  ;;  %v5990_v53 = vld [vmem:[%s5742_s26 + $0x5c] sm:$0x1]  ;;  %v5496_v0 = vld [vmem:[%s7131_s1] sm:$0xff] }
  0x42   : > { %1033 = vmatpush.bf16.msrb.mxu1 %v5498_v56  ;;  %v540_v18 = vrot.slane %v539_v8, 4  ;;  %v630_v50 = vrot.slane %v628_v9, 5  ;;  %v634_v51 = vrot.slane %v632_v10, 4  ;;  %v331_v16 = vshrl.u32 %v219_v6, 16  ;;  %v237_v55 = vld [vmem:[%s5742_s26 + $0x84] sm:$0xf] }
  0x43   : > { %v721_v20 = vpack.c.b16 %v696_v11, %v5948_v58  ;;  %v535_v21 = vsel %vm5757_vm2, %v530_v13, %v534_v60  ;;  %v625_v22 = vor.u32 %v624_v14, %v621_v3  ;;  %v640_v23 = vrot.slane %v638_v15, 5  ;;  %v5536_v56 = vld [vmem:[%s7131_s1 + $0xc0] sm:$0xff]  ;;  %v238_v10 = vld [vmem:[%s5742_s26 + $0x88] sm:$0xf] }
  0x44   : > { %1415 = vmatpush.bf16.msrb.mxu2 %v5513_v17  ;;  %v545_v26 = vsel %vm5757_vm2, %v540_v18, %v544_v1  ;;  %v703_v28 = vunpack.c.l.b16 %v535_v21  ;;  %v635_v29 = vor.u32 %v634_v51, %v630_v50  ;;  %v333_v32 = vrot.slane %v331_v16, 4  ;;  %v5544_v18 = vld [vmem:[%s7131_s1 + $0x100] sm:$0xff]  ;;  %v274_v16 = vld [vmem:[%s5742_s26 + $0x8c] sm:$0x1] }
  0x45   : > { %v704_v33 = vunpack.c.l.b16 %v545_v26  ;;  %v626_v34 = vrot.slane %v625_v22, 4  ;;  %v334_v36 = vshll.u32 %v219_v6, 16  ;;  %v340_v37 = vshll.u32 %v5958_v59, 16  ;;  %1730 = vmatpush.bf16.msrb.mxu3 %v5537_v38  ;;  %2411 = vmatpush.bf16.msrb.mxu0 %v5546_v39  ;;  %v245_v22 = vld [vmem:[%s5742_s26 + $0xb4] sm:$0xf] }
  0x46   : > { %v636_v41 = vrot.slane %v635_v29, 4  ;;  %v344_v42 = vshrl.u32 %v5958_v59, 16  ;;  %v350_v43 = vshll.u32 %v5964_v24, 16  ;;  %v451_v44 = vshrl.u32 %v229_v25, 16  ;;  %1034 = vmatpush.bf16.msrb.mxu1 %v5497_v40  ;;  %v246_v39 = vld [vmem:[%s5742_s26 + $0xb8] sm:$0xf] }
  0x47   : > { %v725_v46 = vpack.c.b16 %v704_v33, %v703_v28  ;;  %v631_v47 = vsel %vm5757_vm2, %v626_v34, %v630_v50  ;;  %v336_v48 = vrot.slane %v334_v36, 5  ;;  %v342_v49 = vrot.slane %v340_v37, 5 }
  0x48   : > { %v641_v54 = vsel %vm5757_vm2, %v636_v41, %v640_v23  ;;  %v711_v12 = vunpack.c.l.b16 %v631_v47  ;;  %v346_v19 = vrot.slane %v344_v42, 4  ;;  %v352_v31 = vrot.slane %v350_v43, 5  ;;  %1416 = vmatpush.bf16.msrb.mxu2 %v5512_v45  ;;  %v278_v45 = vld [vmem:[%s5742_s26 + $0xbc] sm:$0x1] }
  0x49   : > { %v712_v58 = vunpack.c.l.b16 %v641_v54  ;;  %v337_v60 = vor.u32 %v336_v48, %v333_v32  ;;  %v453_v61 = vrot.slane %v451_v44, 4  ;;  %v454_v63 = vshll.u32 %v229_v25, 16  ;;  %1731 = vmatpush.bf16.msrb.mxu3 %v5536_v56  ;;  %2412 = vmatpush.bf16.msrb.mxu0 %v5545_v57  ;;  %v5583_v47 = vld [vmem:[%s7131_s1 + $0x1b8] sm:$0xff] }
  0x4a   : > { %v347_v1 = vor.u32 %v346_v19, %v342_v49  ;;  %v460_v3 = vshll.u32 %v5987_v52, 16  ;;  %v464_v5 = vshrl.u32 %v5987_v52, 16  ;;  %v470_v6 = vshll.u32 %v5990_v53, 16  ;;  %1035 = vmatpush.bf16.msrb.mxu1 %v5496_v0 }
  0x4b   : > { %833 = vmatmul.bf16.gmra.mxu1 %v721_v20  ;;  %853 = vmatmul.bf16.gmra.mxu2 %v725_v46  ;;  %v729_v7 = vpack.c.b16 %v712_v58, %v711_v12  ;;  %v338_v8 = vrot.slane %v337_v60, 4  ;;  %v456_v9 = vrot.slane %v454_v63, 5  ;;  %v547_v11 = vshrl.u32 %v237_v55, 16  ;;  %v221_v46 = vld [vmem:[%s5742_s26 + $0x24] sm:$0xf] }
  0x4c   : > { %v348_v13 = vrot.slane %v347_v1, 4  ;;  %v462_v14 = vrot.slane %v460_v3, 5  ;;  %v466_v15 = vrot.slane %v464_v5, 4  ;;  %v472_v17 = vrot.slane %v470_v6, 5  ;;  %3147 = vmatpush.bf16.msra.mxu2 %v5583_v47  ;;  %v5591_v6 = vld [vmem:[%s7131_s1 + $0x1f8] sm:$0xff] }
  0x4d   : > { %873 = vmatmul.bf16.gmra.mxu3 %v729_v7  ;;  %v343_v50 = vsel %vm5757_vm2, %v338_v8, %v342_v49  ;;  %v457_v51 = vor.u32 %v456_v9, %v453_v61  ;;  %v549_v20 = vrot.slane %v547_v11, 4  ;;  %v550_v21 = vshll.u32 %v237_v55, 16  ;;  %2413 = vmatpush.bf16.msrb.mxu0 %v5544_v18  ;;  %v6028_v61 = vld [vmem:[%s5742_s26 + $0x28] sm:$0xf]  ;;  %v5559_v7 = vld [vmem:[%s7131_s1 + $0x178] sm:$0xff] }
  0x4e   : > { %v353_v23 = vsel %vm5757_vm2, %v348_v13, %v352_v31  ;;  %v687_v25 = vunpack.c.l.b16 %v343_v50  ;;  %v467_v26 = vor.u32 %v466_v15, %v462_v14  ;;  %v556_v28 = vshll.u32 %v238_v10, 16  ;;  %v5599_v8 = vld [vmem:[%s7131_s1 + $0x238] sm:$0xff]  ;;  %3829 = vmatpush.bf16.msra.mxu3 %v5591_v6  ;;  %2832 = vmatpush.bf16.msra.mxu1 %v5559_v7 }
  0x4f   : > { %v688_v29 = vunpack.c.l.b16 %v353_v23  ;;  %v458_v32 = vrot.slane %v457_v51, 4  ;;  %v552_v33 = vrot.slane %v550_v21, 5  ;;  %v560_v34 = vshrl.u32 %v238_v10, 16 }
  0x50   : > { %v468_v36 = vrot.slane %v467_v26, 4  ;;  %v558_v37 = vrot.slane %v556_v28, 5  ;;  %v566_v38 = vshll.u32 %v274_v16, 16  ;;  %v643_v40 = vshrl.u32 %v245_v22, 16  ;;  %v1117_v26 = vld [vmem:[%s5742_s26] sm:$0xe] }
  0x51   : > { %v717_v41 = vpack.c.b16 %v688_v29, %v687_v25  ;;  %v463_v42 = vsel %vm5757_vm2, %v458_v32, %v462_v14  ;;  %v553_v43 = vor.u32 %v552_v33, %v549_v20  ;;  %v562_v44 = vrot.slane %v560_v34, 4  ;;  %v6042_v14 = vld [vmem:[%s5742_s26 + $0x2c] sm:$0x1]  ;;  %4255 = vmatpush.bf16.msra.mxu0 %v5599_v8 }
  0x52   : > { %v473_v48 = vsel %vm5757_vm2, %v468_v36, %v472_v17  ;;  %v697_v49 = vunpack.c.l.b16 %v463_v42  ;;  %v568_v54 = vrot.slane %v566_v38, 5  ;;  %v645_v12 = vrot.slane %v643_v40, 4  ;;  %v4981_v38 = vld [vmem:[%s5742_s26 + $0xc] sm:$0xf] }
  0x53   : > { %813 = vmatmul.bf16.gmra.mxu0 %v717_v41  ;;  %v698_v19 = vunpack.c.l.b16 %v473_v48  ;;  %v554_v31 = vrot.slane %v553_v43, 4  ;;  %v563_v55 = vor.u32 %v562_v44, %v558_v37  ;;  %v646_v56 = vshll.u32 %v245_v22, 16 }
  0x54   : > { %v652_v57 = vshll.u32 %v246_v39, 16  ;;  %v656_v58 = vshrl.u32 %v246_v39, 16  ;;  %v662_v60 = vshll.u32 %v278_v45, 16  ;;  %v355_v63 = vshrl.u32 %v221_v46, 16  ;;  %v4982_v39 = vld [vmem:[%s5742_s26 + $0x10] sm:$0xf] }
  0x55   : > { %v722_v0 = vpack.c.b16 %v698_v19, %v697_v49  ;;  %v559_v1 = vsel %vm5757_vm2, %v554_v31, %v558_v37  ;;  %v564_v3 = vrot.slane %v563_v55, 4  ;;  %v648_v5 = vrot.slane %v646_v56, 5 }
  0x56   : > { %v705_v9 = vunpack.c.l.b16 %v559_v1  ;;  %v654_v10 = vrot.slane %v652_v57, 5  ;;  %v658_v11 = vrot.slane %v656_v58, 4  ;;  %v664_v13 = vrot.slane %v662_v60, 5  ;;  %v4983_v58 = vld [vmem:[%s5742_s26 + $0x14] sm:$0x1] }
  0x57   : > { %v569_v15 = vsel %vm5757_vm2, %v564_v3, %v568_v54  ;;  %v649_v17 = vor.u32 %v648_v5, %v645_v12  ;;  %v357_v18 = vrot.slane %v355_v63, 4  ;;  %v358_v50 = vshll.u32 %v221_v46, 16 }
  0x58   : > { %v706_v51 = vunpack.c.l.b16 %v569_v15  ;;  %v659_v16 = vor.u32 %v658_v11, %v654_v10  ;;  %v364_v20 = vshll.u32 %v6028_v61, 16  ;;  %v368_v21 = vshrl.u32 %v6028_v61, 16 }
  0x59   : > { %v650_v22 = vrot.slane %v649_v17, 4  ;;  %v360_v23 = vrot.slane %v358_v50, 5  ;;  %v374_v25 = vshll.u32 %v6042_v14, 16  ;;  %v4773_v44 = vrot.slane %v1117_v26, 9  ;;  %v4984_v50 = vld [vmem:[%s5742_s26 + $0x18] sm:$0xf] }
  0x5a   : > { %v726_v28 = vpack.c.b16 %v706_v51, %v705_v9  ;;  %v660_v29 = vrot.slane %v659_v16, 4  ;;  %v366_v32 = vrot.slane %v364_v20, 5  ;;  %v370_v33 = vrot.slane %v368_v21, 4  ;;  %v5480_v51 = vld [vmem:[%s5742_s26] sm:$0xff]  ;;  %v4985_v16 = vld [vmem:[%s5742_s26 + $0x1c] sm:$0xf] }
  0x5b   : > { %838 = vmatmul.bf16.gmra.mxu1 %v722_v0  ;;  %v655_v34 = vsel %vm5757_vm2, %v650_v22, %v654_v10  ;;  %v361_v36 = vor.u32 %v360_v23, %v357_v18  ;;  %v376_v37 = vrot.slane %v374_v25, 5  ;;  %v1170_v47 = vrot.slane %v5782_v62, 5  ;;  %v1118_v21 = vld [vmem:[%s5742_s26 + $0xc] sm:$0xe] }
  0x5c   : > { %858 = vmatmul.bf16.gmra.mxu2 %v726_v28  ;;  %v665_v40 = vsel %vm5757_vm2, %v660_v29, %v664_v13  ;;  %v713_v41 = vunpack.c.l.b16 %v655_v34  ;;  %v371_v42 = vor.u32 %v370_v33, %v366_v32  ;;  %v1173_v48 = vrot.slane %v5789_v4, 5  ;;  %v5520_v34 = vld [vmem:[%s5742_s26 + $0xc] sm:$0xff] }
  0x5d   : > { %v714_v45 = vunpack.c.l.b16 %v665_v40  ;;  %v362_v46 = vrot.slane %v361_v36, 4  ;;  %v1894_v54 = vshrl.u32 %v4981_v38, 16  ;;  %v1897_v12 = vshll.u32 %v4981_v38, 16 }
  0x5e   : > { %v372_v49 = vrot.slane %v371_v42, 4  ;;  %v1903_v19 = vshll.u32 %v4982_v39, 16  ;;  %v1171_v56 = vsel %vm6057_vm5, %v4773_v44, %v1170_v47  ;;  %v1172_v57 = vrot.slane %v1170_v47, 4  ;;  %v4986_v44 = vld [vmem:[%s5742_s26 + $0x20] sm:$0x1] }
  0x5f   : > { %v730_v31 = vpack.c.b16 %v714_v45, %v713_v41  ;;  %v367_v55 = vsel %vm5757_vm2, %v362_v46, %v366_v32  ;;  %v1297_v62 = vunpack.c.l.b16 %v1171_v56  ;;  %v1896_v0 = vrot.slane %v1894_v54, 4  ;;  %v5558_v56 = vld [vmem:[%s7131_s1 + $0x170] sm:$0xff] }
  0x60   : > { %v377_v60 = vsel %vm5757_vm2, %v372_v49, %v376_v37  ;;  %v689_v63 = vunpack.c.l.b16 %v367_v55  ;;  %v1174_v1 = vsel %vm6057_vm5, %v1172_v57, %v1173_v48  ;;  %v1899_v3 = vrot.slane %v1897_v12, 5  ;;  %v5582_v48 = vld [vmem:[%s7131_s1 + $0x1b0] sm:$0xff]  ;;  %2833 = vmatpush.bf16.msra.mxu1 %v5558_v56 }
  0x61   : > { %878 = vmatmul.bf16.gmra.mxu3 %v730_v31  ;;  %v690_v4 = vunpack.c.l.b16 %v377_v60  ;;  %v1298_v5 = vunpack.c.l.b16 %v1174_v1  ;;  %v1905_v6 = vrot.slane %v1903_v19, 5  ;;  %v1907_v7 = vshrl.u32 %v4982_v39, 16  ;;  %3148 = vmatpush.bf16.msra.mxu2 %v5582_v48  ;;  %v4987_v31 = vld [vmem:[%s5742_s26 + $0x24] sm:$0xf]  ;;  %v5590_v55 = vld [vmem:[%s7131_s1 + $0x1f0] sm:$0xff] }
  0x62   : > { %v1913_v8 = vshll.u32 %v4983_v58, 16  ;;  %v1900_v10 = vor.u32 %v1899_v3, %v1896_v0  ;;  %v1177_v22 = vrot.slane %v5861_v27, 5  ;;  %v1918_v23 = vshrl.u32 %v4984_v50, 16  ;;  %v5598_v57 = vld [vmem:[%s7131_s1 + $0x230] sm:$0xff]  ;;  %3830 = vmatpush.bf16.msra.mxu3 %v5590_v55  ;;  %v1120_v48 = vld [vmem:[%s5742_s26 + $0x24] sm:$0xe] }
  0x63   : > { %v718_v9 = vpack.c.b16 %v690_v4, %v689_v63  ;;  %v1329_v11 = vpack.c.b16 %v1298_v5, %v1297_v62  ;;  %v1909_v13 = vrot.slane %v1907_v7, 4  ;;  %v1921_v25 = vshll.u32 %v4984_v50, 16  ;;  %v4988_v62 = vld [vmem:[%s5742_s26 + $0x28] sm:$0xf]  ;;  %v5481_v0 = vld [vmem:[%s5742_s26 + $0xc] sm:$0xff]  ;;  %4256 = vmatpush.bf16.msra.mxu0 %v5598_v57 }
  0x64   : > { %v1901_v15 = vrot.slane %v1900_v10, 4  ;;  %v1915_v18 = vrot.slane %v1913_v8, 5  ;;  %v1927_v29 = vshll.u32 %v4985_v16, 16  ;;  %v1931_v32 = vshrl.u32 %v4985_v16, 16 }
  0x65   : > { %818 = vmatmul.bf16.gmra.mxu0 %v718_v9  ;;  %v1910_v17 = vor.u32 %v1909_v13, %v1905_v6  ;;  %v4774_v33 = vrot.slane %v1118_v21, 9  ;;  %v1179_v38 = vrot.slane %v1177_v22, 4  ;;  %v1180_v27 = vrot.slane %v5871_v35, 5  ;;  %v4989_v21 = vld [vmem:[%s5742_s26 + $0x2c] sm:$0x1] }
  0x66   : > { %v1906_v26 = vsel %vm5757_vm2, %v1901_v15, %v1905_v6  ;;  %v1920_v39 = vrot.slane %v1918_v23, 4  ;;  %v1923_v40 = vrot.slane %v1921_v25, 5  ;;  %v1929_v41 = vrot.slane %v1927_v29, 5  ;;  %v1119_v6 = vld [vmem:[%s5742_s26 + $0x18] sm:$0xe] }
  0x67   : > { %v1911_v20 = vrot.slane %v1910_v17, 4  ;;  %v2294_v36 = vunpack.c.l.b16 %v1906_v26  ;;  %v1933_v42 = vrot.slane %v1931_v32, 4  ;;  %v1178_v46 = vsel %vm6057_vm5, %v4774_v33, %v1177_v22 }
  0x68   : > { %v1181_v47 = vsel %vm6057_vm5, %v1179_v38, %v1180_v27  ;;  %v1924_v35 = vor.u32 %v1923_v40, %v1920_v39  ;;  %v1937_v54 = vshll.u32 %v4986_v44, 16  ;;  %v1299_v12 = vunpack.c.l.b16 %v1178_v46  ;;  %v4991_v38 = vld [vmem:[%s5742_s26 + $0x34] sm:$0xf]  ;;  %v5482_v27 = vld [vmem:[%s5742_s26 + $0x18] sm:$0xff] }
  0x69   : > { %v1916_v28 = vsel %vm5757_vm2, %v1911_v20, %v1915_v18  ;;  %v1934_v49 = vor.u32 %v1933_v42, %v1929_v41  ;;  %v1300_v19 = vunpack.c.l.b16 %v1181_v47  ;;  %v1184_v1 = vrot.slane %v5958_v59, 5  ;;  %v5521_v18 = vld [vmem:[%s5742_s26 + $0x18] sm:$0xff] }
  0x6a   : > { %v2295_v37 = vunpack.c.l.b16 %v1916_v28  ;;  %v1925_v58 = vrot.slane %v1924_v35, 4  ;;  %v1939_v63 = vrot.slane %v1937_v54, 5  ;;  %v1942_v3 = vshrl.u32 %v4987_v31, 16 }
  0x6b   : > { %1036 = vmatmul.bf16.vlgmr.msrb.gmra.mxu1 %v5480_v51  ;;  %v1935_v60 = vrot.slane %v1934_v49, 4  ;;  %v1330_v4 = vpack.c.b16 %v1300_v19, %v1299_v12  ;;  %v1945_v5 = vshll.u32 %v4987_v31, 16  ;;  %v1951_v7 = vshll.u32 %v4988_v62, 16  ;;  %v5522_v31 = vld [vmem:[%s5742_s26 + $0x24] sm:$0xff] }
  0x6c   : > { %1417 = vmatmul.bf16.vlgmr.msrb.gmra.mxu2 %v1329_v11  ;;  %v2326_v45 = vpack.c.b16 %v2295_v37, %v2294_v36  ;;  %v1955_v8 = vshrl.u32 %v4988_v62, 16  ;;  %v1930_v9 = vsel %vm5757_vm2, %v1925_v58, %v1929_v41  ;;  %v1187_v11 = vrot.slane %v5964_v24, 5  ;;  %v4990_v37 = vld [vmem:[%s5742_s26 + $0x30] sm:$0xf] }
  0x6d   : > { %v1940_v10 = vsel %vm5757_vm2, %v1935_v60, %v1939_v63  ;;  %v4775_v13 = vrot.slane %v1119_v6, 9  ;;  %v1186_v59 = vrot.slane %v1184_v1, 4  ;;  %v1944_v15 = vrot.slane %v1942_v3, 4  ;;  %v4993_v6 = vld [vmem:[%s5742_s26 + $0x3c] sm:$0xf] }
  0x6e   : > { %v1947_v17 = vrot.slane %v1945_v5, 5  ;;  %v2296_v50 = vunpack.c.l.b16 %v1930_v9  ;;  %v2297_v51 = vunpack.c.l.b16 %v1940_v10  ;;  %v1953_v16 = vrot.slane %v1951_v7, 5  ;;  %v4994_v7 = vld [vmem:[%s5742_s26 + $0x40] sm:$0xf] }
  0x6f   : > { %v1957_v20 = vrot.slane %v1955_v8, 4  ;;  %v1185_v22 = vsel %vm6057_vm5, %v4775_v13, %v1184_v1  ;;  %v1188_v25 = vsel %vm6057_vm5, %v1186_v59, %v1187_v11  ;;  %v1961_v28 = vshll.u32 %v4989_v21, 16  ;;  %v5581_v1 = vld [vmem:[%s7131_s1 + $0x1a8] sm:$0xff]  ;;  %v5633_v21 = vld [vmem:[%s5742_s26 + $0x34] sm:$0xf] }
  0x70   : > { %v1948_v23 = vor.u32 %v1947_v17, %v1944_v15  ;;  %v2327_v24 = vpack.c.b16 %v2297_v51, %v2296_v50  ;;  %v1301_v29 = vunpack.c.l.b16 %v1185_v22  ;;  %v1302_v32 = vunpack.c.l.b16 %v1188_v25  ;;  %3149 = vmatpush.bf16.msra.mxu2 %v5581_v1  ;;  %v5589_v11 = vld [vmem:[%s7131_s1 + $0x1e8] sm:$0xff]  ;;  %v1122_v1 = vld [vmem:[%s5742_s26 + $0x3c] sm:$0xe] }
  0x71   : > { %1732 = vmatmul.bf16.vlgmr.msrb.gmra.mxu3 %v5520_v34  ;;  %v1958_v26 = vor.u32 %v1957_v20, %v1953_v16  ;;  %v1963_v36 = vrot.slane %v1961_v28, 5  ;;  %v1966_v41 = vshrl.u32 %v4990_v37, 16  ;;  %v1969_v42 = vshll.u32 %v4990_v37, 16  ;;  %v5557_v13 = vld [vmem:[%s7131_s1 + $0x168] sm:$0xff]  ;;  %v5634_v37 = vld [vmem:[%s5742_s26 + $0x38] sm:$0x1] }
  0x72   : > { %v1949_v33 = vrot.slane %v1948_v23, 4  ;;  %v1331_v39 = vpack.c.b16 %v1302_v32, %v1301_v29  ;;  %v1975_v46 = vshll.u32 %v4991_v38, 16  ;;  %v1979_v47 = vshrl.u32 %v4991_v38, 16  ;;  %v5597_v59 = vld [vmem:[%s7131_s1 + $0x228] sm:$0xff]  ;;  %3831 = vmatpush.bf16.msra.mxu3 %v5589_v11  ;;  %2834 = vmatpush.bf16.msra.mxu1 %v5557_v13  ;;  %v5636_v13 = vld [vmem:[%s5742_s26 + $0x44] sm:$0x1] }
  0x73   : > { %v1959_v34 = vrot.slane %v1958_v26, 4  ;;  %v1194_v54 = vrot.slane %v6042_v14, 5  ;;  %v1968_v12 = vrot.slane %v1966_v41, 4  ;;  %v1971_v19 = vrot.slane %v1969_v42, 5  ;;  %v5483_v15 = vld [vmem:[%s5742_s26 + $0x24] sm:$0xff]  ;;  %4257 = vmatpush.bf16.msra.mxu0 %v5597_v59 }
  0x74   : > { %v1954_v40 = vsel %vm5757_vm2, %v1949_v33, %v1953_v16  ;;  %v4776_v55 = vrot.slane %v1120_v48, 9  ;;  %v1977_v57 = vrot.slane %v1975_v46, 5  ;;  %v1981_v58 = vrot.slane %v1979_v47, 4  ;;  %v5523_v33 = vld [vmem:[%s5742_s26 + $0x30] sm:$0xff] }
  0x75   : > { %2414 = vmatmul.bf16.vlgmr.msrb.gmra.mxu0 %v2326_v45  ;;  %v1964_v44 = vsel %vm5757_vm2, %v1959_v34, %v1963_v36  ;;  %v1191_v45 = vrot.slane %v6028_v61, 5  ;;  %v2298_v35 = vunpack.c.l.b16 %v1954_v40  ;;  %v4992_v61 = vld [vmem:[%s5742_s26 + $0x38] sm:$0x1]  ;;  %v1972_v63 = vor.u32 %v1971_v19, %v1968_v12  ;;  %v4996_v12 = vld [vmem:[%s5742_s26 + $0x48] sm:$0xf] }
  0x76   : > { %v2299_v49 = vunpack.c.l.b16 %v1964_v44  ;;  %v1982_v14 = vor.u32 %v1981_v58, %v1977_v57  ;;  %v1990_v17 = vshrl.u32 %v4993_v6, 16  ;;  %v1999_v51 = vshll.u32 %v4994_v7, 16  ;;  %v4997_v19 = vld [vmem:[%s5742_s26 + $0x4c] sm:$0xf] }
  0x77   : > { %v1193_v56 = vrot.slane %v1191_v45, 4  ;;  %v1192_v62 = vsel %vm6057_vm5, %v4776_v55, %v1191_v45  ;;  %v1973_v8 = vrot.slane %v1972_v63, 4  ;;  %v1198_v22 = vrot.slane %v5633_v21, 5 }
  0x78   : > { %v2328_v60 = vpack.c.b16 %v2299_v49, %v2298_v35  ;;  %v1303_v3 = vunpack.c.l.b16 %v1192_v62  ;;  %v1983_v9 = vrot.slane %v1982_v14, 4  ;;  %v2003_v23 = vshrl.u32 %v4994_v7, 16  ;;  %v5635_v62 = vld [vmem:[%s5742_s26 + $0x40] sm:$0xf] }
  0x79   : > { %v1978_v16 = vsel %vm5757_vm2, %v1973_v8, %v1977_v57  ;;  %v1992_v25 = vrot.slane %v1990_v17, 4  ;;  %v2001_v32 = vrot.slane %v1999_v51, 5  ;;  %v1200_v36 = vrot.slane %v1198_v22, 4 }
  0x7a   : > { %v2300_v28 = vunpack.c.l.b16 %v1978_v16  ;;  %v1201_v38 = vrot.slane %v5634_v37, 5  ;;  %v2014_v58 = vshrl.u32 %v4996_v12, 16  ;;  %v2027_v14 = vshrl.u32 %v4997_v19, 16  ;;  %v5000_v37 = vld [vmem:[%s5742_s26 + $0x58] sm:$0xf] }
  0x7b   : > { %1041 = vmatmul.bf16.gmra.mxu1 %v5481_v0  ;;  %v1195_v0 = vsel %vm6057_vm5, %v1193_v56, %v1194_v54  ;;  %v1208_v59 = vrot.slane %v5636_v13, 5 }
  0x7c   : > { %1422 = vmatmul.bf16.gmra.mxu2 %v1330_v4  ;;  %v1985_v4 = vshll.u32 %v4992_v61, 16  ;;  %v1304_v5 = vunpack.c.l.b16 %v1195_v0  ;;  %v1202_v44 = vsel %vm6057_vm5, %v1200_v36, %v1201_v38  ;;  %v2017_v61 = vshll.u32 %v4996_v12, 16  ;;  %v5588_v38 = vld [vmem:[%s7131_s1 + $0x1e0] sm:$0xff] }
  0x7d   : > { %v1306_v35 = vunpack.c.l.b16 %v1202_v44  ;;  %v1205_v0 = vrot.slane %v5635_v62, 5  ;;  %3832 = vmatpush.bf16.msra.mxu3 %v5588_v38  ;;  %v2051_v12 = vshrl.u32 %v5000_v37, 16 }
  0x7e   : > { %v1987_v10 = vrot.slane %v1985_v4, 5  ;;  %v1332_v50 = vpack.c.b16 %v1304_v5, %v1303_v3  ;;  %v2019_v7 = vrot.slane %v2017_v61, 5 }
  0x7f   : > { %v1207_v11 = vrot.slane %v1205_v0, 4 }
  0x80   : > { %v1988_v20 = vsel %vm5757_vm2, %v1983_v9, %v1987_v10  ;;  %v5524_v9 = vld [vmem:[%s5742_s26 + $0x3c] sm:$0xff]  ;;  %v4778_v10 = vrot.slane %v1122_v1, 9 }
  0x81   : > { %1737 = vmatmul.bf16.gmra.mxu3 %v5521_v18  ;;  %v1993_v18 = vshll.u32 %v4993_v6, 16  ;;  %v2301_v29 = vunpack.c.l.b16 %v1988_v20  ;;  %v2016_v6 = vrot.slane %v2014_v58, 4 }
  0x82   : > { %v1206_v21 = vsel %vm6057_vm5, %v4778_v10, %v1205_v0 }
  0x83   : > { %v1995_v26 = vrot.slane %v1993_v18, 5  ;;  %v2329_v41 = vpack.c.b16 %v2301_v29, %v2300_v28  ;;  %v4998_v18 = vld [vmem:[%s5742_s26 + $0x50] sm:$0x1]  ;;  %v2020_v20 = vor.u32 %v2019_v7, %v2016_v6  ;;  %v1307_v28 = vunpack.c.l.b16 %v1206_v21 }
  0x85   : > { %2419 = vmatmul.bf16.gmra.mxu0 %v2327_v24  ;;  %v1121_v24 = vld [vmem:[%s5742_s26 + $0x30] sm:$0xe]  ;;  %v1996_v40 = vor.u32 %v1995_v26, %v1992_v25  ;;  %v5580_v25 = vld [vmem:[%s7131_s1 + $0x1a0] sm:$0xff] }
  0x86   : > { %v4777_v34 = vrot.slane %v1121_v24, 9  ;;  %v2033_v24 = vshll.u32 %v4998_v18, 16  ;;  %3150 = vmatpush.bf16.msra.mxu2 %v5580_v25 }
  0x87   : > { %v1997_v47 = vrot.slane %v1996_v40, 4 }
  0x88   : > { %v1199_v42 = vsel %vm6057_vm5, %v4777_v34, %v1198_v22  ;;  %v1209_v22 = vsel %vm6057_vm5, %v1207_v11, %v1208_v59  ;;  %v2035_v36 = vrot.slane %v2033_v24, 5 }
  0x89   : > { %v1305_v48 = vunpack.c.l.b16 %v1199_v42  ;;  %v2002_v55 = vsel %vm5757_vm2, %v1997_v47, %v2001_v32  ;;  %v1308_v29 = vunpack.c.l.b16 %v1209_v22  ;;  %v2047_v47 = vshll.u32 %v5000_v37, 16  ;;  %v5002_v22 = vld [vmem:[%s5742_s26 + $0x60] sm:$0xf] }
  0x8a   : > { %v2302_v3 = vunpack.c.l.b16 %v2002_v55  ;;  %v2065_v37 = vshll.u32 %v5002_v22, 16 }
  0x8b   : > { %1046 = vmatmul.bf16.gmra.mxu1 %v5482_v27  ;;  %v2005_v27 = vrot.slane %v2003_v23, 4  ;;  %v1333_v57 = vpack.c.b16 %v1306_v35, %v1305_v48  ;;  %v5596_v48 = vld [vmem:[%s7131_s1 + $0x220] sm:$0xff] }
  0x8c   : > { %1427 = vmatmul.bf16.gmra.mxu2 %v1331_v39  ;;  %v4995_v39 = vld [vmem:[%s5742_s26 + $0x44] sm:$0x1]  ;;  %4258 = vmatpush.bf16.msra.mxu0 %v5596_v48 }
  0x8d   : > { %v2006_v45 = vor.u32 %v2005_v27, %v2001_v32  ;;  %v2009_v46 = vshll.u32 %v4995_v39, 16  ;;  %v2021_v32 = vrot.slane %v2020_v20, 4  ;;  %v5556_v27 = vld [vmem:[%s7131_s1 + $0x160] sm:$0xff] }
  0x8e   : > { %2835 = vmatpush.bf16.msra.mxu1 %v5556_v27 }
  0x8f   : > { %v2007_v49 = vrot.slane %v2006_v45, 4  ;;  %v2011_v54 = vrot.slane %v2009_v46, 5  ;;  %v1334_v46 = vpack.c.b16 %v1308_v29, %v1307_v28  ;;  %v5486_v29 = vld [vmem:[%s5742_s26 + $0x48] sm:$0xff] }
  0x91   : > { %1742 = vmatmul.bf16.gmra.mxu3 %v5522_v31  ;;  %v5484_v31 = vld [vmem:[%s5742_s26 + $0x30] sm:$0xff]  ;;  %v2012_v63 = vsel %vm5757_vm2, %v2007_v49, %v2011_v54  ;;  %v1212_v54 = vrot.slane %v5900_v2, 5 }
  0x92   : > { %v2303_v5 = vunpack.c.l.b16 %v2012_v63  ;;  %v5525_v63 = vld [vmem:[%s5742_s26 + $0x48] sm:$0xff] }
  0x93   : > { %v1214_v0 = vrot.slane %v1212_v54, 4 }
  0x94   : > { %v2330_v51 = vpack.c.b16 %v2303_v5, %v2302_v3  ;;  %v2053_v3 = vrot.slane %v2051_v12, 4  ;;  %v5001_v5 = vld [vmem:[%s5742_s26 + $0x5c] sm:$0x1] }
  0x95   : > { %2424 = vmatmul.bf16.gmra.mxu0 %v2328_v60  ;;  %v2023_v60 = vshll.u32 %v4997_v19, 16  ;;  %v1123_v19 = vld [vmem:[%s5742_s26 + $0x48] sm:$0xe]  ;;  %v2057_v59 = vshll.u32 %v5001_v5, 16  ;;  %v5579_v5 = vld [vmem:[%s7131_s1 + $0x198] sm:$0xff] }
  0x96   : > { %v4779_v62 = vrot.slane %v1123_v19, 9  ;;  %3151 = vmatpush.bf16.msra.mxu2 %v5579_v5 }
  0x97   : > { %v2025_v8 = vrot.slane %v2023_v60, 5  ;;  %v2049_v60 = vrot.slane %v2047_v47, 5  ;;  %v2059_v21 = vrot.slane %v2057_v59, 5  ;;  %v5005_v59 = vld [vmem:[%s5742_s26 + $0x6c] sm:$0xf] }
  0x98   : > { %v1213_v10 = vsel %vm6057_vm5, %v4779_v62, %v1212_v54  ;;  %v5526_v54 = vld [vmem:[%s5742_s26 + $0x54] sm:$0xff] }
  0x99   : > { %v2026_v35 = vsel %vm5757_vm2, %v2021_v32, %v2025_v8  ;;  %v2054_v13 = vor.u32 %v2053_v3, %v2049_v60  ;;  %v1309_v18 = vunpack.c.l.b16 %v1213_v10 }
  0x9a   : > { %v2304_v58 = vunpack.c.l.b16 %v2026_v35  ;;  %v2067_v35 = vrot.slane %v2065_v37, 5  ;;  %v5638_v37 = vld [vmem:[%s5742_s26 + $0x64] sm:$0xf] }
  0x9b   : > { %1051 = vmatmul.bf16.gmra.mxu1 %v5483_v15  ;;  %v2029_v15 = vrot.slane %v2027_v14, 4  ;;  %v5637_v14 = vld [vmem:[%s5742_s26 + $0x50] sm:$0x1]  ;;  %v2055_v20 = vrot.slane %v2054_v13, 4 }
  0x9c   : > { %1432 = vmatmul.bf16.gmra.mxu2 %v1332_v50  ;;  %v1215_v1 = vrot.slane %v5637_v14, 5 }
  0x9d   : > { %v2030_v23 = vor.u32 %v2029_v15, %v2025_v8  ;;  %v2060_v27 = vsel %vm5757_vm2, %v2055_v20, %v2059_v21  ;;  %v5487_v20 = vld [vmem:[%s5742_s26 + $0x54] sm:$0xff]  ;;  %v5006_v21 = vld [vmem:[%s5742_s26 + $0x70] sm:$0xf] }
  0x9e   : > { %v1216_v11 = vsel %vm6057_vm5, %v1214_v0, %v1215_v1  ;;  %v2307_v47 = vunpack.c.l.b16 %v2060_v27  ;;  %v2089_v27 = vshll.u32 %v5005_v59, 16 }
  0x9f   : > { %v2031_v34 = vrot.slane %v2030_v23, 4  ;;  %v5003_v23 = vld [vmem:[%s5742_s26 + $0x64] sm:$0xf] }
  0xa0   : > { %v2071_v38 = vshll.u32 %v5003_v23, 16 }
  0xa1   : > { %1747 = vmatmul.bf16.gmra.mxu3 %v5523_v33  ;;  %v4999_v33 = vld [vmem:[%s5742_s26 + $0x54] sm:$0xf]  ;;  %v2036_v49 = vsel %vm5757_vm2, %v2031_v34, %v2035_v36  ;;  %v2062_v36 = vshrl.u32 %v5002_v22, 16 }
  0xa2   : > { %v2038_v42 = vshrl.u32 %v4999_v33, 16  ;;  %v2041_v44 = vshll.u32 %v4999_v33, 16  ;;  %v2305_v61 = vunpack.c.l.b16 %v2036_v49  ;;  %v2073_v49 = vrot.slane %v2071_v38, 5 }
  0xa3   : > { %v2064_v48 = vrot.slane %v2062_v36, 4  ;;  %v1226_v38 = vrot.slane %v5638_v37, 5 }
  0xa4   : > { %v2043_v55 = vrot.slane %v2041_v44, 5  ;;  %v2331_v8 = vpack.c.b16 %v2305_v61, %v2304_v58  ;;  %v1124_v44 = vld [vmem:[%s5742_s26 + $0x54] sm:$0xe]  ;;  %v5004_v61 = vld [vmem:[%s5742_s26 + $0x68] sm:$0x1] }
  0xa5   : > { %2429 = vmatmul.bf16.gmra.mxu0 %v2329_v41  ;;  %v5485_v41 = vld [vmem:[%s5742_s26 + $0x3c] sm:$0xff]  ;;  %v4780_v12 = vrot.slane %v1124_v44, 9  ;;  %v2068_v62 = vor.u32 %v2067_v35, %v2064_v48  ;;  %v2081_v3 = vshll.u32 %v5004_v61, 16  ;;  %v2095_v44 = vshll.u32 %v5006_v21, 16 }
  0xa6   : > { %v2091_v61 = vrot.slane %v2089_v27, 5  ;;  %v5488_v27 = vld [vmem:[%s5742_s26 + $0x60] sm:$0xff] }
  0xa7   : > { %v2069_v10 = vrot.slane %v2068_v62, 4  ;;  %v2083_v13 = vrot.slane %v2081_v3, 5 }
  0xa8   : > { %v6165_v56 = vpop.f32.mrf.mxu1 }
  0xab   : > { %v6170_v4 = vpop.f32.mrf.mxu0  ;;  %1056 = vmatmul.bf16.gmra.mxu1 %v5484_v31  ;;  %v2040_v31 = vrot.slane %v2038_v42, 4  ;;  %v2075_v42 = vshrl.u32 %v5003_v23, 16 }
  0xac   : > { %1437 = vmatmul.bf16.gmra.mxu2 %v1333_v57 }
  0xad   : > { %v2044_v7 = vor.u32 %v2043_v55, %v2040_v31  ;;  %v1222_v31 = vrot.slane %v5990_v53, 5  ;;  %v2077_v55 = vrot.slane %v2075_v42, 4  ;;  %v1125_v42 = vld [vmem:[%s5742_s26 + $0x60] sm:$0xe] }
  0xae   : > { %v6175_v17 = vpop.f32.mrf.mxu2 }
  0xaf   : > { %v6178_v50 = vpop.f32.mrf.mxu3  ;;  %v2045_v15 = vrot.slane %v2044_v7, 4  ;;  %v2078_v1 = vor.u32 %v2077_v55, %v2073_v49 }
  0xb0   : > { %v6180_v16 = vpop.f32.mrf.mxu1 }
  0xb1   : > { %1752 = vmatmul.bf16.gmra.mxu3 %v5524_v9  ;;  %v2050_v32 = vsel %vm5757_vm2, %v2045_v15, %v2049_v60  ;;  %v5587_v15 = vld [vmem:[%s7131_s1 + $0x1d8] sm:$0xff] }
  0xb2   : > { %3833 = vmatpush.bf16.msra.mxu3 %v5587_v15 }
  0xb3   : > { %v6189_v26 = vpop.f32.mrf.mxu0 }
  0xb5   : > { %2434 = vmatmul.bf16.gmra.mxu0 %v2330_v51  ;;  %v1310_v51 = vunpack.c.l.b16 %v1216_v11  ;;  %v2079_v11 = vrot.slane %v2078_v1, 4 }
  0xb6   : > { %v6199_v39 = vpop.f32.mrf.mxu2 }
  0xb7   : > { %v6201_v40 = vpop.f32.mrf.mxu3  ;;  %v1335_v34 = vpack.c.b16 %v1310_v51, %v1309_v18  ;;  %v5555_v18 = vld [vmem:[%s7131_s1 + $0x158] sm:$0xff]  ;;  %v2084_v36 = vsel %vm5757_vm2, %v2079_v11, %v2083_v13 }
  0xb8   : > { %v6204_v45 = vpop.f32.mrf.mxu1  ;;  %2836 = vmatpush.bf16.msra.mxu1 %v5555_v18  ;;  %v2309_v35 = vunpack.c.l.b16 %v2084_v36 }
  0xbb   : > { %1061 = vmatmul.bf16.gmra.mxu1 %v5485_v41  ;;  %v1219_v41 = vrot.slane %v5987_v52, 5 }
  0xbc   : > { %v6215_v57 = vpop.f32.mrf.mxu0  ;;  %1442 = vmatmul.bf16.gmra.mxu2 %v1334_v46  ;;  %v2306_v46 = vunpack.c.l.b16 %v2050_v32 }
  0xbd   : > { %v1221_v19 = vrot.slane %v1219_v41, 4  ;;  %v1220_v14 = vsel %vm6057_vm5, %v4780_v12, %v1219_v41  ;;  %v4781_v12 = vrot.slane %v1125_v42, 9 }
  0xbe   : > { %v6219_v2 = vpop.f32.mrf.mxu2  ;;  %v2332_v60 = vpack.c.b16 %v2307_v47, %v2306_v46  ;;  %v1311_v7 = vunpack.c.l.b16 %v1220_v14  ;;  %v2099_v46 = vshrl.u32 %v5006_v21, 16  ;;  %v5595_v47 = vld [vmem:[%s7131_s1 + $0x218] sm:$0xff] }
  0xbf   : > { %v6222_v6 = vpop.f32.mrf.mxu3  ;;  %v1223_v53 = vsel %vm6057_vm5, %v1221_v19, %v1222_v31  ;;  %4259 = vmatpush.bf16.msra.mxu0 %v5595_v47  ;;  %v1228_v19 = vrot.slane %v1226_v38, 4  ;;  %v5639_v31 = vld [vmem:[%s5742_s26 + $0x68] sm:$0x1]  ;;  %v1227_v5 = vsel %vm6057_vm5, %v4781_v12, %v1226_v38  ;;  %v5009_v21 = vld [vmem:[%s5742_s26 + $0x7c] sm:$0xf] }
  0xc0   : > { %v6224_v9 = vpop.f32.mrf.mxu1  ;;  %v1229_v55 = vrot.slane %v5639_v31, 5  ;;  %v2101_v62 = vrot.slane %v2099_v46, 4  ;;  %v1313_v18 = vunpack.c.l.b16 %v1227_v5  ;;  %v2119_v42 = vshll.u32 %v5009_v21, 16  ;;  %v5640_v47 = vld [vmem:[%s5742_s26 + $0x70] sm:$0xf] }
  0xc1   : > { %1757 = vmatmul.bf16.gmra.mxu3 %v5525_v63 }
  0xc4   : > { %v6232_v24 = vpop.f32.mrf.mxu0 }
  0xc5   : > { %2439 = vmatmul.bf16.gmra.mxu0 %v2331_v8  ;;  %v1312_v8 = vunpack.c.l.b16 %v1223_v53  ;;  %v5007_v53 = vld [vmem:[%s5742_s26 + $0x74] sm:$0x1] }
  0xc6   : > { %v6234_v25 = vpop.f32.mrf.mxu2  ;;  %v2105_v13 = vshll.u32 %v5007_v53, 16 }
  0xc7   : > { %v6236_v28 = vpop.f32.mrf.mxu3  ;;  %v1336_v23 = vpack.c.b16 %v1312_v8, %v1311_v7  ;;  %v1230_v7 = vsel %vm6057_vm5, %v1228_v19, %v1229_v55 }
  0xc8   : > { %v6241_v33 = vpop.f32.mrf.mxu1 }
  0xcb   : > { %1066 = vmatmul.bf16.gmra.mxu1 %v5486_v29  ;;  %v2086_v29 = vshrl.u32 %v5005_v59, 16  ;;  %v5008_v59 = vld [vmem:[%s5742_s26 + $0x78] sm:$0xf] }
  0xcc   : > { %1447 = vmatmul.bf16.gmra.mxu2 %v1335_v34  ;;  %v2074_v34 = vsel %vm5757_vm2, %v2069_v10, %v2073_v49  ;;  %v2110_v36 = vshrl.u32 %v5008_v59, 16  ;;  %v2113_v37 = vshll.u32 %v5008_v59, 16 }
  0xcd   : > { %v2308_v48 = vunpack.c.l.b16 %v2074_v34  ;;  %v2088_v49 = vrot.slane %v2086_v29, 4  ;;  %v2107_v34 = vrot.slane %v2105_v13, 5  ;;  %v5528_v13 = vld [vmem:[%s5742_s26 + $0x6c] sm:$0xff] }
  0xce   : > { %v6249_v58 = vpop.f32.mrf.mxu2  ;;  %v2112_v55 = vrot.slane %v2110_v36, 4 }
  0xcf   : > { %v2333_v1 = vpack.c.b16 %v2309_v35, %v2308_v48  ;;  %v2092_v8 = vor.u32 %v2091_v61, %v2088_v49  ;;  %v1233_v48 = vrot.slane %v5640_v47, 5  ;;  %v2115_v61 = vrot.slane %v2113_v37, 5  ;;  %v5578_v47 = vld [vmem:[%s7131_s1 + $0x190] sm:$0xff] }
  0xd0   : > { %v6252_v52 = vpop.f32.mrf.mxu0  ;;  %v6254_v63 = vpop.f32.mrf.mxu3  ;;  %3152 = vmatpush.bf16.msra.mxu2 %v5578_v47 }
  0xd1   : > { %1762 = vmatmul.bf16.gmra.mxu3 %v5526_v54  ;;  %v6256_v0 = vpop.f32.mrf.mxu1  ;;  %v5527_v54 = vld [vmem:[%s5742_s26 + $0x60] sm:$0xff] }
  0xd5   : > { %2444 = vmatmul.bf16.gmra.mxu0 %v2332_v60  ;;  %v2097_v60 = vrot.slane %v2095_v44, 5  ;;  %v2123_v44 = vshrl.u32 %v5009_v21, 16 }
  0xd6   : > { %v6272_v51 = vpop.f32.mrf.mxu2 }
  0xd7   : > { %v2102_v11 = vor.u32 %v2101_v62, %v2097_v60  ;;  %v2121_v62 = vrot.slane %v2119_v42, 5  ;;  %v2125_v53 = vrot.slane %v2123_v44, 4 }
  0xd8   : > { %v6276_v22 = vpop.f32.mrf.mxu0  ;;  %v6285_v41 = vpop.f32.mrf.mxu3 }
  0xd9   : > { %v6278_v32 = vpop.f32.mrf.mxu1  ;;  %v2103_v29 = vrot.slane %v2102_v11, 4  ;;  %v5010_v11 = vld [vmem:[%s5742_s26 + $0x80] sm:$0x1]  ;;  %v2126_v21 = vor.u32 %v2125_v53, %v2121_v62  ;;  %v5554_v53 = vld [vmem:[%s7131_s1 + $0x150] sm:$0xff] }
  0xda   : > { %2837 = vmatpush.bf16.msra.mxu1 %v5554_v53 }
  0xdb   : > { %1071 = vmatmul.bf16.gmra.mxu1 %v5487_v20  ;;  %v1314_v20 = vunpack.c.l.b16 %v1230_v7  ;;  %v2108_v31 = vsel %vm5757_vm2, %v2103_v29, %v2107_v34  ;;  %v5641_v7 = vld [vmem:[%s5742_s26 + $0x74] sm:$0x1] }
  0xdc   : > { %1452 = vmatmul.bf16.gmra.mxu2 %v1336_v23  ;;  %v2093_v23 = vrot.slane %v2092_v8, 4  ;;  %v1236_v8 = vrot.slane %v5641_v7, 5  ;;  %v5489_v7 = vld [vmem:[%s5742_s26 + $0x6c] sm:$0xff] }
  0xdd   : > { %v1337_v46 = vpack.c.b16 %v1314_v20, %v1313_v18  ;;  %v2311_v18 = vunpack.c.l.b16 %v2108_v31  ;;  %v5011_v31 = vld [vmem:[%s5742_s26 + $0x84] sm:$0xf] }
  0xde   : > { %v2098_v49 = vsel %vm5757_vm2, %v2093_v23, %v2097_v60  ;;  %v1235_v60 = vrot.slane %v1233_v48, 4  ;;  %v2129_v23 = vshll.u32 %v5010_v11, 16 }
  0xdf   : > { %v6293_v14 = vpop.f32.mrf.mxu2  ;;  %v2310_v59 = vunpack.c.l.b16 %v2098_v49 }
  0xe0   : > { %v1237_v36 = vsel %vm6057_vm5, %v1235_v60, %v1236_v8 }
  0xe1   : > { %1767 = vmatmul.bf16.gmra.mxu3 %v5527_v54  ;;  %v6296_v3 = vpop.f32.mrf.mxu1  ;;  %v1126_v54 = vld [vmem:[%s5742_s26 + $0x6c] sm:$0xe]  ;;  %v2334_v37 = vpack.c.b16 %v2311_v18, %v2310_v59  ;;  %v1316_v49 = vunpack.c.l.b16 %v1237_v36 }
  0xe2   : > { %v6302_v10 = vpop.f32.mrf.mxu0  ;;  %v4782_v5 = vrot.slane %v1126_v54, 9  ;;  %v2127_v54 = vrot.slane %v2126_v21, 4 }
  0xe4   : > { %v6305_v15 = vpop.f32.mrf.mxu3  ;;  %v1234_v34 = vsel %vm6057_vm5, %v4782_v5, %v1233_v48  ;;  %v2131_v48 = vrot.slane %v2129_v23, 5 }
  0xe5   : > { %2449 = vmatmul.bf16.gmra.mxu0 %v2333_v1 }
  0xe6   : > { %v2132_v11 = vsel %vm5757_vm2, %v2127_v54, %v2131_v48 }
  0xe7   : > { %v6308_v38 = vpop.f32.mrf.mxu2 }
  0xe9   : > { %v1037_v35 = vpop.f32.mrf.mxu1 }
  0xea   : > { %v6315_v12 = vpop.f32.mrf.mxu0  ;;  %v1038_v19 = vadd.f32 %v1037_v35, %v6170_v4  ;;  %v2116_v4 = vor.u32 %v2115_v61, %v2112_v55  ;;  %v1315_v35 = vunpack.c.l.b16 %v1234_v34  ;;  %v5012_v61 = vld [vmem:[%s5742_s26 + $0x88] sm:$0xf] }
  0xeb   : > { %1076 = vmatmul.bf16.gmra.mxu1 %v5488_v27  ;;  %v2147_v21 = vshrl.u32 %v5012_v61, 16 }
  0xec   : > { %v6320_v1 = vpop.f32.mrf.mxu3  ;;  %1457 = vmatmul.bf16.gmra.mxu2 %v1337_v46  ;;  %v2117_v46 = vrot.slane %v2116_v4, 4  ;;  %v1338_v8 = vpack.c.b16 %v1316_v49, %v1315_v35  ;;  %v2137_v4 = vshll.u32 %v5011_v31, 16 }
  0xed   : > { %v2149_v54 = vrot.slane %v2147_v21, 4 }
  0xee   : > { %v2122_v5 = vsel %vm5757_vm2, %v2117_v46, %v2121_v62  ;;  %v2139_v35 = vrot.slane %v2137_v4, 5 }
  0xef   : > { %v1418_v20 = vpop.f32.mrf.mxu2 }
  0xf0   : > { %v1498_v29 = vadd.f32 %v1418_v20, %v1038_v19  ;;  %v2143_v20 = vshll.u32 %v5012_v61, 16 }
  0xf1   : > { %1772 = vmatmul.bf16.gmra.mxu3 %v5528_v13  ;;  %v1039_v27 = vpop.f32.mrf.mxu1  ;;  %v2134_v13 = vshrl.u32 %v5011_v31, 16 }
  0xf2   : > { %v2415_v42 = vpop.f32.mrf.mxu0  ;;  %v1040_v44 = vadd.f32 %v1039_v27, %v6189_v26  ;;  %v5586_v26 = vld [vmem:[%s7131_s1 + $0x1d0] sm:$0xff]  ;;  %v2145_v49 = vrot.slane %v2143_v20, 5 }
  0xf3   : > { %3834 = vmatpush.bf16.msra.mxu3 %v5586_v26  ;;  %v5594_v27 = vld [vmem:[%s7131_s1 + $0x210] sm:$0xff]  ;;  %v2136_v47 = vrot.slane %v2134_v13, 4  ;;  %v5013_v26 = vld [vmem:[%s5742_s26 + $0x8c] sm:$0x1] }
  0xf4   : > { %v1733_v19 = vpop.f32.mrf.mxu3  ;;  %4260 = vmatpush.bf16.msra.mxu0 %v5594_v27  ;;  %v2153_v4 = vshll.u32 %v5013_v26, 16  ;;  %v5644_v26 = vld [vmem:[%s5742_s26 + $0x88] sm:$0xf] }
  0xf5   : > { %2454 = vmatmul.bf16.gmra.mxu0 %v2334_v37  ;;  %v1813_v55 = vadd.f32 %v1733_v19, %v1498_v29  ;;  %v5642_v29 = vld [vmem:[%s5742_s26 + $0x7c] sm:$0xf]  ;;  %v1127_v37 = vld [vmem:[%s5742_s26 + $0x78] sm:$0xe] }
  0xf6   : > { %v1240_v34 = vrot.slane %v5642_v29, 5  ;;  %v5529_v19 = vld [vmem:[%s5742_s26 + $0x78] sm:$0xff] }
  0xf7   : > { %v1420_v60 = vpop.f32.mrf.mxu2  ;;  %v6346_v59 = vadd.f32 %v2415_v42, %v1813_v55  ;;  %v2312_v42 = vunpack.c.l.b16 %v2122_v5  ;;  %v5643_v55 = vld [vmem:[%s5742_s26 + $0x80] sm:$0x1] }
  0xf8   : > { %v1499_v18 = vadd.f32 %v1420_v60, %v1040_v44  ;;  %v2313_v44 = vunpack.c.l.b16 %v2132_v11  ;;  %v1242_v31 = vrot.slane %v1240_v34, 4  ;;  %v1243_v61 = vrot.slane %v5643_v55, 5 }
  0xf9   : > { %v1042_v23 = vpop.f32.mrf.mxu1 }
  0xfa   : > { %v2417_v62 = vpop.f32.mrf.mxu0  ;;  %v1043_v36 = vadd.f32 %v1042_v23, %v6215_v57  ;;  %v4783_v57 = vrot.slane %v1127_v37, 9  ;;  %v2335_v60 = vpack.c.b16 %v2313_v44, %v2312_v42  ;;  %v2140_v23 = vor.u32 %v2139_v35, %v2136_v47  ;;  %v5490_v47 = vld [vmem:[%s5742_s26 + $0x78] sm:$0xff]  ;;  %v5015_v35 = vld [vmem:[%s5742_s26 + $0x94] sm:$0xf] }
  0xfb   : > { %1081 = vmatmul.bf16.gmra.mxu1 %v5489_v7  ;;  %v1244_v13 = vsel %vm6057_vm5, %v1242_v31, %v1243_v61  ;;  %v2155_v44 = vrot.slane %v2153_v4, 5 }
  0xfc   : > { %v1735_v46 = vpop.f32.mrf.mxu3  ;;  %1462 = vmatmul.bf16.gmra.mxu2 %v1338_v8  ;;  %v1241_v11 = vsel %vm6057_vm5, %v4783_v57, %v1240_v34  ;;  %v2141_v27 = vrot.slane %v2140_v23, 4  ;;  %v5014_v34 = vld [vmem:[%s5742_s26 + $0x90] sm:$0xf]  ;;  %v1128_v23 = vld [vmem:[%s5742_s26 + $0x84] sm:$0xe] }
  0xfd   : > { %v1814_v48 = vadd.f32 %v1735_v46, %v1499_v18  ;;  %v2150_v18 = vor.u32 %v2149_v54, %v2145_v49  ;;  %v2158_v57 = vshrl.u32 %v5014_v34, 16 }
  0xfe   : > { %v2146_v55 = vsel %vm5757_vm2, %v2141_v27, %v2145_v49 }
  0xff   : > { %v1423_v53 = vpop.f32.mrf.mxu2  ;;  %v6357_v5 = vadd.f32 %v2417_v62, %v1814_v48  ;;  %v1318_v62 = vunpack.c.l.b16 %v1244_v13  ;;  %v2151_v42 = vrot.slane %v2150_v18, 4  ;;  %v2314_v18 = vunpack.c.l.b16 %v2146_v55 }
 0x100   : > { %v1500_v7 = vadd.f32 %v1423_v53, %v1043_v36  ;;  %v1317_v36 = vunpack.c.l.b16 %v1241_v11  ;;  %v1247_v53 = vrot.slane %v5644_v26, 5  ;;  %v2171_v11 = vshrl.u32 %v5015_v35, 16 }
 0x101   : > { %1777 = vmatmul.bf16.gmra.mxu3 %v5529_v19  ;;  %v1044_v8 = vpop.f32.mrf.mxu1  ;;  %v2156_v61 = vsel %vm5757_vm2, %v2151_v42, %v2155_v44  ;;  %v2160_v49 = vrot.slane %v2158_v57, 4 }
 0x102   : > { %v2420_v20 = vpop.f32.mrf.mxu0  ;;  %v1045_v21 = vadd.f32 %v1044_v8, %v6232_v24  ;;  %v1339_v19 = vpack.c.b16 %v1318_v62, %v1317_v36  ;;  %v2161_v24 = vshll.u32 %v5014_v34, 16  ;;  %v2167_v8 = vshll.u32 %v5015_v35, 16  ;;  %v5016_v34 = vld [vmem:[%s5742_s26 + $0x98] sm:$0x1] }
 0x103   : > { %v2315_v4 = vunpack.c.l.b16 %v2156_v61  ;;  %v4784_v36 = vrot.slane %v1128_v23, 9  ;;  %v1249_v62 = vrot.slane %v1247_v53, 4  ;;  %v2177_v26 = vshll.u32 %v5016_v34, 16 }
 0x104   : > { %v1738_v29 = vpop.f32.mrf.mxu3  ;;  %v6378_v42 = vrot.slane %v2167_v8, 5 }
 0x105   : > { %2459 = vmatmul.bf16.gmra.mxu0 %v2335_v60  ;;  %v1815_v37 = vadd.f32 %v1738_v29, %v1500_v7  ;;  %v5530_v29 = vld [vmem:[%s5742_s26 + $0x84] sm:$0xff]  ;;  %v2336_v35 = vpack.c.b16 %v2315_v4, %v2314_v18 }
 0x106   : > { %v5553_v4 = vld [vmem:[%s7131_s1 + $0x148] sm:$0xff] }
 0x107   : > { %v1425_v46 = vpop.f32.mrf.mxu2  ;;  %v6367_v48 = vadd.f32 %v2420_v20, %v1815_v37  ;;  %v2163_v20 = vrot.slane %v2161_v24, 5  ;;  %v5645_v37 = vld [vmem:[%s5742_s26 + $0x8c] sm:$0x1]  ;;  %2838 = vmatpush.bf16.msra.mxu1 %v5553_v4 }
 0x108   : > { %v1501_v54 = vadd.f32 %v1425_v46, %v1045_v21  ;;  %v1250_v27 = vrot.slane %v5645_v37, 5 }
 0x109   : > { %v1047_v31 = vpop.f32.mrf.mxu1  ;;  %v2164_v24 = vor.u32 %v2163_v20, %v2160_v49  ;;  %v2179_v20 = vrot.slane %v2177_v26, 5 }
 0x10a   : > { %v2422_v60 = vpop.f32.mrf.mxu0  ;;  %v1048_v7 = vadd.f32 %v1047_v31, %v6252_v52  ;;  %v2173_v52 = vrot.slane %v2171_v11, 4  ;;  %v1251_v57 = vsel %vm6057_vm5, %v1249_v62, %v1250_v27  ;;  %v5491_v62 = vld [vmem:[%s5742_s26 + $0x84] sm:$0xff] }
 0x10b   : > { %1086 = vmatmul.bf16.gmra.mxu1 %v5490_v47  ;;  %v1320_v11 = vunpack.c.l.b16 %v1251_v57  ;;  %v2165_v18 = vrot.slane %v2164_v24, 4  ;;  %v1129_v57 = vld [vmem:[%s5742_s26 + $0x90] sm:$0xe] }
 0x10c   : > { %v1740_v13 = vpop.f32.mrf.mxu3  ;;  %1467 = vmatmul.bf16.gmra.mxu2 %v1339_v19  ;;  %v2174_v61 = vor.u32 %v2173_v52, %v6378_v42 }
 0x10d   : > { %v1816_v21 = vadd.f32 %v1740_v13, %v1501_v54  ;;  %v1248_v54 = vsel %vm6057_vm5, %v4784_v36, %v1247_v53  ;;  %v5018_v53 = vld [vmem:[%s5742_s26 + $0xa0] sm:$0xf] }
 0x10e   : > { %v1319_v8 = vunpack.c.l.b16 %v1248_v54  ;;  %v2175_v49 = vrot.slane %v2174_v61, 4  ;;  %v2191_v37 = vshll.u32 %v5018_v53, 16  ;;  %v2195_v27 = vshrl.u32 %v5018_v53, 16  ;;  %v5647_v53 = vld [vmem:[%s5742_s26 + $0x98] sm:$0x1] }
 0x10f   : > { %v1428_v44 = vpop.f32.mrf.mxu2  ;;  %v6381_v47 = vadd.f32 %v2422_v60, %v1816_v21  ;;  %v5577_v60 = vld [vmem:[%s7131_s1 + $0x188] sm:$0xff]  ;;  %v2170_v54 = vsel %vm5757_vm2, %v2165_v18, %v6378_v42  ;;  %v4785_v42 = vrot.slane %v1129_v57, 9 }
 0x110   : > { %v1502_v46 = vadd.f32 %v1428_v44, %v1048_v7  ;;  %v5017_v7 = vld [vmem:[%s5742_s26 + $0x9c] sm:$0xf]  ;;  %3153 = vmatpush.bf16.msra.mxu2 %v5577_v60  ;;  %v1340_v34 = vpack.c.b16 %v1320_v11, %v1319_v8  ;;  %v2180_v26 = vsel %vm5757_vm2, %v2175_v49, %v2179_v20  ;;  %v5593_v60 = vld [vmem:[%s7131_s1 + $0x208] sm:$0xff]  ;;  %v2316_v4 = vunpack.c.l.b16 %v2170_v54 }
 0x111   : > { %1782 = vmatmul.bf16.gmra.mxu3 %v5530_v29  ;;  %v1049_v19 = vpop.f32.mrf.mxu1  ;;  %v2182_v21 = vshrl.u32 %v5017_v7, 16  ;;  %v2185_v29 = vshll.u32 %v5017_v7, 16  ;;  %v2193_v7 = vrot.slane %v2191_v37, 5  ;;  %4261 = vmatpush.bf16.msra.mxu0 %v5593_v60  ;;  %v2317_v49 = vunpack.c.l.b16 %v2180_v26 }
 0x112   : > { %v2425_v31 = vpop.f32.mrf.mxu0  ;;  %v1050_v55 = vadd.f32 %v1049_v19, %v6276_v22  ;;  %v5585_v22 = vld [vmem:[%s7131_s1 + $0x1c8] sm:$0xff] }
 0x113   : > { %3835 = vmatpush.bf16.msra.mxu3 %v5585_v22  ;;  %v5531_v22 = vld [vmem:[%s5742_s26 + $0x90] sm:$0xff] }
 0x114   : > { %v1743_v23 = vpop.f32.mrf.mxu3 }
 0x115   : > { %2464 = vmatmul.bf16.gmra.mxu0 %v2336_v35  ;;  %v1817_v13 = vadd.f32 %v1743_v23, %v1502_v46  ;;  %v5646_v46 = vld [vmem:[%s5742_s26 + $0x94] sm:$0xf]  ;;  %v2197_v23 = vrot.slane %v2195_v27, 4 }
 0x116   : > { %v1254_v35 = vrot.slane %v5646_v46, 5 }
 0x117   : > { %v1430_v36 = vpop.f32.mrf.mxu2  ;;  %v6401_v52 = vadd.f32 %v2425_v31, %v1817_v13  ;;  %v2184_v31 = vrot.slane %v2182_v21, 4  ;;  %v1257_v13 = vrot.slane %v5647_v53, 5 }
 0x118   : > { %v1503_v44 = vadd.f32 %v1430_v36, %v1050_v55  ;;  %v2187_v55 = vrot.slane %v2185_v29, 5  ;;  %v1256_v11 = vrot.slane %v1254_v35, 4  ;;  %v2198_v29 = vor.u32 %v2197_v23, %v2193_v7 }
 0x119   : > { %v1052_v19 = vpop.f32.mrf.mxu1  ;;  %v1255_v37 = vsel %vm6057_vm5, %v4785_v42, %v1254_v35  ;;  %v5020_v35 = vld [vmem:[%s5742_s26 + $0xa8] sm:$0xf] }
 0x11a   : > { %v2427_v24 = vpop.f32.mrf.mxu0  ;;  %v1053_v61 = vadd.f32 %v1052_v19, %v6302_v10  ;;  %v5019_v10 = vld [vmem:[%s5742_s26 + $0xa4] sm:$0x1]  ;;  %v2188_v20 = vor.u32 %v2187_v55, %v2184_v31  ;;  %v1258_v27 = vsel %vm6057_vm5, %v1256_v11, %v1257_v13  ;;  %v1321_v26 = vunpack.c.l.b16 %v1255_v37  ;;  %v5492_v11 = vld [vmem:[%s5742_s26 + $0x90] sm:$0xff] }
 0x11b   : > { %1091 = vmatmul.bf16.gmra.mxu1 %v5491_v62  ;;  %v2201_v36 = vshll.u32 %v5019_v10, 16  ;;  %v1322_v31 = vunpack.c.l.b16 %v1258_v27  ;;  %v2206_v13 = vshrl.u32 %v5020_v35, 16 }
 0x11c   : > { %v1745_v8 = vpop.f32.mrf.mxu3  ;;  %1472 = vmatmul.bf16.gmra.mxu2 %v1340_v34  ;;  %v2189_v57 = vrot.slane %v2188_v20, 4 }
 0x11d   : > { %v1818_v18 = vadd.f32 %v1745_v8, %v1503_v44  ;;  %v2337_v44 = vpack.c.b16 %v2317_v49, %v2316_v4  ;;  %v2203_v55 = vrot.slane %v2201_v36, 5  ;;  %v5021_v8 = vld [vmem:[%s5742_s26 + $0xac] sm:$0xf]  ;;  %v1341_v53 = vpack.c.b16 %v1322_v31, %v1321_v26  ;;  %v5532_v26 = vld [vmem:[%s5742_s26 + $0x9c] sm:$0xff] }
 0x11e   : > { %v2215_v4 = vshll.u32 %v5021_v8, 16  ;;  %v2219_v49 = vshrl.u32 %v5021_v8, 16 }
 0x11f   : > { %v1433_v21 = vpop.f32.mrf.mxu2  ;;  %v6421_v34 = vadd.f32 %v2427_v24, %v1818_v18  ;;  %v2194_v24 = vsel %vm5757_vm2, %v2189_v57, %v2193_v7  ;;  %v1130_v7 = vld [vmem:[%s5742_s26 + $0x9c] sm:$0xe] }
 0x120   : > { %v1504_v62 = vadd.f32 %v1433_v21, %v1053_v61  ;;  %v2199_v61 = vrot.slane %v2198_v29, 4  ;;  %v5648_v21 = vld [vmem:[%s5742_s26 + $0xa0] sm:$0xf]  ;;  %v4786_v31 = vrot.slane %v1130_v7, 9  ;;  %v5023_v7 = vld [vmem:[%s5742_s26 + $0xb4] sm:$0xf] }
 0x121   : > { %1787 = vmatmul.bf16.gmra.mxu3 %v5531_v22  ;;  %v1054_v46 = vpop.f32.mrf.mxu1  ;;  %v2209_v22 = vshll.u32 %v5020_v35, 16  ;;  %v1261_v29 = vrot.slane %v5648_v21, 5 }
 0x122   : > { %v2430_v19 = vpop.f32.mrf.mxu0  ;;  %v1055_v54 = vadd.f32 %v1054_v46, %v6315_v12  ;;  %v2204_v12 = vsel %vm5757_vm2, %v2199_v61, %v2203_v55  ;;  %v5649_v55 = vld [vmem:[%s5742_s26 + $0xa4] sm:$0x1] }
 0x123   : > { %v2319_v37 = vunpack.c.l.b16 %v2204_v12  ;;  %v2211_v46 = vrot.slane %v2209_v22, 5  ;;  %v1263_v61 = vrot.slane %v1261_v29, 4 }
 0x124   : > { %v1748_v60 = vpop.f32.mrf.mxu3 }
 0x125   : > { %2469 = vmatmul.bf16.gmra.mxu0 %v2337_v44  ;;  %v1819_v23 = vadd.f32 %v1748_v60, %v1504_v62  ;;  %v2318_v62 = vunpack.c.l.b16 %v2194_v24  ;;  %v2208_v44 = vrot.slane %v2206_v13, 4  ;;  %v1264_v60 = vrot.slane %v5649_v55, 5 }
 0x126   : > { %v1262_v13 = vsel %vm6057_vm5, %v4786_v31, %v1261_v29  ;;  %v5024_v31 = vld [vmem:[%s5742_s26 + $0xb8] sm:$0xf]  ;;  %v2233_v55 = vshll.u32 %v5023_v7, 16 }
 0x127   : > { %v1435_v42 = vpop.f32.mrf.mxu2  ;;  %v6431_v10 = vadd.f32 %v2430_v19, %v1819_v23  ;;  %v2217_v19 = vrot.slane %v2215_v4, 5  ;;  %v5022_v23 = vld [vmem:[%s5742_s26 + $0xb0] sm:$0x1]  ;;  %v1323_v21 = vunpack.c.l.b16 %v1262_v13  ;;  %v1131_v13 = vld [vmem:[%s5742_s26 + $0xa8] sm:$0xe] }
 0x128   : > { %v1505_v18 = vadd.f32 %v1435_v42, %v1055_v54  ;;  %v2221_v54 = vrot.slane %v2219_v49, 4  ;;  %v2338_v42 = vpack.c.b16 %v2319_v37, %v2318_v62  ;;  %v2225_v4 = vshll.u32 %v5022_v23, 16 }
 0x129   : > { %v1057_v20 = vpop.f32.mrf.mxu1 }
 0x12a   : > { %v2432_v36 = vpop.f32.mrf.mxu0  ;;  %v1058_v35 = vadd.f32 %v1057_v20, %v6165_v56  ;;  %v2222_v22 = vor.u32 %v2221_v54, %v2217_v19  ;;  %v5576_v56 = vld [vmem:[%s7131_s1 + $0x180] sm:$0xff] }
 0x12b   : > { %1096 = vmatmul.bf16.gmra.mxu1 %v5492_v11  ;;  %v2212_v11 = vor.u32 %v2211_v46, %v2208_v44  ;;  %3154 = vmatpush.bf16.msra.mxu2 %v5576_v56  ;;  %v5584_v44 = vld [vmem:[%s7131_s1 + $0x1c0] sm:$0xff]  ;;  %v2235_v56 = vrot.slane %v2233_v55, 5 }
 0x12c   : > { %v1750_v27 = vpop.f32.mrf.mxu3  ;;  %1477 = vmatmul.bf16.gmra.mxu2 %v1341_v53  ;;  %v2223_v37 = vrot.slane %v2222_v22, 4  ;;  %v5552_v46 = vld [vmem:[%s7131_s1 + $0x140] sm:$0xff]  ;;  %3836 = vmatpush.bf16.msra.mxu3 %v5584_v44  ;;  %v2243_v22 = vshrl.u32 %v5024_v31, 16 }
 0x12d   : > { %v1820_v57 = vadd.f32 %v1750_v27, %v1505_v18  ;;  %v1265_v18 = vsel %vm6057_vm5, %v1263_v61, %v1264_v60  ;;  %v2213_v29 = vrot.slane %v2212_v11, 4  ;;  %v2227_v27 = vrot.slane %v2225_v4, 5  ;;  %2839 = vmatpush.bf16.msra.mxu1 %v5552_v46  ;;  %v5592_v4 = vld [vmem:[%s7131_s1 + $0x200] sm:$0xff] }
 0x12e   : > { %v2230_v61 = vshrl.u32 %v5023_v7, 16  ;;  %4262 = vmatpush.bf16.msra.mxu0 %v5592_v4  ;;  %v5533_v7 = vld [vmem:[%s5742_s26 + $0xa8] sm:$0xff]  ;;  %v5026_v4 = vld [vmem:[%s5742_s26 + $0xc0] sm:$0xf] }
 0x12f   : > { %v1438_v8 = vpop.f32.mrf.mxu2  ;;  %v6439_v12 = vadd.f32 %v2432_v36, %v1820_v57  ;;  %v1324_v36 = vunpack.c.l.b16 %v1265_v18  ;;  %v2239_v18 = vshll.u32 %v5024_v31, 16 }
 0x130   : > { %v1506_v24 = vadd.f32 %v1438_v8, %v1058_v35 }
 0x131   : > { %1792 = vmatmul.bf16.gmra.mxu3 %v5532_v26  ;;  %v1059_v53 = vpop.f32.mrf.mxu1  ;;  %v5493_v26 = vld [vmem:[%s5742_s26 + $0x9c] sm:$0xff]  ;;  %v1342_v23 = vpack.c.b16 %v1324_v36, %v1323_v21  ;;  %v2241_v46 = vrot.slane %v2239_v18, 5 }
 0x132   : > { %v2435_v49 = vpop.f32.mrf.mxu0  ;;  %v1060_v54 = vadd.f32 %v1059_v53, %v6180_v16  ;;  %v5650_v16 = vld [vmem:[%s5742_s26 + $0xac] sm:$0xf] }
 0x133   : > { %v1268_v11 = vrot.slane %v5650_v16, 5 }
 0x134   : > { %v1753_v20 = vpop.f32.mrf.mxu3 }
 0x135   : > { %2474 = vmatmul.bf16.gmra.mxu0 %v2338_v42  ;;  %v1821_v62 = vadd.f32 %v1753_v20, %v1506_v24  ;;  %v2218_v42 = vsel %vm5757_vm2, %v2213_v29, %v2217_v19  ;;  %v2228_v24 = vsel %vm5757_vm2, %v2223_v37, %v2227_v27  ;;  %v1270_v29 = vrot.slane %v1268_v11, 4  ;;  %v5651_v37 = vld [vmem:[%s5742_s26 + $0xb0] sm:$0x1] }
 0x136   : > { %v2320_v20 = vunpack.c.l.b16 %v2218_v42  ;;  %v2321_v21 = vunpack.c.l.b16 %v2228_v24  ;;  %v1271_v27 = vrot.slane %v5651_v37, 5  ;;  %v2254_v37 = vshrl.u32 %v5026_v4, 16 }
 0x137   : > { %v1440_v57 = vpop.f32.mrf.mxu2  ;;  %v6458_v60 = vadd.f32 %v2435_v49, %v1821_v62  ;;  %v2232_v49 = vrot.slane %v2230_v61, 4  ;;  %v4787_v62 = vrot.slane %v1131_v13, 9 }
 0x138   : > { %v1507_v35 = vadd.f32 %v1440_v57, %v1060_v54  ;;  %v2245_v54 = vrot.slane %v2243_v22, 4 }
 0x139   : > { %v1062_v8 = vpop.f32.mrf.mxu1  ;;  %v2236_v31 = vor.u32 %v2235_v56, %v2232_v49  ;;  %v1269_v42 = vsel %vm6057_vm5, %v4787_v62, %v1268_v11  ;;  %v5027_v56 = vld [vmem:[%s5742_s26 + $0xc4] sm:$0xf]  ;;  %v5494_v62 = vld [vmem:[%s5742_s26 + $0xa8] sm:$0xff] }
 0x13a   : > { %v2437_v53 = vpop.f32.mrf.mxu0  ;;  %v1063_v44 = vadd.f32 %v1062_v8, %v6204_v45  ;;  %v1272_v45 = vsel %vm6057_vm5, %v1270_v29, %v1271_v27  ;;  %v2246_v24 = vor.u32 %v2245_v54, %v2241_v46  ;;  %v1325_v22 = vunpack.c.l.b16 %v1269_v42 }
 0x13b   : > { %1101 = vmatmul.bf16.gmra.mxu1 %v5493_v26  ;;  %v5025_v26 = vld [vmem:[%s5742_s26 + $0xbc] sm:$0x1]  ;;  %v2237_v13 = vrot.slane %v2236_v31, 4  ;;  %v2257_v27 = vshll.u32 %v5026_v4, 16  ;;  %v2267_v31 = vshrl.u32 %v5027_v56, 16 }
 0x13c   : > { %v1755_v19 = vpop.f32.mrf.mxu3  ;;  %1482 = vmatmul.bf16.gmra.mxu2 %v1342_v23  ;;  %v2249_v16 = vshll.u32 %v5025_v26, 16  ;;  %v2263_v26 = vshll.u32 %v5027_v56, 16 }
 0x13d   : > { %v1822_v36 = vadd.f32 %v1755_v19, %v1507_v35  ;;  %v2339_v35 = vpack.c.b16 %v2321_v21, %v2320_v20  ;;  %v5652_v19 = vld [vmem:[%s5742_s26 + $0x10] sm:$0xf]  ;;  %v2247_v21 = vrot.slane %v2246_v24, 4  ;;  %v2242_v29 = vsel %vm5757_vm2, %v2237_v13, %v2241_v46 }
 0x13e   : > { %v2593_v20 = vrot.slane %v5652_v19, 5  ;;  %v2256_v13 = vrot.slane %v2254_v37, 4  ;;  %v2269_v56 = vrot.slane %v2267_v31, 4 }
 0x13f   : > { %v1443_v57 = vpop.f32.mrf.mxu2  ;;  %v6473_v55 = vadd.f32 %v2437_v53, %v1822_v36  ;;  %v1326_v53 = vunpack.c.l.b16 %v1272_v45  ;;  %v2251_v36 = vrot.slane %v2249_v16, 5  ;;  %v5654_v45 = vld [vmem:[%s5742_s26 + $0x14] sm:$0x1] }
 0x140   : > { %v1508_v61 = vadd.f32 %v1443_v57, %v1063_v44  ;;  %v2595_v42 = vrot.slane %v2593_v20, 4  ;;  %v2596_v24 = vrot.slane %v5654_v45, 5 }
 0x141   : > { %7139 = vst [vmem:[#allocation2_spill] sm:$0xff] %v6473_v55  ;;  %1797 = vmatmul.bf16.gmra.mxu3 %v5533_v7  ;;  %v1064_v23 = vpop.f32.mrf.mxu1  ;;  %v1343_v57 = vpack.c.b16 %v1326_v53, %v1325_v22  ;;  %v2252_v46 = vsel %vm5757_vm2, %v2247_v21, %v2251_v36  ;;  %v5077_v22 = vld [vmem:[%s5742_s26 + $0xc] sm:$0xe]  ;;  %v5028_v21 = vld [vmem:[%s5742_s26 + $0xc8] sm:$0x1] }
 0x142   : > { %v2440_v8 = vpop.f32.mrf.mxu0  ;;  %v1065_v11 = vadd.f32 %v1064_v23, %v6224_v9  ;;  %v5653_v9 = vld [vmem:[%s5742_s26 + $0xb8] sm:$0xf]  ;;  %v5093_v19 = vrot.slane %v5077_v22, 9 }
 0x143   : > { %v1275_v23 = vrot.slane %v5653_v9, 5  ;;  %v2323_v9 = vunpack.c.l.b16 %v2252_v46 }
 0x144   : > { %v1758_v18 = vpop.f32.mrf.mxu3 }
 0x145   : > { %2479 = vmatmul.bf16.gmra.mxu0 %v2339_v35  ;;  %v1823_v49 = vadd.f32 %v1758_v18, %v1508_v61  ;;  %v1132_v35 = vld [vmem:[%s5742_s26 + $0xb4] sm:$0xe]  ;;  %v2259_v18 = vrot.slane %v2257_v27, 5  ;;  %v1277_v45 = vrot.slane %v1275_v23, 4 }
 0x146   : > { %v4788_v4 = vrot.slane %v1132_v35, 9  ;;  %v2273_v35 = vshll.u32 %v5028_v21, 16  ;;  %v5495_v21 = vld [vmem:[%s5742_s26 + $0xb4] sm:$0xff] }
 0x147   : > { %v1445_v7 = vpop.f32.mrf.mxu2  ;;  %v6486_v44 = vadd.f32 %v2440_v8, %v1823_v49  ;;  %v2322_v8 = vunpack.c.l.b16 %v2242_v29  ;;  %v2265_v49 = vrot.slane %v2263_v26, 5  ;;  %v2597_v29 = vsel %vm6057_vm5, %v2595_v42, %v2596_v24  ;;  %v5301_v42 = vld [vmem:[%s5742_s26 + $0x18] sm:$0xf] }
 0x148   : > { %v1509_v54 = vadd.f32 %v1445_v7, %v1065_v11  ;;  %v5534_v7 = vld [vmem:[%s5742_s26 + $0xb4] sm:$0xff]  ;;  %v2260_v27 = vor.u32 %v2259_v18, %v2256_v13  ;;  %v1276_v31 = vsel %vm6057_vm5, %v4788_v4, %v1275_v23  ;;  %v6512_v18 = vld [vmem:[%s5742_s26 + $0x1c] sm:$0xf] }
 0x149   : > { %7140 = vst [vmem:[#allocation3_spill] sm:$0xff] %v6486_v44  ;;  %v1067_v61 = vpop.f32.mrf.mxu1  ;;  %v5655_v44 = vld [vmem:[%s5742_s26 + $0xbc] sm:$0x1]  ;;  %v1327_v22 = vunpack.c.l.b16 %v1276_v31 }
 0x14a   : > { %v2442_v16 = vpop.f32.mrf.mxu0  ;;  %v1278_v55 = vrot.slane %v5655_v44, 5  ;;  %v1068_v36 = vadd.f32 %v1067_v61, %v6241_v33  ;;  %v2270_v44 = vor.u32 %v2269_v56, %v2265_v49  ;;  %v2340_v33 = vpack.c.b16 %v2323_v9, %v2322_v8 }
 0x14b   : > { %1106 = vmatmul.bf16.gmra.mxu1 %v5494_v62  ;;  %v2594_v62 = vsel %vm6057_vm5, %v5093_v19, %v2593_v20  ;;  %v2275_v19 = vrot.slane %v2273_v35, 5  ;;  %v3317_v8 = vshrl.u32 %v5301_v42, 16  ;;  %v3320_v9 = vshll.u32 %v5301_v42, 16  ;;  %v5303_v35 = vld [vmem:[%s5742_s26 + $0x20] sm:$0x1] }
 0x14c   : > { %v1760_v53 = vpop.f32.mrf.mxu3  ;;  %1487 = vmatmul.bf16.gmra.mxu2 %v1343_v57  ;;  %v2720_v57 = vunpack.c.l.b16 %v2594_v62  ;;  %v1279_v20 = vsel %vm6057_vm5, %v1277_v45, %v1278_v55  ;;  %v2271_v56 = vrot.slane %v2270_v44, 4  ;;  %v3326_v55 = vshll.u32 %v6512_v18, 16 }
 0x14d   : > { %v1824_v11 = vadd.f32 %v1760_v53, %v1509_v54  ;;  %v2721_v54 = vunpack.c.l.b16 %v2597_v29  ;;  %v2261_v53 = vrot.slane %v2260_v27, 4  ;;  %v1328_v4 = vunpack.c.l.b16 %v1279_v20 }
 0x14e   : > { %v2276_v27 = vsel %vm5757_vm2, %v2271_v56, %v2275_v19  ;;  %v3328_v31 = vrot.slane %v3326_v55, 5  ;;  %v5304_v56 = vld [vmem:[%s5742_s26 + $0x24] sm:$0xf] }
 0x14f   : > { %v1448_v37 = vpop.f32.mrf.mxu2  ;;  %v6506_v46 = vpack.c.b16 %v2721_v54, %v2720_v57  ;;  %v6509_v24 = vadd.f32 %v2442_v16, %v1824_v11  ;;  %v3330_v16 = vshrl.u32 %v6512_v18, 16  ;;  %v1344_v29 = vpack.c.b16 %v1328_v4, %v1327_v22 }
 0x150   : > { %v1510_v26 = vadd.f32 %v1448_v37, %v1068_v36  ;;  %v2266_v37 = vsel %vm5757_vm2, %v2261_v53, %v2265_v49  ;;  %v3319_v54 = vrot.slane %v3317_v8, 4  ;;  %v2325_v20 = vunpack.c.l.b16 %v2276_v27 }
 0x151   : > { %1802 = vmatmul.bf16.gmra.mxu3 %v5534_v7  ;;  %v1069_v61 = vpop.f32.mrf.mxu1  ;;  %v3332_v44 = vrot.slane %v3330_v16, 4  ;;  %v3336_v53 = vshll.u32 %v5303_v35, 16  ;;  %v3344_v27 = vshll.u32 %v5304_v56, 16 }
 0x152   : > { %v2445_v13 = vpop.f32.mrf.mxu0  ;;  %v1070_v11 = vadd.f32 %v1069_v61, %v6256_v0  ;;  %v2324_v61 = vunpack.c.l.b16 %v2266_v37  ;;  %v3341_v37 = vshrl.u32 %v5304_v56, 16  ;;  %v5656_v56 = vld [vmem:[%s5742_s26 + $0x1c] sm:$0xf] }
 0x153   : > { %v3333_v22 = vor.u32 %v3332_v44, %v3328_v31 }
 0x154   : > { %v1763_v23 = vpop.f32.mrf.mxu3  ;;  %v2341_v19 = vpack.c.b16 %v2325_v20, %v2324_v61  ;;  %v4019_v20 = vrot.slane %v5303_v35, 5 }
 0x155   : > { %2484 = vmatmul.bf16.gmra.mxu0 %v2340_v33  ;;  %v1825_v7 = vadd.f32 %v1763_v23, %v1510_v26  ;;  %v3322_v26 = vrot.slane %v3320_v9, 5  ;;  %v3334_v16 = vrot.slane %v3333_v22, 4 }
 0x157   : > { %v1450_v45 = vpop.f32.mrf.mxu2  ;;  %v6518_v36 = vadd.f32 %v2445_v13, %v1825_v7  ;;  %v5535_v13 = vld [vmem:[%s5742_s26 + $0xc0] sm:$0xff]  ;;  %v3323_v49 = vor.u32 %v3322_v26, %v3319_v54  ;;  %v6529_v7 = vld [vmem:[%s5742_s26 + $0x28] sm:$0xf] }
 0x158   : > { %v1511_v62 = vadd.f32 %v1450_v45, %v1070_v11  ;;  %v3338_v11 = vrot.slane %v3336_v53, 5 }
 0x159   : > { %v1072_v57 = vpop.f32.mrf.mxu1  ;;  %v3324_v55 = vrot.slane %v3323_v49, 4  ;;  %v3346_v49 = vrot.slane %v3344_v27, 5 }
 0x15a   : > { %v2447_v0 = vpop.f32.mrf.mxu0  ;;  %v1073_v23 = vadd.f32 %v1072_v57, %v6278_v32  ;;  %v3350_v32 = vshll.u32 %v6529_v7, 16  ;;  %v3354_v57 = vshrl.u32 %v6529_v7, 16 }
 0x15b   : > { %1111 = vmatmul.bf16.gmra.mxu1 %v5495_v21  ;;  %v3329_v44 = vsel %vm5757_vm2, %v3324_v55, %v3328_v31  ;;  %v5560_v31 = vld [vmem:[%s5742_s26 + $0x18] sm:$0xff] }
 0x15c   : > { %v1765_v33 = vpop.f32.mrf.mxu3  ;;  %1492 = vmatmul.bf16.gmra.mxu2 %v1344_v29  ;;  %v4016_v29 = vrot.slane %v6512_v18, 5  ;;  %v6542_v22 = vrot.slane %v3350_v32, 5  ;;  %v3356_v53 = vrot.slane %v3354_v57, 4 }
 0x15d   : > { %v1826_v42 = vadd.f32 %v1765_v33, %v1511_v62  ;;  %v5397_v62 = vld [vmem:[%s5742_s26 + $0x18] sm:$0xe] }
 0x15e   : > { %v5413_v33 = vrot.slane %v5397_v62, 9  ;;  %v4018_v61 = vrot.slane %v4016_v29, 4 }
 0x15f   : > { %v1453_v4 = vpop.f32.mrf.mxu2  ;;  %v6531_v45 = vadd.f32 %v2447_v0, %v1826_v42  ;;  %v3339_v0 = vsel %vm5757_vm2, %v3334_v16, %v3338_v11  ;;  %v3343_v42 = vrot.slane %v3341_v37, 4  ;;  %v5078_v16 = vld [vmem:[%s5742_s26 + $0x18] sm:$0xe]  ;;  %v3357_v37 = vor.u32 %v3356_v53, %v6542_v22 }
 0x160   : > { %v1512_v8 = vadd.f32 %v1453_v4, %v1073_v23  ;;  %v4017_v11 = vsel %vm6057_vm5, %v5413_v33, %v4016_v29  ;;  %v4020_v62 = vsel %vm6057_vm5, %v4018_v61, %v4019_v20  ;;  %v5094_v57 = vrot.slane %v5078_v16, 9  ;;  %v5307_v16 = vld [vmem:[%s5742_s26 + $0x30] sm:$0xf] }
 0x161   : > { %1807 = vmatmul.bf16.gmra.mxu3 %v5535_v13  ;;  %v1074_v9 = vpop.f32.mrf.mxu1  ;;  %v4143_v29 = vunpack.c.l.b16 %v4017_v11  ;;  %v4144_v33 = vunpack.c.l.b16 %v4020_v62  ;;  %v6571_v11 = vld [vmem:[%s5742_s26 + $0x34] sm:$0xf] }
 0x162   : > { %v2450_v21 = vpop.f32.mrf.mxu0  ;;  %v1075_v18 = vadd.f32 %v1074_v9, %v6296_v3  ;;  %v3717_v3 = vunpack.c.l.b16 %v3329_v44  ;;  %v3718_v9 = vunpack.c.l.b16 %v3339_v0 }
 0x164   : > { %v1768_v54 = vpop.f32.mrf.mxu3 }
 0x165   : > { %2489 = vmatmul.bf16.gmra.mxu0 %v2341_v19  ;;  %v1827_v26 = vadd.f32 %v1768_v54, %v1512_v8  ;;  %v2600_v19 = vrot.slane %v5656_v56, 5  ;;  %v6549_v8 = vld [vmem:[%s5742_s26 + $0x2c] sm:$0x1]  ;;  %v5398_v56 = vld [vmem:[%s5742_s26 + $0x24] sm:$0xe] }
 0x166   : > { %v3360_v27 = vshll.u32 %v6549_v8, 16 }
 0x167   : > { %v1455_v13 = vpop.f32.mrf.mxu2  ;;  %v6544_v23 = vadd.f32 %v2450_v21, %v1827_v26  ;;  %v3347_v21 = vor.u32 %v3346_v49, %v3343_v42  ;;  %v2602_v54 = vrot.slane %v2600_v19, 4  ;;  %v5657_v26 = vld [vmem:[%s5742_s26 + $0x20] sm:$0x1]  ;;  %v3358_v42 = vrot.slane %v3357_v37, 4 }
 0x168   : > { %v1513_v4 = vadd.f32 %v1455_v13, %v1075_v18  ;;  %v2603_v44 = vrot.slane %v5657_v26, 5  ;;  %v3749_v18 = vpack.c.b16 %v3718_v9, %v3717_v3  ;;  %v3362_v13 = vrot.slane %v3360_v27, 5 }
 0x169   : > { %v1077_v55 = vpop.f32.mrf.mxu1  ;;  %v3348_v20 = vrot.slane %v3347_v21, 4  ;;  %v2601_v53 = vsel %vm6057_vm5, %v5094_v57, %v2600_v19  ;;  %v4175_v3 = vpack.c.b16 %v4144_v33, %v4143_v29  ;;  %v5414_v37 = vrot.slane %v5398_v56, 9 }
 0x16a   : > { %v2452_v35 = vpop.f32.mrf.mxu0  ;;  %v1078_v61 = vadd.f32 %v1077_v55, %v6175_v17  ;;  %v2722_v62 = vunpack.c.l.b16 %v2601_v53  ;;  %v3365_v57 = vshrl.u32 %v5307_v16, 16  ;;  %v4026_v26 = vrot.slane %v6549_v8, 5  ;;  %v5079_v53 = vld [vmem:[%s5742_s26 + $0x24] sm:$0xe] }
 0x16b   : > { %2840 = vmatmul.bf16.vlgmr.msra.gmra.mxu1 %v6506_v46  ;;  %v3353_v19 = vsel %vm5757_vm2, %v3348_v20, %v6542_v22 }
 0x16c   : > { %v1770_v32 = vpop.f32.mrf.mxu3  ;;  %3155 = vmatmul.bf16.vlgmr.msra.gmra.mxu2 %v5560_v31  ;;  %v2604_v31 = vsel %vm6057_vm5, %v2602_v54, %v2603_v44  ;;  %v3374_v44 = vshll.u32 %v6571_v11, 16  ;;  %v3719_v33 = vunpack.c.l.b16 %v3353_v19  ;;  %v3367_v8 = vrot.slane %v3365_v57, 4 }
 0x16d   : > { %v1828_v0 = vadd.f32 %v1770_v32, %v1513_v4  ;;  %v4023_v4 = vrot.slane %v6529_v7, 5  ;;  %v2723_v21 = vunpack.c.l.b16 %v2604_v31  ;;  %v3363_v7 = vsel %vm5757_vm2, %v3358_v42, %v3362_v13  ;;  %v5561_v13 = vld [vmem:[%s5742_s26 + $0x24] sm:$0xff] }
 0x16f   : > { %v1458_v46 = vpop.f32.mrf.mxu2  ;;  %v6568_v17 = vadd.f32 %v2452_v35, %v1828_v0  ;;  %v4025_v32 = vrot.slane %v4023_v4, 4  ;;  %v3368_v35 = vshll.u32 %v5307_v16, 16  ;;  %v3378_v0 = vshrl.u32 %v6571_v11, 16 }
 0x170   : > { %v1514_v49 = vadd.f32 %v1458_v46, %v1078_v61  ;;  %v2753_v29 = vpack.c.b16 %v2723_v21, %v2722_v62  ;;  %v5658_v61 = vld [vmem:[%s5742_s26 + $0x28] sm:$0xf]  ;;  %v5095_v21 = vrot.slane %v5079_v53, 9 }
 0x171   : > { %3837 = vmatmul.bf16.vlgmr.msra.gmra.mxu3 %v3749_v18  ;;  %v1079_v9 = vpop.f32.mrf.mxu1  ;;  %v2607_v46 = vrot.slane %v5658_v61, 5  ;;  %v3370_v31 = vrot.slane %v3368_v35, 5  ;;  %v3380_v16 = vrot.slane %v3378_v0, 4  ;;  %v5310_v61 = vld [vmem:[%s5742_s26 + $0x3c] sm:$0xf] }
 0x172   : > { %v2455_v55 = vpop.f32.mrf.mxu0  ;;  %v1080_v22 = vadd.f32 %v1079_v9, %v6199_v39  ;;  %v4027_v39 = vsel %vm6057_vm5, %v4025_v32, %v4026_v26  ;;  %v6591_v9 = vrot.slane %v3374_v44, 5 }
 0x173   : > { %v2609_v19 = vrot.slane %v2607_v46, 4 }
 0x174   : > { %v1773_v27 = vpop.f32.mrf.mxu3  ;;  %v3381_v26 = vor.u32 %v3380_v16, %v6591_v9  ;;  %v5399_v16 = vld [vmem:[%s5742_s26 + $0x30] sm:$0xe] }
 0x175   : > { %4263 = vmatmul.bf16.vlgmr.msra.gmra.mxu0 %v4175_v3  ;;  %v1829_v54 = vadd.f32 %v1773_v27, %v1514_v49  ;;  %v3720_v49 = vunpack.c.l.b16 %v3363_v7  ;;  %v4024_v3 = vsel %vm6057_vm5, %v5414_v37, %v4023_v4  ;;  %v5659_v27 = vld [vmem:[%s5742_s26 + $0x2c] sm:$0x1]  ;;  %v4146_v4 = vunpack.c.l.b16 %v4027_v39 }
 0x176   : > { %v2610_v7 = vrot.slane %v5659_v27, 5  ;;  %v4145_v35 = vunpack.c.l.b16 %v4024_v3  ;;  %v3371_v37 = vor.u32 %v3370_v31, %v3367_v8 }
 0x177   : > { %v1460_v18 = vpop.f32.mrf.mxu2  ;;  %v6583_v20 = vadd.f32 %v2455_v55, %v1829_v54  ;;  %v6594_v55 = vld [vmem:[%s5742_s26 + $0x38] sm:$0x1]  ;;  %v3750_v32 = vpack.c.b16 %v3720_v49, %v3719_v33  ;;  %v3382_v49 = vrot.slane %v3381_v26, 4 }
 0x178   : > { %v1515_v42 = vadd.f32 %v1460_v18, %v1080_v22  ;;  %v3384_v44 = vshll.u32 %v6594_v55, 16  ;;  %v2608_v18 = vsel %vm6057_vm5, %v5095_v21, %v2607_v46  ;;  %v3372_v8 = vrot.slane %v3371_v37, 4 }
 0x179   : > { %v1082_v56 = vpop.f32.mrf.mxu1  ;;  %v2724_v46 = vunpack.c.l.b16 %v2608_v18  ;;  %v3389_v21 = vshrl.u32 %v5310_v61, 16  ;;  %v4033_v26 = vrot.slane %v6594_v55, 5 }
 0x17a   : > { %v2457_v62 = vpop.f32.mrf.mxu0  ;;  %v1083_v0 = vadd.f32 %v1082_v56, %v6219_v2  ;;  %v3386_v31 = vrot.slane %v3384_v44, 5  ;;  %v4030_v2 = vrot.slane %v6571_v11, 5 }
 0x17b   : > { %2845 = vmatmul.bf16.gmra.mxu1 %v2753_v29  ;;  %v2611_v29 = vsel %vm6057_vm5, %v2609_v19, %v2610_v7  ;;  %v3392_v19 = vshll.u32 %v5310_v61, 16  ;;  %v3391_v44 = vrot.slane %v3389_v21, 4 }
 0x17c   : > { %v1775_v57 = vpop.f32.mrf.mxu3  ;;  %3160 = vmatmul.bf16.gmra.mxu2 %v5561_v13  ;;  %v4176_v13 = vpack.c.b16 %v4146_v4, %v4145_v35  ;;  %v2725_v39 = vunpack.c.l.b16 %v2611_v29  ;;  %v3377_v35 = vsel %vm5757_vm2, %v3372_v8, %v6591_v9  ;;  %v5415_v4 = vrot.slane %v5399_v16, 9 }
 0x17d   : > { %v1830_v54 = vadd.f32 %v1775_v57, %v1515_v42  ;;  %v6606_v42 = vld [vmem:[%s5742_s26 + $0x40] sm:$0xf]  ;;  %v4032_v37 = vrot.slane %v4030_v2, 4 }
 0x17e   : > { %v3398_v27 = vshll.u32 %v6606_v42, 16  ;;  %v3402_v7 = vshrl.u32 %v6606_v42, 16 }
 0x17f   : > { %v1463_v22 = vpop.f32.mrf.mxu2  ;;  %v6609_v56 = vadd.f32 %v2457_v62, %v1830_v54  ;;  %v3387_v62 = vsel %vm5757_vm2, %v3382_v49, %v3386_v31  ;;  %v6628_v49 = vld [vmem:[%s5742_s26 + $0x44] sm:$0x1]  ;;  %v4034_v16 = vsel %vm6057_vm5, %v4032_v37, %v4033_v26 }
 0x180   : > { %v1516_v53 = vadd.f32 %v1463_v22, %v1083_v0  ;;  %v3394_v22 = vrot.slane %v3392_v19, 5  ;;  %v6621_v9 = vrot.slane %v3398_v27, 5  ;;  %v3404_v18 = vrot.slane %v3402_v7, 4 }
 0x181   : > { %3842 = vmatmul.bf16.gmra.mxu3 %v3750_v32  ;;  %v1084_v33 = vpop.f32.mrf.mxu1  ;;  %v2754_v32 = vpack.c.b16 %v2725_v39, %v2724_v46  ;;  %v3722_v31 = vunpack.c.l.b16 %v3387_v62  ;;  %v5080_v46 = vld [vmem:[%s5742_s26 + $0x30] sm:$0xe]  ;;  %v4031_v39 = vsel %vm6057_vm5, %v5415_v4, %v4030_v2  ;;  %v3408_v19 = vshll.u32 %v6628_v49, 16 }
 0x182   : > { %v2460_v3 = vpop.f32.mrf.mxu0  ;;  %v1085_v54 = vadd.f32 %v1084_v33, %v6234_v25  ;;  %v3721_v33 = vunpack.c.l.b16 %v3377_v35  ;;  %v3405_v21 = vor.u32 %v3404_v18, %v6621_v9  ;;  %v5096_v7 = vrot.slane %v5080_v46, 9  ;;  %v5661_v35 = vld [vmem:[%s5742_s26 + $0x38] sm:$0x1]  ;;  %v5313_v46 = vld [vmem:[%s5742_s26 + $0x48] sm:$0xf] }
 0x183   : > { %v4147_v2 = vunpack.c.l.b16 %v4031_v39  ;;  %v4148_v4 = vunpack.c.l.b16 %v4034_v16  ;;  %v6649_v39 = vld [vmem:[%s5742_s26 + $0x4c] sm:$0xf] }
 0x184   : > { %v1778_v57 = vpop.f32.mrf.mxu3 }
 0x185   : > { %4268 = vmatmul.bf16.gmra.mxu0 %v4176_v13  ;;  %v1831_v11 = vadd.f32 %v1778_v57, %v1516_v53  ;;  %v5562_v13 = vld [vmem:[%s5742_s26 + $0x30] sm:$0xff] }
 0x186   : > { %v5660_v53 = vld [vmem:[%s5742_s26 + $0x34] sm:$0xf] }
 0x187   : > { %v1465_v0 = vpop.f32.mrf.mxu2  ;;  %v6623_v29 = vadd.f32 %v2460_v3, %v1831_v11  ;;  %v2614_v8 = vrot.slane %v5660_v53, 5  ;;  %v3395_v3 = vor.u32 %v3394_v22, %v3391_v44  ;;  %v2617_v11 = vrot.slane %v5661_v35, 5  ;;  %v5400_v53 = vld [vmem:[%s5742_s26 + $0x3c] sm:$0xe] }
 0x188   : > { %v1517_v61 = vadd.f32 %v1465_v0, %v1085_v54  ;;  %v3751_v54 = vpack.c.b16 %v3722_v31, %v3721_v33  ;;  %v3406_v44 = vrot.slane %v3405_v21, 4  ;;  %v3410_v0 = vrot.slane %v3408_v19, 5 }
 0x189   : > { %v1087_v25 = vpop.f32.mrf.mxu1  ;;  %v2616_v57 = vrot.slane %v2614_v8, 4  ;;  %v3396_v26 = vrot.slane %v3395_v3, 4  ;;  %v2615_v18 = vsel %vm6057_vm5, %v5096_v7, %v2614_v8  ;;  %v4177_v33 = vpack.c.b16 %v4148_v4, %v4147_v2 }
 0x18a   : > { %v2462_v55 = vpop.f32.mrf.mxu0  ;;  %v1088_v37 = vadd.f32 %v1087_v25, %v6249_v58  ;;  %v2726_v16 = vunpack.c.l.b16 %v2615_v18  ;;  %v5416_v21 = vrot.slane %v5400_v53, 9  ;;  %v3413_v7 = vshrl.u32 %v5313_v46, 16  ;;  %v5081_v18 = vld [vmem:[%s5742_s26 + $0x3c] sm:$0xe] }
 0x18b   : > { %2850 = vmatmul.bf16.gmra.mxu1 %v2754_v32  ;;  %v3401_v8 = vsel %vm5757_vm2, %v3396_v26, %v6621_v9  ;;  %v4040_v35 = vrot.slane %v6628_v49, 5 }
 0x18c   : > { %v1780_v27 = vpop.f32.mrf.mxu3  ;;  %3165 = vmatmul.bf16.gmra.mxu2 %v5562_v13  ;;  %v2618_v13 = vsel %vm6057_vm5, %v2616_v57, %v2617_v11  ;;  %v3422_v11 = vshll.u32 %v6649_v39, 16  ;;  %v3723_v4 = vunpack.c.l.b16 %v3401_v8  ;;  %v3415_v49 = vrot.slane %v3413_v7, 4 }
 0x18d   : > { %v1832_v62 = vadd.f32 %v1780_v27, %v1517_v61  ;;  %v4037_v61 = vrot.slane %v6606_v42, 5  ;;  %v2727_v3 = vunpack.c.l.b16 %v2618_v13  ;;  %v3411_v42 = vsel %vm5757_vm2, %v3406_v44, %v3410_v0  ;;  %v5563_v0 = vld [vmem:[%s5742_s26 + $0x3c] sm:$0xff] }
 0x18f   : > { %v1468_v32 = vpop.f32.mrf.mxu2  ;;  %v6646_v58 = vadd.f32 %v2462_v55, %v1832_v62  ;;  %v4039_v27 = vrot.slane %v4037_v61, 4  ;;  %v3416_v55 = vshll.u32 %v5313_v46, 16  ;;  %v3426_v62 = vshrl.u32 %v6649_v39, 16 }
 0x190   : > { %v1518_v22 = vadd.f32 %v1468_v32, %v1088_v37  ;;  %v2755_v2 = vpack.c.b16 %v2727_v3, %v2726_v16  ;;  %v5662_v37 = vld [vmem:[%s5742_s26 + $0x40] sm:$0xf]  ;;  %v5097_v3 = vrot.slane %v5081_v18, 9 }
 0x191   : > { %3847 = vmatmul.bf16.gmra.mxu3 %v3751_v54  ;;  %v1089_v31 = vpop.f32.mrf.mxu1  ;;  %v2621_v32 = vrot.slane %v5662_v37, 5  ;;  %v3418_v13 = vrot.slane %v3416_v55, 5  ;;  %v3428_v46 = vrot.slane %v3426_v62, 4  ;;  %v5316_v37 = vld [vmem:[%s5742_s26 + $0x54] sm:$0xf] }
 0x192   : > { %v2465_v25 = vpop.f32.mrf.mxu0  ;;  %v1090_v9 = vadd.f32 %v1089_v31, %v6272_v51  ;;  %v4041_v51 = vsel %vm6057_vm5, %v4039_v27, %v4040_v35  ;;  %v6669_v31 = vrot.slane %v3422_v11, 5 }
 0x193   : > { %v2623_v8 = vrot.slane %v2621_v32, 4 }
 0x194   : > { %v1783_v19 = vpop.f32.mrf.mxu3  ;;  %v3429_v35 = vor.u32 %v3428_v46, %v6669_v31  ;;  %v5401_v46 = vld [vmem:[%s5742_s26 + $0x48] sm:$0xe] }
 0x195   : > { %4273 = vmatmul.bf16.gmra.mxu0 %v4177_v33  ;;  %v1833_v57 = vadd.f32 %v1783_v19, %v1518_v22  ;;  %v3724_v22 = vunpack.c.l.b16 %v3411_v42  ;;  %v4038_v33 = vsel %vm6057_vm5, %v5416_v21, %v4037_v61  ;;  %v5663_v19 = vld [vmem:[%s5742_s26 + $0x44] sm:$0x1]  ;;  %v4150_v61 = vunpack.c.l.b16 %v4041_v51 }
 0x196   : > { %v2624_v42 = vrot.slane %v5663_v19, 5  ;;  %v4149_v55 = vunpack.c.l.b16 %v4038_v33  ;;  %v3419_v21 = vor.u32 %v3418_v13, %v3415_v49 }
 0x197   : > { %v1470_v54 = vpop.f32.mrf.mxu2  ;;  %v6661_v26 = vadd.f32 %v2465_v25, %v1833_v57  ;;  %v6672_v25 = vld [vmem:[%s5742_s26 + $0x50] sm:$0x1]  ;;  %v3752_v27 = vpack.c.b16 %v3724_v22, %v3723_v4  ;;  %v3430_v22 = vrot.slane %v3429_v35, 4 }
 0x198   : > { %v1519_v44 = vadd.f32 %v1470_v54, %v1090_v9  ;;  %v3432_v11 = vshll.u32 %v6672_v25, 16  ;;  %v2622_v54 = vsel %vm6057_vm5, %v5097_v3, %v2621_v32  ;;  %v3420_v49 = vrot.slane %v3419_v21, 4 }
 0x199   : > { %v1092_v53 = vpop.f32.mrf.mxu1  ;;  %v2728_v32 = vunpack.c.l.b16 %v2622_v54  ;;  %v3437_v3 = vshrl.u32 %v5316_v37, 16  ;;  %v4047_v35 = vrot.slane %v6672_v25, 5 }
 0x19a   : > { %v2467_v16 = vpop.f32.mrf.mxu0  ;;  %v1093_v62 = vadd.f32 %v1092_v53, %v6293_v14  ;;  %v3434_v13 = vrot.slane %v3432_v11, 5  ;;  %v4044_v14 = vrot.slane %v6649_v39, 5 }
 0x19b   : > { %2855 = vmatmul.bf16.gmra.mxu1 %v2755_v2  ;;  %v2625_v2 = vsel %vm6057_vm5, %v2623_v8, %v2624_v42  ;;  %v3440_v8 = vshll.u32 %v5316_v37, 16  ;;  %v3439_v11 = vrot.slane %v3437_v3, 4 }
 0x19c   : > { %v1785_v7 = vpop.f32.mrf.mxu3  ;;  %3170 = vmatmul.bf16.gmra.mxu2 %v5563_v0  ;;  %v4178_v0 = vpack.c.b16 %v4150_v61, %v4149_v55  ;;  %v2729_v51 = vunpack.c.l.b16 %v2625_v2  ;;  %v3425_v55 = vsel %vm5757_vm2, %v3420_v49, %v6669_v31  ;;  %v5417_v61 = vrot.slane %v5401_v46, 9 }
 0x19d   : > { %v1834_v57 = vadd.f32 %v1785_v7, %v1519_v44  ;;  %v6684_v44 = vld [vmem:[%s5742_s26 + $0x58] sm:$0xf]  ;;  %v4046_v21 = vrot.slane %v4044_v14, 4 }
 0x19e   : > { %v3446_v19 = vshll.u32 %v6684_v44, 16  ;;  %v3450_v42 = vshrl.u32 %v6684_v44, 16 }
 0x19f   : > { %v1473_v9 = vpop.f32.mrf.mxu2  ;;  %v6687_v53 = vadd.f32 %v2467_v16, %v1834_v57  ;;  %v3435_v16 = vsel %vm5757_vm2, %v3430_v22, %v3434_v13  ;;  %v6706_v22 = vld [vmem:[%s5742_s26 + $0x5c] sm:$0x1]  ;;  %v4048_v46 = vsel %vm6057_vm5, %v4046_v21, %v4047_v35 }
 0x1a0   : > { %v1520_v18 = vadd.f32 %v1473_v9, %v1093_v62  ;;  %v3442_v9 = vrot.slane %v3440_v8, 5  ;;  %v6699_v31 = vrot.slane %v3446_v19, 5  ;;  %v3452_v54 = vrot.slane %v3450_v42, 4 }
 0x1a1   : > { %3852 = vmatmul.bf16.gmra.mxu3 %v3752_v27  ;;  %v1094_v4 = vpop.f32.mrf.mxu1  ;;  %v2756_v27 = vpack.c.b16 %v2729_v51, %v2728_v32  ;;  %v3726_v13 = vunpack.c.l.b16 %v3435_v16  ;;  %v5082_v32 = vld [vmem:[%s5742_s26 + $0x48] sm:$0xe]  ;;  %v4045_v51 = vsel %vm6057_vm5, %v5417_v61, %v4044_v14  ;;  %v3456_v8 = vshll.u32 %v6706_v22, 16 }
 0x1a2   : > { %v2470_v33 = vpop.f32.mrf.mxu0  ;;  %v1095_v57 = vadd.f32 %v1094_v4, %v6308_v38  ;;  %v3725_v4 = vunpack.c.l.b16 %v3425_v55  ;;  %v3453_v3 = vor.u32 %v3452_v54, %v6699_v31  ;;  %v5098_v42 = vrot.slane %v5082_v32, 9  ;;  %v5665_v55 = vld [vmem:[%s5742_s26 + $0x50] sm:$0x1]  ;;  %v5319_v32 = vld [vmem:[%s5742_s26 + $0x60] sm:$0xf] }
 0x1a3   : > { %v4151_v14 = vunpack.c.l.b16 %v4045_v51  ;;  %v4152_v61 = vunpack.c.l.b16 %v4048_v46  ;;  %v6727_v51 = vld [vmem:[%s5742_s26 + $0x64] sm:$0xf] }
 0x1a4   : > { %v1788_v7 = vpop.f32.mrf.mxu3 }
 0x1a5   : > { %4278 = vmatmul.bf16.gmra.mxu0 %v4178_v0  ;;  %v1835_v39 = vadd.f32 %v1788_v7, %v1520_v18  ;;  %v5564_v0 = vld [vmem:[%s5742_s26 + $0x48] sm:$0xff] }
 0x1a6   : > { %v5664_v18 = vld [vmem:[%s5742_s26 + $0x4c] sm:$0xf] }
 0x1a7   : > { %v1475_v62 = vpop.f32.mrf.mxu2  ;;  %v6701_v2 = vadd.f32 %v2470_v33, %v1835_v39  ;;  %v2628_v49 = vrot.slane %v5664_v18, 5  ;;  %v3443_v33 = vor.u32 %v3442_v9, %v3439_v11  ;;  %v2631_v39 = vrot.slane %v5665_v55, 5  ;;  %v5402_v18 = vld [vmem:[%s5742_s26 + $0x54] sm:$0xe] }
 0x1a8   : > { %v1521_v37 = vadd.f32 %v1475_v62, %v1095_v57  ;;  %v3753_v57 = vpack.c.b16 %v3726_v13, %v3725_v4  ;;  %v3454_v11 = vrot.slane %v3453_v3, 4  ;;  %v3458_v62 = vrot.slane %v3456_v8, 5 }
 0x1a9   : > { %v1097_v38 = vpop.f32.mrf.mxu1  ;;  %v2630_v7 = vrot.slane %v2628_v49, 4  ;;  %v3444_v35 = vrot.slane %v3443_v33, 4  ;;  %v2629_v54 = vsel %vm6057_vm5, %v5098_v42, %v2628_v49  ;;  %v4179_v4 = vpack.c.b16 %v4152_v61, %v4151_v14 }
 0x1aa   : > { %v2472_v25 = vpop.f32.mrf.mxu0  ;;  %v1098_v21 = vadd.f32 %v1097_v38, %v6178_v50  ;;  %v2730_v46 = vunpack.c.l.b16 %v2629_v54  ;;  %v5418_v3 = vrot.slane %v5402_v18, 9  ;;  %v3461_v42 = vshrl.u32 %v5319_v32, 16  ;;  %v5083_v54 = vld [vmem:[%s5742_s26 + $0x54] sm:$0xe] }
 0x1ab   : > { %2860 = vmatmul.bf16.gmra.mxu1 %v2756_v27  ;;  %v3449_v49 = vsel %vm5757_vm2, %v3444_v35, %v6699_v31  ;;  %v4054_v55 = vrot.slane %v6706_v22, 5 }
 0x1ac   : > { %v1790_v19 = vpop.f32.mrf.mxu3  ;;  %3175 = vmatmul.bf16.gmra.mxu2 %v5564_v0  ;;  %v2632_v0 = vsel %vm6057_vm5, %v2630_v7, %v2631_v39  ;;  %v3470_v39 = vshll.u32 %v6727_v51, 16  ;;  %v3727_v61 = vunpack.c.l.b16 %v3449_v49  ;;  %v3463_v22 = vrot.slane %v3461_v42, 4 }
 0x1ad   : > { %v1836_v16 = vadd.f32 %v1790_v19, %v1521_v37  ;;  %v4051_v37 = vrot.slane %v6684_v44, 5  ;;  %v2731_v33 = vunpack.c.l.b16 %v2632_v0  ;;  %v3459_v44 = vsel %vm5757_vm2, %v3454_v11, %v3458_v62  ;;  %v5565_v62 = vld [vmem:[%s5742_s26 + $0x54] sm:$0xff] }
 0x1af   : > { %v1478_v27 = vpop.f32.mrf.mxu2  ;;  %v6724_v50 = vadd.f32 %v2472_v25, %v1836_v16  ;;  %v4053_v19 = vrot.slane %v4051_v37, 4  ;;  %v3464_v25 = vshll.u32 %v5319_v32, 16  ;;  %v3474_v16 = vshrl.u32 %v6727_v51, 16 }
 0x1b0   : > { %v1522_v9 = vadd.f32 %v1478_v27, %v1098_v21  ;;  %v2757_v14 = vpack.c.b16 %v2731_v33, %v2730_v46  ;;  %v5666_v21 = vld [vmem:[%s5742_s26 + $0x58] sm:$0xf]  ;;  %v5099_v33 = vrot.slane %v5083_v54, 9 }
 0x1b1   : > { %3857 = vmatmul.bf16.gmra.mxu3 %v3753_v57  ;;  %v1099_v13 = vpop.f32.mrf.mxu1  ;;  %v2635_v27 = vrot.slane %v5666_v21, 5  ;;  %v3466_v0 = vrot.slane %v3464_v25, 5  ;;  %v3476_v32 = vrot.slane %v3474_v16, 4  ;;  %v5322_v21 = vld [vmem:[%s5742_s26 + $0x6c] sm:$0xf] }
 0x1b2   : > { %v2475_v38 = vpop.f32.mrf.mxu0  ;;  %v1100_v31 = vadd.f32 %v1099_v13, %v6201_v40  ;;  %v4055_v40 = vsel %vm6057_vm5, %v4053_v19, %v4054_v55  ;;  %v6747_v13 = vrot.slane %v3470_v39, 5 }
 0x1b3   : > { %v2637_v49 = vrot.slane %v2635_v27, 4 }
 0x1b4   : > { %v1793_v8 = vpop.f32.mrf.mxu3  ;;  %v3477_v55 = vor.u32 %v3476_v32, %v6747_v13  ;;  %v5403_v32 = vld [vmem:[%s5742_s26 + $0x60] sm:$0xe] }
 0x1b5   : > { %4283 = vmatmul.bf16.gmra.mxu0 %v4179_v4  ;;  %v1837_v7 = vadd.f32 %v1793_v8, %v1522_v9  ;;  %v3728_v9 = vunpack.c.l.b16 %v3459_v44  ;;  %v4052_v4 = vsel %vm6057_vm5, %v5418_v3, %v4051_v37  ;;  %v5667_v8 = vld [vmem:[%s5742_s26 + $0x5c] sm:$0x1]  ;;  %v4154_v37 = vunpack.c.l.b16 %v4055_v40 }
 0x1b6   : > { %v2638_v44 = vrot.slane %v5667_v8, 5  ;;  %v4153_v25 = vunpack.c.l.b16 %v4052_v4  ;;  %v3467_v3 = vor.u32 %v3466_v0, %v3463_v22 }
 0x1b7   : > { %v1480_v57 = vpop.f32.mrf.mxu2  ;;  %v6739_v35 = vadd.f32 %v2475_v38, %v1837_v7  ;;  %v6750_v38 = vld [vmem:[%s5742_s26 + $0x68] sm:$0x1]  ;;  %v3754_v19 = vpack.c.b16 %v3728_v9, %v3727_v61  ;;  %v3478_v9 = vrot.slane %v3477_v55, 4 }
 0x1b8   : > { %v1523_v11 = vadd.f32 %v1480_v57, %v1100_v31  ;;  %v3480_v39 = vshll.u32 %v6750_v38, 16  ;;  %v2636_v57 = vsel %vm6057_vm5, %v5099_v33, %v2635_v27  ;;  %v3468_v22 = vrot.slane %v3467_v3, 4 }
 0x1b9   : > { %v1102_v18 = vpop.f32.mrf.mxu1  ;;  %v2732_v27 = vunpack.c.l.b16 %v2636_v57  ;;  %v3485_v33 = vshrl.u32 %v5322_v21, 16  ;;  %v4061_v55 = vrot.slane %v6750_v38, 5 }
 0x1ba   : > { %v2477_v46 = vpop.f32.mrf.mxu0  ;;  %v1103_v16 = vadd.f32 %v1102_v18, %v6222_v6  ;;  %v3482_v0 = vrot.slane %v3480_v39, 5  ;;  %v4058_v6 = vrot.slane %v6727_v51, 5 }
 0x1bb   : > { %2865 = vmatmul.bf16.gmra.mxu1 %v2757_v14  ;;  %v2639_v14 = vsel %vm6057_vm5, %v2637_v49, %v2638_v44  ;;  %v3488_v49 = vshll.u32 %v5322_v21, 16  ;;  %v3487_v39 = vrot.slane %v3485_v33, 4 }
 0x1bc   : > { %v1795_v42 = vpop.f32.mrf.mxu3  ;;  %3180 = vmatmul.bf16.gmra.mxu2 %v5565_v62  ;;  %v4180_v62 = vpack.c.b16 %v4154_v37, %v4153_v25  ;;  %v2733_v40 = vunpack.c.l.b16 %v2639_v14  ;;  %v3473_v25 = vsel %vm5757_vm2, %v3468_v22, %v6747_v13  ;;  %v5419_v37 = vrot.slane %v5403_v32, 9 }
 0x1bd   : > { %v1838_v7 = vadd.f32 %v1795_v42, %v1523_v11  ;;  %v6762_v11 = vld [vmem:[%s5742_s26 + $0x70] sm:$0xf]  ;;  %v4060_v3 = vrot.slane %v4058_v6, 4 }
 0x1be   : > { %v3494_v8 = vshll.u32 %v6762_v11, 16  ;;  %v3498_v44 = vshrl.u32 %v6762_v11, 16 }
 0x1bf   : > { %v1483_v31 = vpop.f32.mrf.mxu2  ;;  %v6765_v18 = vadd.f32 %v2477_v46, %v1838_v7  ;;  %v3483_v46 = vsel %vm5757_vm2, %v3478_v9, %v3482_v0  ;;  %v6784_v9 = vld [vmem:[%s5742_s26 + $0x74] sm:$0x1]  ;;  %v4062_v32 = vsel %vm6057_vm5, %v4060_v3, %v4061_v55 }
 0x1c0   : > { %v1524_v54 = vadd.f32 %v1483_v31, %v1103_v16  ;;  %v3490_v31 = vrot.slane %v3488_v49, 5  ;;  %v6777_v13 = vrot.slane %v3494_v8, 5  ;;  %v3500_v57 = vrot.slane %v3498_v44, 4 }
 0x1c1   : > { %3862 = vmatmul.bf16.gmra.mxu3 %v3754_v19  ;;  %v1104_v61 = vpop.f32.mrf.mxu1  ;;  %v2758_v19 = vpack.c.b16 %v2733_v40, %v2732_v27  ;;  %v3730_v0 = vunpack.c.l.b16 %v3483_v46  ;;  %v5084_v27 = vld [vmem:[%s5742_s26 + $0x60] sm:$0xe]  ;;  %v4059_v40 = vsel %vm6057_vm5, %v5419_v37, %v4058_v6  ;;  %v3504_v49 = vshll.u32 %v6784_v9, 16 }
 0x1c2   : > { %v2480_v4 = vpop.f32.mrf.mxu0  ;;  %v1105_v7 = vadd.f32 %v1104_v61, %v6236_v28  ;;  %v3729_v61 = vunpack.c.l.b16 %v3473_v25  ;;  %v3501_v33 = vor.u32 %v3500_v57, %v6777_v13  ;;  %v5100_v44 = vrot.slane %v5084_v27, 9  ;;  %v5669_v25 = vld [vmem:[%s5742_s26 + $0x68] sm:$0x1]  ;;  %v5325_v27 = vld [vmem:[%s5742_s26 + $0x78] sm:$0xf] }
 0x1c3   : > { %v4155_v6 = vunpack.c.l.b16 %v4059_v40  ;;  %v4156_v37 = vunpack.c.l.b16 %v4062_v32  ;;  %v6805_v40 = vld [vmem:[%s5742_s26 + $0x7c] sm:$0xf] }
 0x1c4   : > { %v1798_v42 = vpop.f32.mrf.mxu3 }
 0x1c5   : > { %4288 = vmatmul.bf16.gmra.mxu0 %v4180_v62  ;;  %v1839_v51 = vadd.f32 %v1798_v42, %v1524_v54  ;;  %v5566_v62 = vld [vmem:[%s5742_s26 + $0x60] sm:$0xff] }
 0x1c6   : > { %v5668_v54 = vld [vmem:[%s5742_s26 + $0x64] sm:$0xf] }
 0x1c7   : > { %v1485_v16 = vpop.f32.mrf.mxu2  ;;  %v6779_v14 = vadd.f32 %v2480_v4, %v1839_v51  ;;  %v2642_v22 = vrot.slane %v5668_v54, 5  ;;  %v3491_v4 = vor.u32 %v3490_v31, %v3487_v39  ;;  %v2645_v51 = vrot.slane %v5669_v25, 5  ;;  %v5404_v54 = vld [vmem:[%s5742_s26 + $0x6c] sm:$0xe] }
 0x1c8   : > { %v1525_v21 = vadd.f32 %v1485_v16, %v1105_v7  ;;  %v3755_v7 = vpack.c.b16 %v3730_v0, %v3729_v61  ;;  %v3502_v39 = vrot.slane %v3501_v33, 4  ;;  %v3506_v16 = vrot.slane %v3504_v49, 5 }
 0x1c9   : > { %v1107_v28 = vpop.f32.mrf.mxu1  ;;  %v2644_v42 = vrot.slane %v2642_v22, 4  ;;  %v3492_v55 = vrot.slane %v3491_v4, 4  ;;  %v2643_v57 = vsel %vm6057_vm5, %v5100_v44, %v2642_v22  ;;  %v4181_v61 = vpack.c.b16 %v4156_v37, %v4155_v6 }
 0x1ca   : > { %v2482_v38 = vpop.f32.mrf.mxu0  ;;  %v1108_v3 = vadd.f32 %v1107_v28, %v6254_v63  ;;  %v2734_v32 = vunpack.c.l.b16 %v2643_v57  ;;  %v5420_v33 = vrot.slane %v5404_v54, 9  ;;  %v3509_v44 = vshrl.u32 %v5325_v27, 16  ;;  %v5085_v57 = vld [vmem:[%s5742_s26 + $0x6c] sm:$0xe] }
 0x1cb   : > { %2870 = vmatmul.bf16.gmra.mxu1 %v2758_v19  ;;  %v3497_v22 = vsel %vm5757_vm2, %v3492_v55, %v6777_v13  ;;  %v4068_v25 = vrot.slane %v6784_v9, 5 }
 0x1cc   : > { %v1800_v8 = vpop.f32.mrf.mxu3  ;;  %3185 = vmatmul.bf16.gmra.mxu2 %v5566_v62  ;;  %v2646_v62 = vsel %vm6057_vm5, %v2644_v42, %v2645_v51  ;;  %v3518_v51 = vshll.u32 %v6805_v40, 16  ;;  %v3731_v37 = vunpack.c.l.b16 %v3497_v22  ;;  %v3511_v9 = vrot.slane %v3509_v44, 4 }
 0x1cd   : > { %v1840_v46 = vadd.f32 %v1800_v8, %v1525_v21  ;;  %v4065_v21 = vrot.slane %v6762_v11, 5  ;;  %v2735_v4 = vunpack.c.l.b16 %v2646_v62  ;;  %v3507_v11 = vsel %vm5757_vm2, %v3502_v39, %v3506_v16  ;;  %v5567_v16 = vld [vmem:[%s5742_s26 + $0x6c] sm:$0xff] }
 0x1cf   : > { %v1488_v19 = vpop.f32.mrf.mxu2  ;;  %v6802_v63 = vadd.f32 %v2482_v38, %v1840_v46  ;;  %v4067_v8 = vrot.slane %v4065_v21, 4  ;;  %v3512_v38 = vshll.u32 %v5325_v27, 16  ;;  %v3522_v46 = vshrl.u32 %v6805_v40, 16 }
 0x1d0   : > { %v1526_v31 = vadd.f32 %v1488_v19, %v1108_v3  ;;  %v2759_v6 = vpack.c.b16 %v2735_v4, %v2734_v32  ;;  %v5670_v3 = vld [vmem:[%s5742_s26 + $0x70] sm:$0xf]  ;;  %v6826_v4 = vld [vmem:[%s5742_s26 + $0x80] sm:$0x1] }
 0x1d1   : > { %3867 = vmatmul.bf16.gmra.mxu3 %v3755_v7  ;;  %v1109_v0 = vpop.f32.mrf.mxu1  ;;  %v2649_v19 = vrot.slane %v5670_v3, 5  ;;  %v3514_v62 = vrot.slane %v3512_v38, 5  ;;  %v3524_v27 = vrot.slane %v3522_v46, 4  ;;  %v5328_v3 = vld [vmem:[%s5742_s26 + $0x84] sm:$0xf] }
 0x1d2   : > { %v2485_v28 = vpop.f32.mrf.mxu0  ;;  %v1110_v13 = vadd.f32 %v1109_v0, %v6285_v41  ;;  %v4069_v41 = vsel %vm6057_vm5, %v4067_v8, %v4068_v25  ;;  %v3520_v0 = vrot.slane %v3518_v51, 5  ;;  %v3528_v25 = vshll.u32 %v6826_v4, 16 }
 0x1d3   : > { %v2651_v22 = vrot.slane %v2649_v19, 4 }
 0x1d4   : > { %v1803_v49 = vpop.f32.mrf.mxu3  ;;  %v3525_v8 = vor.u32 %v3524_v27, %v3520_v0  ;;  %v5405_v27 = vld [vmem:[%s5742_s26 + $0x78] sm:$0xe] }
 0x1d5   : > { %4293 = vmatmul.bf16.gmra.mxu0 %v4181_v61  ;;  %v1841_v42 = vadd.f32 %v1803_v49, %v1526_v31  ;;  %v3732_v31 = vunpack.c.l.b16 %v3507_v11  ;;  %v4066_v61 = vsel %vm6057_vm5, %v5420_v33, %v4065_v21  ;;  %v5671_v49 = vld [vmem:[%s5742_s26 + $0x74] sm:$0x1]  ;;  %v3515_v21 = vor.u32 %v3514_v62, %v3511_v9  ;;  %v6837_v9 = vld [vmem:[%s5742_s26 + $0x88] sm:$0xf] }
 0x1d6   : > { %v2652_v11 = vrot.slane %v5671_v49, 5  ;;  %v4157_v38 = vunpack.c.l.b16 %v4066_v61  ;;  %v3542_v49 = vshll.u32 %v6837_v9, 16 }
 0x1d7   : > { %v1490_v7 = vpop.f32.mrf.mxu2  ;;  %v6817_v55 = vadd.f32 %v2485_v28, %v1841_v42  ;;  %v5101_v28 = vrot.slane %v5085_v57, 9  ;;  %v4158_v42 = vunpack.c.l.b16 %v4069_v41  ;;  %v3516_v61 = vrot.slane %v3515_v21, 4 }
 0x1d8   : > { %v1527_v39 = vadd.f32 %v1490_v7, %v1110_v13  ;;  %v3756_v13 = vpack.c.b16 %v3732_v31, %v3731_v37  ;;  %v3530_v31 = vrot.slane %v3528_v25, 5 }
 0x1d9   : > { %v1112_v54 = vpop.f32.mrf.mxu1  ;;  %v2650_v7 = vsel %vm6057_vm5, %v5101_v28, %v2649_v19  ;;  %v3533_v28 = vshrl.u32 %v5328_v3, 16 }
 0x1da   : > { %v2487_v32 = vpop.f32.mrf.mxu0  ;;  %v1113_v51 = vadd.f32 %v1112_v54, %v6305_v15  ;;  %v4072_v15 = vrot.slane %v6805_v40, 5  ;;  %v2736_v19 = vunpack.c.l.b16 %v2650_v7 }
 0x1db   : > { %2875 = vmatmul.bf16.gmra.mxu1 %v2759_v6  ;;  %v2653_v6 = vsel %vm6057_vm5, %v2651_v22, %v2652_v11  ;;  %v3536_v22 = vshll.u32 %v5328_v3, 16  ;;  %v3546_v11 = vshrl.u32 %v6837_v9, 16  ;;  %v3535_v25 = vrot.slane %v3533_v28, 4 }
 0x1dc   : > { %v1805_v44 = vpop.f32.mrf.mxu3  ;;  %3190 = vmatmul.bf16.gmra.mxu2 %v5567_v16  ;;  %v4182_v16 = vpack.c.b16 %v4158_v42, %v4157_v38  ;;  %v2737_v41 = vunpack.c.l.b16 %v2653_v6  ;;  %v3521_v38 = vsel %vm5757_vm2, %v3516_v61, %v3520_v0  ;;  %v5421_v42 = vrot.slane %v5405_v27, 9 }
 0x1dd   : > { %v1842_v33 = vadd.f32 %v1805_v44, %v1527_v39  ;;  %v3526_v39 = vrot.slane %v3525_v8, 4  ;;  %v4074_v21 = vrot.slane %v4072_v15, 4  ;;  %v4075_v8 = vrot.slane %v6826_v4, 5 }
 0x1de   : > { %v6851_v0 = vrot.slane %v3542_v49, 5  ;;  %v3548_v7 = vrot.slane %v3546_v11, 4 }
 0x1df   : > { %v1493_v46 = vpop.f32.mrf.mxu2  ;;  %v6840_v62 = vadd.f32 %v2487_v32, %v1842_v33  ;;  %v3531_v32 = vsel %vm5757_vm2, %v3526_v39, %v3530_v31  ;;  %v5086_v31 = vld [vmem:[%s5742_s26 + $0x78] sm:$0xe]  ;;  %v4076_v27 = vsel %vm6057_vm5, %v4074_v21, %v4075_v8 }
 0x1e0   : > { %v1528_v57 = vadd.f32 %v1493_v46, %v1113_v51  ;;  %v3538_v46 = vrot.slane %v3536_v22, 5  ;;  %v3549_v28 = vor.u32 %v3548_v7, %v6851_v0  ;;  %v5102_v49 = vrot.slane %v5086_v31, 9 }
 0x1e1   : > { %3872 = vmatmul.bf16.gmra.mxu3 %v3756_v13  ;;  %v1114_v37 = vpop.f32.mrf.mxu1  ;;  %v2760_v13 = vpack.c.b16 %v2737_v41, %v2736_v19  ;;  %v6859_v19 = vld [vmem:[%s5742_s26 + $0x8c] sm:$0x1]  ;;  %v4073_v41 = vsel %vm6057_vm5, %v5421_v42, %v4072_v15  ;;  %v4160_v42 = vunpack.c.l.b16 %v4076_v27 }
 0x1e2   : > { %v2490_v54 = vpop.f32.mrf.mxu0  ;;  %v1115_v33 = vadd.f32 %v1114_v37, %v6320_v1  ;;  %v3733_v1 = vunpack.c.l.b16 %v3521_v38  ;;  %v3734_v37 = vunpack.c.l.b16 %v3531_v32  ;;  %v4159_v15 = vunpack.c.l.b16 %v4073_v41  ;;  %v6879_v41 = vld [vmem:[%s5742_s26 + $0x94] sm:$0xf] }
 0x1e4   : > { %v1808_v44 = vpop.f32.mrf.mxu3 }
 0x1e5   : > { %4298 = vmatmul.bf16.gmra.mxu0 %v4182_v16  ;;  %v1843_v40 = vadd.f32 %v1808_v44, %v1528_v57  ;;  %v5568_v16 = vld [vmem:[%s5742_s26 + $0x78] sm:$0xff]  ;;  %v5673_v44 = vld [vmem:[%s5742_s26 + $0x80] sm:$0x1] }
 0x1e6   : > { %v5672_v57 = vld [vmem:[%s5742_s26 + $0x7c] sm:$0xf]  ;;  %v2659_v38 = vrot.slane %v5673_v44, 5 }
 0x1e7   : > { %v1495_v51 = vpop.f32.mrf.mxu2  ;;  %v6853_v6 = vadd.f32 %v2490_v54, %v1843_v40  ;;  %v2656_v61 = vrot.slane %v5672_v57, 5  ;;  %v3539_v54 = vor.u32 %v3538_v46, %v3535_v25  ;;  %v3552_v40 = vshll.u32 %v6859_v19, 16 }
 0x1e8   : > { %v1529_v3 = vadd.f32 %v1495_v51, %v1115_v33  ;;  %v3757_v33 = vpack.c.b16 %v3734_v37, %v3733_v1  ;;  %v3550_v25 = vrot.slane %v3549_v28, 4  ;;  %v5331_v51 = vld [vmem:[%s5742_s26 + $0x90] sm:$0xf]  ;;  %v4183_v57 = vpack.c.b16 %v4160_v42, %v4159_v15 }
 0x1e9   : > { %v2841_v39 = vpop.f32.mrf.mxu1  ;;  %v2658_v11 = vrot.slane %v2656_v61, 4  ;;  %v3540_v8 = vrot.slane %v3539_v54, 4  ;;  %v2657_v46 = vsel %vm6057_vm5, %v5102_v49, %v2656_v61  ;;  %v3557_v27 = vshrl.u32 %v5331_v51, 16 }
 0x1ea   : > { %v2492_v4 = vpop.f32.mrf.mxu0  ;;  %v2921_v21 = vadd.f32 %v2841_v39, %v6346_v59  ;;  %v5406_v59 = vld [vmem:[%s5742_s26 + $0x84] sm:$0xe]  ;;  %v3560_v54 = vshll.u32 %v5331_v51, 16  ;;  %v2738_v61 = vunpack.c.l.b16 %v2657_v46 }
 0x1eb   : > { %2880 = vmatmul.bf16.gmra.mxu1 %v2760_v13  ;;  %v2660_v7 = vsel %vm6057_vm5, %v2658_v11, %v2659_v38  ;;  %v5422_v11 = vrot.slane %v5406_v59, 9  ;;  %v4082_v38 = vrot.slane %v6859_v19, 5 }
 0x1ec   : > { %v1810_v22 = vpop.f32.mrf.mxu3  ;;  %3195 = vmatmul.bf16.gmra.mxu2 %v5568_v16  ;;  %v3554_v16 = vrot.slane %v3552_v40, 5  ;;  %v2739_v28 = vunpack.c.l.b16 %v2660_v7  ;;  %v3566_v40 = vshll.u32 %v6879_v41, 16 }
 0x1ed   : > { %v1844_v32 = vadd.f32 %v1810_v22, %v1529_v3  ;;  %v4079_v3 = vrot.slane %v6837_v9, 5  ;;  %v3545_v9 = vsel %vm5757_vm2, %v3540_v8, %v6851_v0  ;;  %v3559_v0 = vrot.slane %v3557_v27, 4  ;;  %v5674_v8 = vld [vmem:[%s5742_s26 + $0x88] sm:$0xf] }
 0x1ee   : > { %v3555_v49 = vsel %vm5757_vm2, %v3550_v25, %v3554_v16  ;;  %v2663_v19 = vrot.slane %v5674_v8, 5  ;;  %v5569_v25 = vld [vmem:[%s5742_s26 + $0x84] sm:$0xff]  ;;  %v3735_v51 = vunpack.c.l.b16 %v3545_v9  ;;  %v5333_v9 = vld [vmem:[%s5742_s26 + $0x98] sm:$0x1]  ;;  %v5407_v8 = vld [vmem:[%s5742_s26 + $0x90] sm:$0xe] }
 0x1ef   : > { %v3156_v13 = vpop.f32.mrf.mxu2  ;;  %v6876_v39 = vadd.f32 %v2492_v4, %v1844_v32  ;;  %v4081_v4 = vrot.slane %v4079_v3, 4  ;;  %v3570_v32 = vshrl.u32 %v6879_v41, 16  ;;  %v3736_v46 = vunpack.c.l.b16 %v3555_v49  ;;  %v5087_v16 = vld [vmem:[%s5742_s26 + $0x84] sm:$0xe] }
 0x1f0   : > { %v3236_v1 = vadd.f32 %v3156_v13, %v2921_v21  ;;  %v2761_v13 = vpack.c.b16 %v2739_v28, %v2738_v61  ;;  %v4080_v7 = vsel %vm6057_vm5, %v5422_v11, %v4079_v3  ;;  %v2665_v61 = vrot.slane %v2663_v19, 4  ;;  %v5675_v28 = vld [vmem:[%s5742_s26 + $0x8c] sm:$0x1] }
 0x1f1   : > { %3877 = vmatmul.bf16.gmra.mxu3 %v3757_v33  ;;  %v2843_v37 = vpop.f32.mrf.mxu1  ;;  %v3562_v33 = vrot.slane %v3560_v54, 5  ;;  %v4083_v59 = vsel %vm6057_vm5, %v4081_v4, %v4082_v38  ;;  %v5103_v54 = vrot.slane %v5087_v16, 9  ;;  %v4161_v3 = vunpack.c.l.b16 %v4080_v7 }
 0x1f2   : > { %v4264_v31 = vpop.f32.mrf.mxu0  ;;  %v2922_v42 = vadd.f32 %v2843_v37, %v6357_v5  ;;  %v3568_v5 = vrot.slane %v3566_v40, 5  ;;  %v3572_v37 = vrot.slane %v3570_v32, 4  ;;  %v4162_v11 = vunpack.c.l.b16 %v4083_v59 }
 0x1f3   : > { %v3563_v27 = vor.u32 %v3562_v33, %v3559_v0  ;;  %v3576_v40 = vshll.u32 %v5333_v9, 16  ;;  %v4086_v16 = vrot.slane %v6879_v41, 5 }
 0x1f4   : > { %v3838_v22 = vpop.f32.mrf.mxu3  ;;  %v3573_v4 = vor.u32 %v3572_v37, %v3568_v5  ;;  %v4184_v7 = vpack.c.b16 %v4162_v11, %v4161_v3  ;;  %v6916_v37 = vld [vmem:[%s5742_s26 + $0xa0] sm:$0xf]  ;;  %v4089_v11 = vrot.slane %v5333_v9, 5 }
 0x1f5   : > { %4303 = vmatmul.bf16.gmra.mxu0 %v4183_v57  ;;  %v3918_v44 = vadd.f32 %v3838_v22, %v3236_v1  ;;  %v2666_v22 = vrot.slane %v5675_v28, 5  ;;  %v3564_v38 = vrot.slane %v3563_v27, 4 }
 0x1f7   : > { %v4344_v15 = vadd.f32 %v4264_v31, %v3918_v44  ;;  %v3158_v21 = vpop.f32.mrf.mxu2 }
 0x1f8   : > { %v3237_v57 = vadd.f32 %v3158_v21, %v2922_v42  ;;  %v3758_v42 = vpack.c.b16 %v3736_v46, %v3735_v51  ;;  %v2664_v21 = vsel %vm6057_vm5, %v5103_v54, %v2663_v19  ;;  %v5334_v51 = vld [vmem:[%s5742_s26 + $0x9c] sm:$0xf]  ;;  %v3578_v54 = vrot.slane %v3576_v40, 5 }
 0x1f9   : > { %4376 = vst [vmem:[%s6893_s30] sm:$0xff] %v4344_v15  ;;  %v2846_v1 = vpop.f32.mrf.mxu1  ;;  %v2740_v19 = vunpack.c.l.b16 %v2664_v21  ;;  %v3581_v41 = vshrl.u32 %v5334_v51, 16 }
 0x1fa   : > { %v4266_v31 = vpop.f32.mrf.mxu0  ;;  %v2923_v0 = vadd.f32 %v2846_v1, %v6367_v48  ;;  %v3574_v1 = vrot.slane %v3573_v4, 4 }
 0x1fb   : > { %2885 = vmatmul.bf16.gmra.mxu1 %v2761_v13  ;;  %v2667_v13 = vsel %vm6057_vm5, %v2665_v61, %v2666_v22  ;;  %v5423_v61 = vrot.slane %v5407_v8, 9  ;;  %v3569_v22 = vsel %vm5757_vm2, %v3564_v38, %v3568_v5  ;;  %v3583_v21 = vrot.slane %v3581_v41, 4  ;;  %v5570_v8 = vld [vmem:[%s5742_s26 + $0x90] sm:$0xff] }
 0x1fc   : > { %v3840_v49 = vpop.f32.mrf.mxu3  ;;  %3200 = vmatmul.bf16.gmra.mxu2 %v5569_v25  ;;  %v4446_v25 = vmul.f32 %v4344_v15, %v4344_v15  ;;  %v2741_v27 = vunpack.c.l.b16 %v2667_v13 }
 0x1fd   : > { %v3919_v44 = vadd.f32 %v3840_v49, %v3237_v57  ;;  %v3584_v49 = vshll.u32 %v5334_v51, 16  ;;  %v4087_v5 = vsel %vm6057_vm5, %v5423_v61, %v4086_v16 }
 0x1fe   : > { %v2762_v40 = vpack.c.b16 %v2741_v27, %v2740_v19 }
 0x1ff   : > { %v4345_v32 = vadd.f32 %v4266_v31, %v3919_v44  ;;  %v3161_v33 = vpop.f32.mrf.mxu2  ;;  %v3590_v44 = vshll.u32 %v6916_v37, 16  ;;  %v3586_v13 = vrot.slane %v3584_v49, 5 }
 0x200   : > { %v3238_v59 = vadd.f32 %v3161_v33, %v2923_v0  ;;  %v3737_v0 = vunpack.c.l.b16 %v3569_v22  ;;  %v4163_v22 = vunpack.c.l.b16 %v4087_v5 }
 0x201   : > { %4377 = vst [vmem:[%s6893_s30 + $0x8] sm:$0xff] %v4345_v32  ;;  %v4408_v46 = vadd.f32 %v4345_v32, %v4344_v15  ;;  %v4447_v57 = vmul.f32 %v4345_v32, %v4345_v32  ;;  %3882 = vmatmul.bf16.gmra.mxu3 %v3758_v42  ;;  %v2848_v48 = vpop.f32.mrf.mxu1  ;;  %v4088_v15 = vrot.slane %v4086_v16, 4  ;;  %v3594_v42 = vshrl.u32 %v6916_v37, 16 }
 0x202   : > { %v4269_v31 = vpop.f32.mrf.mxu0  ;;  %v3579_v32 = vsel %vm5757_vm2, %v3574_v1, %v3578_v54  ;;  %v2924_v33 = vadd.f32 %v2848_v48, %v6381_v47  ;;  %v5088_v48 = vld [vmem:[%s5742_s26 + $0x90] sm:$0xe]  ;;  %v6934_v54 = vld [vmem:[%s5742_s26 + $0xa4] sm:$0x1]  ;;  %v3587_v49 = vor.u32 %v3586_v13, %v3583_v21  ;;  %v5337_v21 = vld [vmem:[%s5742_s26 + $0xa8] sm:$0xf] }
 0x203   : > { %v4478_v28 = vadd.f32 %v4447_v57, %v4446_v25  ;;  %v4090_v25 = vsel %vm6057_vm5, %v4088_v15, %v4089_v11  ;;  %v3592_v57 = vrot.slane %v3590_v44, 5  ;;  %v3738_v47 = vunpack.c.l.b16 %v3579_v32 }
 0x204   : > { %v3843_v3 = vpop.f32.mrf.mxu3  ;;  %v4164_v41 = vunpack.c.l.b16 %v4090_v25  ;;  %v5104_v15 = vrot.slane %v5088_v48, 9 }
 0x205   : > { %4308 = vmatmul.bf16.gmra.mxu0 %v4184_v7  ;;  %v3920_v4 = vadd.f32 %v3843_v3, %v3238_v59  ;;  %v5676_v7 = vld [vmem:[%s5742_s26 + $0x94] sm:$0xf]  ;;  %v3596_v59 = vrot.slane %v3594_v42, 4  ;;  %v3759_v32 = vpack.c.b16 %v3738_v47, %v3737_v0  ;;  %v4093_v0 = vrot.slane %v6916_v37, 5  ;;  %v6948_v47 = vld [vmem:[%s5742_s26 + $0xac] sm:$0xf] }
 0x206   : > { %v2670_v51 = vrot.slane %v5676_v7, 5 }
 0x207   : > { %v4346_v38 = vadd.f32 %v4269_v31, %v3920_v4  ;;  %v3163_v9 = vpop.f32.mrf.mxu2  ;;  %v3597_v42 = vor.u32 %v3596_v59, %v3592_v57 }
 0x208   : > { %v3239_v16 = vadd.f32 %v3163_v9, %v2924_v33  ;;  %v2672_v11 = vrot.slane %v2670_v51, 4  ;;  %v3588_v9 = vrot.slane %v3587_v49, 4  ;;  %v2671_v13 = vsel %vm6057_vm5, %v5104_v15, %v2670_v51 }
 0x209   : > { %4378 = vst [vmem:[%s6893_s30 + $0x10] sm:$0xff] %v4346_v38  ;;  %v4409_v1 = vadd.f32 %v4408_v46, %v4346_v38  ;;  %v4448_v19 = vmul.f32 %v4346_v38, %v4346_v38  ;;  %v2851_v31 = vpop.f32.mrf.mxu1  ;;  %v5677_v46 = vld [vmem:[%s5742_s26 + $0x98] sm:$0x1]  ;;  %v3600_v38 = vshll.u32 %v6934_v54, 16  ;;  %v3598_v25 = vrot.slane %v3597_v42, 4 }
 0x20a   : > { %v4271_v27 = vpop.f32.mrf.mxu0  ;;  %v2673_v44 = vrot.slane %v5677_v46, 5  ;;  %v4095_v15 = vrot.slane %v4093_v0, 4  ;;  %v3614_v46 = vshll.u32 %v6948_v47, 16  ;;  %v3618_v42 = vshrl.u32 %v6948_v47, 16 }
 0x20b   : > { %v4479_v61 = vadd.f32 %v4478_v28, %v4448_v19  ;;  %2890 = vmatmul.bf16.gmra.mxu1 %v2762_v40  ;;  %v2925_v28 = vadd.f32 %v2851_v31, %v6401_v52  ;;  %v4185_v40 = vpack.c.b16 %v4164_v41, %v4163_v22  ;;  %v5408_v31 = vld [vmem:[%s5742_s26 + $0x9c] sm:$0xe]  ;;  %v3608_v22 = vshll.u32 %v5337_v21, 16 }
 0x20c   : > { %v3845_v3 = vpop.f32.mrf.mxu3  ;;  %3205 = vmatmul.bf16.gmra.mxu2 %v5570_v8  ;;  %v2674_v8 = vsel %vm6057_vm5, %v2672_v11, %v2673_v44  ;;  %v2742_v41 = vunpack.c.l.b16 %v2671_v13  ;;  %v4096_v11 = vrot.slane %v6934_v54, 5  ;;  %v5678_v54 = vld [vmem:[%s5742_s26 + $0xa0] sm:$0xf] }
 0x20d   : > { %v3921_v4 = vadd.f32 %v3845_v3, %v3239_v16  ;;  %v3602_v16 = vrot.slane %v3600_v38, 5  ;;  %v2743_v49 = vunpack.c.l.b16 %v2674_v8  ;;  %v3593_v3 = vsel %vm5757_vm2, %v3588_v9, %v3592_v57 }
 0x20e   : > { %v2677_v9 = vrot.slane %v5678_v54, 5  ;;  %v4097_v8 = vsel %vm6057_vm5, %v4095_v15, %v4096_v11  ;;  %v4100_v54 = vrot.slane %v6948_v47, 5 }
 0x20f   : > { %v4347_v33 = vadd.f32 %v4271_v27, %v3921_v4  ;;  %v3166_v5 = vpop.f32.mrf.mxu2  ;;  %v3605_v27 = vshrl.u32 %v5337_v21, 16  ;;  %v3739_v4 = vunpack.c.l.b16 %v3593_v3  ;;  %v5571_v21 = vld [vmem:[%s5742_s26 + $0x9c] sm:$0xff] }
 0x210   : > { %v3240_v52 = vadd.f32 %v3166_v5, %v2925_v28  ;;  %v2763_v5 = vpack.c.b16 %v2743_v49, %v2742_v41  ;;  %v2679_v49 = vrot.slane %v2677_v9, 4 }
 0x211   : > { %4379 = vst [vmem:[%s6893_s30 + $0x18] sm:$0xff] %v4347_v33  ;;  %v4410_v7 = vadd.f32 %v4409_v1, %v4347_v33  ;;  %v4449_v59 = vmul.f32 %v4347_v33, %v4347_v33  ;;  %3887 = vmatmul.bf16.gmra.mxu3 %v3759_v32  ;;  %v2853_v19 = vpop.f32.mrf.mxu1  ;;  %v5424_v1 = vrot.slane %v5408_v31, 9  ;;  %v3607_v57 = vrot.slane %v3605_v27, 4 }
 0x212   : > { %v4274_v48 = vpop.f32.mrf.mxu0  ;;  %v3610_v32 = vrot.slane %v3608_v22, 5  ;;  %v2926_v33 = vadd.f32 %v2853_v19, %v6421_v34  ;;  %v3620_v31 = vrot.slane %v3618_v42, 4 }
 0x213   : > { %v4480_v51 = vadd.f32 %v4479_v61, %v4449_v59  ;;  %v3603_v61 = vsel %vm5757_vm2, %v3598_v25, %v3602_v16  ;;  %v4094_v13 = vsel %vm6057_vm5, %v5424_v1, %v4093_v0  ;;  %v5089_v25 = vld [vmem:[%s5742_s26 + $0x9c] sm:$0xe]  ;;  %v3616_v59 = vrot.slane %v3614_v46, 5  ;;  %v5679_v0 = vld [vmem:[%s5742_s26 + $0xa4] sm:$0x1] }
 0x214   : > { %v3848_v37 = vpop.f32.mrf.mxu3  ;;  %v3611_v27 = vor.u32 %v3610_v32, %v3607_v57  ;;  %v5105_v41 = vrot.slane %v5089_v25, 9  ;;  %v2680_v3 = vrot.slane %v5679_v0, 5  ;;  %v4165_v15 = vunpack.c.l.b16 %v4094_v13 }
 0x215   : > { %4313 = vmatmul.bf16.gmra.mxu0 %v4185_v40  ;;  %v3922_v44 = vadd.f32 %v3848_v37, %v3240_v52  ;;  %v3740_v40 = vunpack.c.l.b16 %v3603_v61  ;;  %v5339_v37 = vld [vmem:[%s5742_s26 + $0xb0] sm:$0x1] }
 0x216   : > { %v3612_v61 = vrot.slane %v3611_v27, 4  ;;  %v3624_v42 = vshll.u32 %v5339_v37, 16  ;;  %v4103_v0 = vrot.slane %v5339_v37, 5 }
 0x217   : > { %v4348_v38 = vadd.f32 %v4274_v48, %v3922_v44  ;;  %v3168_v28 = vpop.f32.mrf.mxu2  ;;  %v3760_v46 = vpack.c.b16 %v3740_v40, %v3739_v4  ;;  %v3621_v44 = vor.u32 %v3620_v31, %v3616_v59 }
 0x218   : > { %v3241_v34 = vadd.f32 %v3168_v28, %v2926_v33  ;;  %v2681_v33 = vsel %vm6057_vm5, %v2679_v49, %v2680_v3  ;;  %v5409_v28 = vld [vmem:[%s5742_s26 + $0xa8] sm:$0xe]  ;;  %v3617_v27 = vsel %vm5757_vm2, %v3612_v61, %v3616_v59 }
 0x219   : > { %4380 = vst [vmem:[%s6893_s30 + $0x20] sm:$0xff] %v4348_v38  ;;  %v4411_v52 = vadd.f32 %v4410_v7, %v4348_v38  ;;  %v4450_v16 = vmul.f32 %v4348_v38, %v4348_v38  ;;  %v2856_v19 = vpop.f32.mrf.mxu1  ;;  %v4166_v7 = vunpack.c.l.b16 %v4097_v8  ;;  %v2678_v38 = vsel %vm6057_vm5, %v5105_v41, %v2677_v9 }
 0x21a   : > { %v4276_v48 = vpop.f32.mrf.mxu0  ;;  %v3622_v25 = vrot.slane %v3621_v44, 4  ;;  %v2745_v9 = vunpack.c.l.b16 %v2681_v33  ;;  %v5425_v31 = vrot.slane %v5409_v28, 9 }
 0x21b   : > { %v4481_v22 = vadd.f32 %v4480_v51, %v4450_v16  ;;  %2895 = vmatmul.bf16.gmra.mxu1 %v2763_v5  ;;  %v2927_v51 = vadd.f32 %v2856_v19, %v6431_v10  ;;  %v4186_v5 = vpack.c.b16 %v4166_v7, %v4165_v15  ;;  %v6978_v10 = vld [vmem:[%s5742_s26 + $0xb8] sm:$0xf]  ;;  %v3626_v19 = vrot.slane %v3624_v42, 5 }
 0x21c   : > { %v3850_v1 = vpop.f32.mrf.mxu3  ;;  %3210 = vmatmul.bf16.gmra.mxu2 %v5571_v21  ;;  %v5340_v21 = vld [vmem:[%s5742_s26 + $0xb4] sm:$0xf]  ;;  %v3638_v3 = vshll.u32 %v6978_v10, 16  ;;  %v4101_v59 = vsel %vm6057_vm5, %v5425_v31, %v4100_v54 }
 0x21d   : > { %v3923_v11 = vadd.f32 %v3850_v1, %v3241_v34  ;;  %v2744_v34 = vunpack.c.l.b16 %v2678_v38  ;;  %v3629_v47 = vshrl.u32 %v5340_v21, 16  ;;  %v3632_v41 = vshll.u32 %v5340_v21, 16 }
 0x21e   : > { %v3642_v1 = vshrl.u32 %v6978_v10, 16  ;;  %v3640_v33 = vrot.slane %v3638_v3, 5 }
 0x21f   : > { %v4349_v57 = vadd.f32 %v4276_v48, %v3923_v11  ;;  %v3171_v32 = vpop.f32.mrf.mxu2  ;;  %v2764_v7 = vpack.c.b16 %v2745_v9, %v2744_v34  ;;  %v3741_v11 = vunpack.c.l.b16 %v3617_v27  ;;  %v3631_v61 = vrot.slane %v3629_v47, 4 }
 0x220   : > { %v3242_v13 = vadd.f32 %v3171_v32, %v2927_v51  ;;  %v3634_v42 = vrot.slane %v3632_v41, 5  ;;  %v5680_v32 = vld [vmem:[%s5742_s26 + $0xac] sm:$0xf]  ;;  %v3644_v28 = vrot.slane %v3642_v1, 4  ;;  %v4167_v34 = vunpack.c.l.b16 %v4101_v59  ;;  %v5343_v59 = vld [vmem:[%s5742_s26 + $0xc0] sm:$0xf] }
 0x221   : > { %4381 = vst [vmem:[%s6893_s30 + $0x28] sm:$0xff] %v4349_v57  ;;  %v4412_v4 = vadd.f32 %v4411_v52, %v4349_v57  ;;  %v4451_v40 = vmul.f32 %v4349_v57, %v4349_v57  ;;  %3892 = vmatmul.bf16.gmra.mxu3 %v3760_v46  ;;  %v2858_v8 = vpop.f32.mrf.mxu1  ;;  %v4102_v52 = vrot.slane %v4100_v54, 4  ;;  %v5572_v57 = vld [vmem:[%s5742_s26 + $0xa8] sm:$0xff]  ;;  %v2684_v38 = vrot.slane %v5680_v32, 5  ;;  %v5410_v32 = vld [vmem:[%s5742_s26 + $0xb4] sm:$0xe] }
 0x222   : > { %v4279_v16 = vpop.f32.mrf.mxu0  ;;  %v2928_v44 = vadd.f32 %v2858_v8, %v6439_v12 }
 0x223   : > { %v4482_v48 = vadd.f32 %v4481_v22, %v4451_v40  ;;  %v3627_v22 = vsel %vm5757_vm2, %v3622_v25, %v3626_v19  ;;  %v4104_v51 = vsel %vm6057_vm5, %v4102_v52, %v4103_v0  ;;  %v6996_v25 = vld [vmem:[%s5742_s26 + $0xbc] sm:$0x1]  ;;  %v3635_v19 = vor.u32 %v3634_v42, %v3631_v61 }
 0x224   : > { %v3853_v49 = vpop.f32.mrf.mxu3  ;;  %v3742_v12 = vunpack.c.l.b16 %v3627_v22  ;;  %v4168_v9 = vunpack.c.l.b16 %v4104_v51  ;;  %v2686_v47 = vrot.slane %v2684_v38, 4  ;;  %v3648_v3 = vshll.u32 %v6996_v25, 16 }
 0x225   : > { %4318 = vmatmul.bf16.gmra.mxu0 %v4186_v5  ;;  %v3924_v15 = vadd.f32 %v3853_v49, %v3242_v13  ;;  %v5090_v13 = vld [vmem:[%s5742_s26 + $0xa8] sm:$0xe]  ;;  %v3645_v49 = vor.u32 %v3644_v28, %v3640_v33  ;;  %v3636_v22 = vrot.slane %v3635_v19, 4  ;;  %v7010_v28 = vld [vmem:[%s5742_s26 + $0xc4] sm:$0xf] }
 0x226   : > { %v5106_v27 = vrot.slane %v5090_v13, 9  ;;  %v3761_v0 = vpack.c.b16 %v3742_v12, %v3741_v11  ;;  %v4107_v11 = vrot.slane %v6978_v10, 5  ;;  %v3650_v51 = vrot.slane %v3648_v3, 5 }
 0x227   : > { %v4350_v46 = vadd.f32 %v4279_v16, %v3924_v15  ;;  %v3173_v37 = vpop.f32.mrf.mxu2  ;;  %v4187_v15 = vpack.c.b16 %v4168_v9, %v4167_v34  ;;  %v4110_v9 = vrot.slane %v6996_v25, 5  ;;  %v3662_v19 = vshll.u32 %v7010_v28, 16  ;;  %v5682_v25 = vld [vmem:[%s5742_s26 + $0xb8] sm:$0xf] }
 0x228   : > { %v3243_v54 = vadd.f32 %v3173_v37, %v2928_v44  ;;  %v3646_v37 = vrot.slane %v3645_v49, 4  ;;  %v4109_v34 = vrot.slane %v4107_v11, 4  ;;  %v7141_v49 = vld [vmem:[#allocation2_spill] sm:$0xff] }
 0x229   : > { %4382 = vst [vmem:[%s6893_s30 + $0x30] sm:$0xff] %v4350_v46  ;;  %v4413_v5 = vadd.f32 %v4412_v4, %v4350_v46  ;;  %v4452_v21 = vmul.f32 %v4350_v46, %v4350_v46  ;;  %v2861_v40 = vpop.f32.mrf.mxu1  ;;  %v5681_v4 = vld [vmem:[%s5742_s26 + $0xb0] sm:$0x1]  ;;  %v2685_v46 = vsel %vm6057_vm5, %v5106_v27, %v2684_v38  ;;  %v3666_v27 = vshrl.u32 %v7010_v28, 16 }
 0x22a   : > { %v4281_v8 = vpop.f32.mrf.mxu0  ;;  %v2687_v41 = vrot.slane %v5681_v4, 5  ;;  %v2746_v12 = vunpack.c.l.b16 %v2685_v46  ;;  %v3664_v46 = vrot.slane %v3662_v19, 5 }
 0x22b   : > { %v4483_v16 = vadd.f32 %v4482_v48, %v4452_v21  ;;  %2900 = vmatmul.bf16.gmra.mxu1 %v2764_v7  ;;  %v2929_v48 = vadd.f32 %v2861_v40, %v6458_v60  ;;  %v3656_v40 = vshll.u32 %v5343_v59, 16 }
 0x22c   : > { %v3855_v31 = vpop.f32.mrf.mxu3  ;;  %3215 = vmatmul.bf16.gmra.mxu2 %v5572_v57  ;;  %v2688_v44 = vsel %vm6057_vm5, %v2686_v47, %v2687_v41 }
 0x22d   : > { %v3925_v52 = vadd.f32 %v3855_v31, %v3243_v54  ;;  %v3653_v54 = vshrl.u32 %v5343_v59, 16  ;;  %v2747_v13 = vunpack.c.l.b16 %v2688_v44  ;;  %v3658_v4 = vrot.slane %v3656_v40, 5  ;;  %v5091_v59 = vld [vmem:[%s5742_s26 + $0xb4] sm:$0xe] }
 0x22f   : > { %v4351_v1 = vadd.f32 %v4281_v8, %v3925_v52  ;;  %v3176_v7 = vpop.f32.mrf.mxu2  ;;  %v3641_v8 = vsel %vm5757_vm2, %v3636_v22, %v3640_v33  ;;  %v3655_v33 = vrot.slane %v3653_v54, 4  ;;  %v2765_v3 = vpack.c.b16 %v2747_v13, %v2746_v12  ;;  %v5345_v13 = vld [vmem:[%s5742_s26 + $0xc8] sm:$0x1] }
 0x230   : > { %v3244_v60 = vadd.f32 %v3176_v7, %v2929_v48  ;;  %v3743_v47 = vunpack.c.l.b16 %v3641_v8  ;;  %v5573_v48 = vld [vmem:[%s5742_s26 + $0xb4] sm:$0xff]  ;;  %v4111_v22 = vsel %vm6057_vm5, %v4109_v34, %v4110_v9  ;;  %v5107_v54 = vrot.slane %v5091_v59, 9 }
 0x231   : > { %4383 = vst [vmem:[%s6893_s30 + $0x38] sm:$0xff] %v4351_v1  ;;  %v4414_v61 = vadd.f32 %v4413_v5, %v4351_v1  ;;  %v4453_v42 = vmul.f32 %v4351_v1, %v4351_v1  ;;  %3897 = vmatmul.bf16.gmra.mxu3 %v3761_v0  ;;  %v2863_v57 = vpop.f32.mrf.mxu1  ;;  %v5426_v5 = vrot.slane %v5410_v32, 9  ;;  %v2691_v1 = vrot.slane %v5682_v25, 5 }
 0x232   : > { %v4284_v21 = vpop.f32.mrf.mxu0  ;;  %v2930_v52 = vadd.f32 %v2863_v57, %v7141_v49  ;;  %v3668_v57 = vrot.slane %v3666_v27, 4  ;;  %v3659_v32 = vor.u32 %v3658_v4, %v3655_v33  ;;  %v5411_v49 = vld [vmem:[%s5742_s26 + $0xc0] sm:$0xe] }
 0x233   : > { %v4484_v38 = vadd.f32 %v4483_v16, %v4453_v42  ;;  %v3651_v16 = vsel %vm5757_vm2, %v3646_v37, %v3650_v51  ;;  %v4108_v7 = vsel %vm6057_vm5, %v5426_v5, %v4107_v11  ;;  %v2693_v40 = vrot.slane %v2691_v1, 4  ;;  %v5683_v11 = vld [vmem:[%s5742_s26 + $0xbc] sm:$0x1] }
 0x234   : > { %v3858_v10 = vpop.f32.mrf.mxu3  ;;  %v2694_v12 = vrot.slane %v5683_v11, 5  ;;  %v3669_v9 = vor.u32 %v3668_v57, %v3664_v46  ;;  %v3660_v19 = vrot.slane %v3659_v32, 4  ;;  %v2692_v4 = vsel %vm6057_vm5, %v5107_v54, %v2691_v1 }
 0x235   : > { %4323 = vmatmul.bf16.gmra.mxu0 %v4187_v15  ;;  %v3926_v31 = vadd.f32 %v3858_v10, %v3244_v60  ;;  %v3744_v15 = vunpack.c.l.b16 %v3651_v16  ;;  %v4169_v10 = vunpack.c.l.b16 %v4108_v7 }
 0x236   : > { %v3670_v7 = vrot.slane %v3669_v9, 4 }
 0x237   : > { %v4352_v41 = vadd.f32 %v4284_v21, %v3926_v31  ;;  %v3178_v0 = vpop.f32.mrf.mxu2  ;;  %v3762_v34 = vpack.c.b16 %v3744_v15, %v3743_v47  ;;  %v3672_v31 = vshll.u32 %v5345_v13, 16 }
 0x238   : > { %v3245_v42 = vadd.f32 %v3178_v0, %v2930_v52  ;;  %v4114_v0 = vrot.slane %v7010_v28, 5 }
 0x239   : > { %4384 = vst [vmem:[%s6893_s30 + $0x40] sm:$0xff] %v4352_v41  ;;  %v4415_v44 = vadd.f32 %v4414_v61, %v4352_v41  ;;  %v4454_v37 = vmul.f32 %v4352_v41, %v4352_v41  ;;  %v2866_v60 = vpop.f32.mrf.mxu1  ;;  %v4170_v61 = vunpack.c.l.b16 %v4111_v22  ;;  %v2695_v41 = vsel %vm6057_vm5, %v2693_v40, %v2694_v12  ;;  %v7040_v22 = vld [vmem:[%s5742_s26 + $0xd0] sm:$0xf] }
 0x23a   : > { %v4286_v51 = vpop.f32.mrf.mxu0  ;;  %v2749_v1 = vunpack.c.l.b16 %v2695_v41  ;;  %v4117_v40 = vrot.slane %v5345_v13, 5  ;;  %v3686_v11 = vshll.u32 %v7040_v22, 16  ;;  %v3690_v12 = vshrl.u32 %v7040_v22, 16 }
 0x23b   : > { %v4485_v21 = vadd.f32 %v4484_v38, %v4454_v37  ;;  %2905 = vmatmul.bf16.gmra.mxu1 %v2765_v3  ;;  %v7142_v38 = vld [vmem:[#allocation3_spill] sm:$0xff]  ;;  %v4188_v52 = vpack.c.b16 %v4170_v61, %v4169_v10  ;;  %v2748_v37 = vunpack.c.l.b16 %v2692_v4 }
 0x23c   : > { %v3860_v8 = vpop.f32.mrf.mxu3  ;;  %3220 = vmatmul.bf16.gmra.mxu2 %v5573_v48  ;;  %v2931_v27 = vadd.f32 %v2866_v60, %v7142_v38  ;;  %v5346_v3 = vld [vmem:[%s5742_s26 + $0xcc] sm:$0xf]  ;;  %v5427_v60 = vrot.slane %v5411_v49, 9  ;;  %v5684_v38 = vld [vmem:[%s5742_s26 + $0xc4] sm:$0xf]  ;;  %v3688_v4 = vrot.slane %v3686_v11, 5 }
 0x23d   : > { %v3927_v5 = vadd.f32 %v3860_v8, %v3245_v42  ;;  %v3674_v42 = vrot.slane %v3672_v31, 5  ;;  %v3677_v28 = vshrl.u32 %v5346_v3, 16  ;;  %v3680_v32 = vshll.u32 %v5346_v3, 16  ;;  %v5574_v31 = vld [vmem:[%s5742_s26 + $0xc0] sm:$0xff] }
 0x23e   : > { %v2766_v10 = vpack.c.b16 %v2749_v1, %v2748_v37  ;;  %v4115_v61 = vsel %vm6057_vm5, %v5427_v60, %v4114_v0  ;;  %v3692_v41 = vrot.slane %v3690_v12, 4 }
 0x23f   : > { %v4353_v16 = vadd.f32 %v4286_v51, %v3927_v5  ;;  %v3181_v33 = vpop.f32.mrf.mxu2  ;;  %v3665_v51 = vsel %vm5757_vm2, %v3660_v19, %v3664_v46  ;;  %v3679_v9 = vrot.slane %v3677_v28, 4  ;;  %v3682_v19 = vrot.slane %v3680_v32, 5 }
 0x240   : > { %v3246_v48 = vadd.f32 %v3181_v33, %v2931_v27  ;;  %v3745_v46 = vunpack.c.l.b16 %v3665_v51  ;;  %v2698_v27 = vrot.slane %v5684_v38, 5  ;;  %v7056_v33 = vld [vmem:[%s5742_s26 + $0xd4] sm:$0x1]  ;;  %v3693_v32 = vor.u32 %v3692_v41, %v3688_v4 }
 0x241   : > { %4385 = vst [vmem:[%s6893_s30 + $0x48] sm:$0xff] %v4353_v16  ;;  %v4416_v47 = vadd.f32 %v4415_v44, %v4353_v16  ;;  %v4455_v25 = vmul.f32 %v4353_v16, %v4353_v16  ;;  %3902 = vmatmul.bf16.gmra.mxu3 %v3762_v34  ;;  %v2868_v15 = vpop.f32.mrf.mxu1  ;;  %v4116_v44 = vrot.slane %v4114_v0, 4  ;;  %v3683_v37 = vor.u32 %v3682_v19, %v3679_v9  ;;  %v5412_v19 = vld [vmem:[%s5742_s26 + $0xcc] sm:$0xe] }
 0x242   : > { %v4289_v59 = vpop.f32.mrf.mxu0  ;;  %v2932_v13 = vadd.f32 %v2868_v15, %v6509_v24  ;;  %v4171_v15 = vunpack.c.l.b16 %v4115_v61  ;;  %v3696_v1 = vshll.u32 %v7056_v33, 16  ;;  %v2700_v51 = vrot.slane %v2698_v27, 4 }
 0x243   : > { %v4486_v57 = vadd.f32 %v4485_v21, %v4455_v25  ;;  %v3675_v21 = vsel %vm5757_vm2, %v3670_v7, %v3674_v42  ;;  %v4118_v16 = vsel %vm6057_vm5, %v4116_v44, %v4117_v40  ;;  %v5092_v25 = vld [vmem:[%s5742_s26 + $0xc0] sm:$0xe]  ;;  %v3694_v61 = vrot.slane %v3693_v32, 4 }
 0x244   : > { %v3863_v54 = vpop.f32.mrf.mxu3  ;;  %v3746_v3 = vunpack.c.l.b16 %v3675_v21  ;;  %v5108_v60 = vrot.slane %v5092_v25, 9  ;;  %v4124_v25 = vrot.slane %v7056_v33, 5 }
 0x245   : > { %4328 = vmatmul.bf16.gmra.mxu0 %v4188_v52  ;;  %v3928_v8 = vadd.f32 %v3863_v54, %v3246_v48 }
 0x246   : > { %v3763_v44 = vpack.c.b16 %v3746_v3, %v3745_v46 }
 0x247   : > { %v4354_v5 = vadd.f32 %v4289_v59, %v3928_v8  ;;  %v3183_v34 = vpop.f32.mrf.mxu2  ;;  %v4172_v59 = vunpack.c.l.b16 %v4118_v16  ;;  %v3684_v8 = vrot.slane %v3683_v37, 4 }
 0x248   : > { %v3247_v0 = vadd.f32 %v3183_v34, %v2932_v13 }
 0x249   : > { %4386 = vst [vmem:[%s6893_s30 + $0x50] sm:$0xff] %v4354_v5  ;;  %v4417_v49 = vadd.f32 %v4416_v47, %v4354_v5  ;;  %v4456_v52 = vmul.f32 %v4354_v5, %v4354_v5  ;;  %v2871_v24 = vpop.f32.mrf.mxu1  ;;  %v5685_v47 = vld [vmem:[%s5742_s26 + $0xc8] sm:$0x1]  ;;  %v3698_v5 = vrot.slane %v3696_v1, 5 }
 0x24a   : > { %v4291_v48 = vpop.f32.mrf.mxu0  ;;  %v2701_v28 = vrot.slane %v5685_v47, 5  ;;  %v2933_v11 = vadd.f32 %v2871_v24, %v6518_v36  ;;  %v4121_v36 = vrot.slane %v7040_v22, 5 }
 0x24b   : > { %v4487_v7 = vadd.f32 %v4486_v57, %v4456_v52  ;;  %2910 = vmatmul.bf16.gmra.mxu1 %v2766_v10  ;;  %v4189_v57 = vpack.c.b16 %v4172_v59, %v4171_v15  ;;  %v2699_v10 = vsel %vm6057_vm5, %v5108_v60, %v2698_v27  ;;  %v3689_v52 = vsel %vm5757_vm2, %v3684_v8, %v3688_v4  ;;  %v5575_v59 = vld [vmem:[%s5742_s26 + $0xcc] sm:$0xff] }
 0x24c   : > { %v3865_v42 = vpop.f32.mrf.mxu3  ;;  %3225 = vmatmul.bf16.gmra.mxu2 %v5574_v31  ;;  %v2702_v21 = vsel %vm6057_vm5, %v2700_v51, %v2701_v28  ;;  %v2750_v38 = vunpack.c.l.b16 %v2699_v10  ;;  %v3699_v24 = vsel %vm5757_vm2, %v3694_v61, %v3698_v5  ;;  %v4123_v3 = vrot.slane %v4121_v36, 4 }
 0x24d   : > { %v3929_v54 = vadd.f32 %v3865_v42, %v3247_v0  ;;  %v2751_v41 = vunpack.c.l.b16 %v2702_v21  ;;  %v5428_v0 = vrot.slane %v5412_v19, 9  ;;  %v3747_v37 = vunpack.c.l.b16 %v3689_v52 }
 0x24e   : > { %v3748_v1 = vunpack.c.l.b16 %v3699_v24  ;;  %v4125_v33 = vsel %vm6057_vm5, %v4123_v3, %v4124_v25 }
 0x24f   : > { %v4355_v40 = vadd.f32 %v4291_v48, %v3929_v54  ;;  %v3186_v12 = vpop.f32.mrf.mxu2  ;;  %v4122_v4 = vsel %vm6057_vm5, %v5428_v0, %v4121_v36  ;;  %v4174_v54 = vunpack.c.l.b16 %v4125_v33 }
 0x250   : > { %v3248_v46 = vadd.f32 %v3186_v12, %v2933_v11  ;;  %v4173_v32 = vunpack.c.l.b16 %v4122_v4 }
 0x251   : > { %4387 = vst [vmem:[%s6893_s30 + $0x58] sm:$0xff] %v4355_v40  ;;  %v4418_v13 = vadd.f32 %v4417_v49, %v4355_v40  ;;  %v4457_v34 = vmul.f32 %v4355_v40, %v4355_v40  ;;  %3907 = vmatmul.bf16.gmra.mxu3 %v3763_v44  ;;  %v2873_v9 = vpop.f32.mrf.mxu1  ;;  %v3764_v40 = vpack.c.b16 %v3748_v1, %v3747_v37 }
 0x252   : > { %v4294_v31 = vpop.f32.mrf.mxu0  ;;  %v2934_v48 = vadd.f32 %v2873_v9, %v6531_v45  ;;  %v4190_v8 = vpack.c.b16 %v4174_v54, %v4173_v32 }
 0x253   : > { %v4488_v16 = vadd.f32 %v4487_v7, %v4457_v34  ;;  %v2767_v7 = vpack.c.b16 %v2751_v41, %v2750_v38 }
 0x254   : > { %v3868_v27 = vpop.f32.mrf.mxu3 }
 0x255   : > { %4333 = vmatmul.bf16.gmra.mxu0 %v4189_v57  ;;  %v3930_v49 = vadd.f32 %v3868_v27, %v3248_v46 }
 0x257   : > { %v4356_v22 = vadd.f32 %v4294_v31, %v3930_v49  ;;  %v3188_v15 = vpop.f32.mrf.mxu2 }
 0x258   : > { %v3249_v51 = vadd.f32 %v3188_v15, %v2934_v48 }
 0x259   : > { %4388 = vst [vmem:[%s6893_s30 + $0x60] sm:$0xff] %v4356_v22  ;;  %v4419_v42 = vadd.f32 %v4418_v13, %v4356_v22  ;;  %v4458_v60 = vmul.f32 %v4356_v22, %v4356_v22  ;;  %v2876_v30 = vpop.f32.mrf.mxu1 }
 0x25a   : > { %v4296_v47 = vpop.f32.mrf.mxu0  ;;  %v2935_v57 = vadd.f32 %v2876_v30, %v6544_v23 }
 0x25b   : > { %v4489_v28 = vadd.f32 %v4488_v16, %v4458_v60  ;;  %2915 = vmatmul.bf16.gmra.mxu1 %v2767_v7 }
 0x25c   : > { %v3870_v45 = vpop.f32.mrf.mxu3  ;;  %3230 = vmatmul.bf16.gmra.mxu2 %v5575_v59 }
 0x25d   : > { %v3931_v44 = vadd.f32 %v3870_v45, %v3249_v51 }
 0x25f   : > { %v4357_v11 = vadd.f32 %v4296_v47, %v3931_v44  ;;  %v3191_v12 = vpop.f32.mrf.mxu2 }
 0x260   : > { %v3250_v43 = vadd.f32 %v3191_v12, %v2935_v57 }
 0x261   : > { %4389 = vst [vmem:[%s6893_s30 + $0x68] sm:$0xff] %v4357_v11  ;;  %v4420_v10 = vadd.f32 %v4419_v42, %v4357_v11  ;;  %v4459_v21 = vmul.f32 %v4357_v11, %v4357_v11  ;;  %3912 = vmatmul.bf16.gmra.mxu3 %v3764_v40  ;;  %v2878_v61 = vpop.f32.mrf.mxu1 }
 0x262   : > { %v4299_v5 = vpop.f32.mrf.mxu0  ;;  %v2936_v19 = vadd.f32 %v2878_v61, %v6568_v17 }
 0x263   : > { %v4490_v13 = vadd.f32 %v4489_v28, %v4459_v21 }
 0x264   : > { %v3873_v34 = vpop.f32.mrf.mxu3 }
 0x265   : > { %4338 = vmatmul.bf16.gmra.mxu0 %v4190_v8  ;;  %v3932_v46 = vadd.f32 %v3873_v34, %v3250_v43 }
 0x267   : > { %v4358_v9 = vadd.f32 %v4299_v5, %v3932_v46  ;;  %v3193_v36 = vpop.f32.mrf.mxu2 }
 0x268   : > { %v3251_v16 = vadd.f32 %v3193_v36, %v2936_v19 }
 0x269   : > { %4390 = vst [vmem:[%s6893_s30 + $0x70] sm:$0xff] %v4358_v9  ;;  %v4421_v23 = vadd.f32 %v4420_v10, %v4358_v9  ;;  %v4460_v31 = vmul.f32 %v4358_v9, %v4358_v9  ;;  %v2881_v38 = vpop.f32.mrf.mxu1 }
 0x26a   : > { %v4301_v41 = vpop.f32.mrf.mxu0  ;;  %v2937_v24 = vadd.f32 %v2881_v38, %v6583_v20 }
 0x26b   : > { %v4491_v27 = vadd.f32 %v4490_v13, %v4460_v31 }
 0x26c   : > { %v3875_v52 = vpop.f32.mrf.mxu3 }
 0x26d   : > { %v3933_v0 = vadd.f32 %v3875_v52, %v3251_v16 }
 0x26f   : > { %v4359_v49 = vadd.f32 %v4301_v41, %v3933_v0  ;;  %v3196_v3 = vpop.f32.mrf.mxu2 }
 0x270   : > { %v3252_v48 = vadd.f32 %v3196_v3, %v2937_v24 }
 0x271   : > { %4391 = vst [vmem:[%s6893_s30 + $0x78] sm:$0xff] %v4359_v49  ;;  %v4422_v25 = vadd.f32 %v4421_v23, %v4359_v49  ;;  %v4461_v22 = vmul.f32 %v4359_v49, %v4359_v49  ;;  %v2883_v17 = vpop.f32.mrf.mxu1 }
 0x272   : > { %v4304_v15 = vpop.f32.mrf.mxu0  ;;  %v2938_v4 = vadd.f32 %v2883_v17, %v6609_v56 }
 0x273   : > { %v4492_v7 = vadd.f32 %v4491_v27, %v4461_v22 }
 0x274   : > { %v3878_v59 = vpop.f32.mrf.mxu3 }
 0x275   : > { %v3934_v37 = vadd.f32 %v3878_v59, %v3252_v48 }
 0x277   : > { %v4360_v1 = vadd.f32 %v4304_v15, %v3934_v37  ;;  %v3198_v42 = vpop.f32.mrf.mxu2 }
 0x278   : > { %v3253_v30 = vadd.f32 %v3198_v42, %v2938_v4 }
 0x279   : > { %4392 = vst [vmem:[%s6893_s30 + $0x80] sm:$0xff] %v4360_v1  ;;  %v4423_v60 = vadd.f32 %v4422_v25, %v4360_v1  ;;  %v4462_v51 = vmul.f32 %v4360_v1, %v4360_v1  ;;  %v2886_v20 = vpop.f32.mrf.mxu1 }
 0x27a   : > { %v4306_v33 = vpop.f32.mrf.mxu0  ;;  %v2939_v54 = vadd.f32 %v2886_v20, %v6623_v29 }
 0x27b   : > { %v4493_v47 = vadd.f32 %v4492_v7, %v4462_v51 }
 0x27c   : > { %v3880_v28 = vpop.f32.mrf.mxu3 }
 0x27d   : > { %v3935_v45 = vadd.f32 %v3880_v28, %v3253_v30 }
 0x27f   : > { %v4361_v32 = vadd.f32 %v4306_v33, %v3935_v45  ;;  %v3201_v44 = vpop.f32.mrf.mxu2 }
 0x280   : > { %v3254_v57 = vadd.f32 %v3201_v44, %v2939_v54 }
 0x281   : > { %4393 = vst [vmem:[%s6893_s30 + $0x88] sm:$0xff] %v4361_v32  ;;  %v4424_v40 = vadd.f32 %v4423_v60, %v4361_v32  ;;  %v4463_v11 = vmul.f32 %v4361_v32, %v4361_v32  ;;  %v2888_v56 = vpop.f32.mrf.mxu1 }
 0x282   : > { %v4309_v12 = vpop.f32.mrf.mxu0  ;;  %v2940_v61 = vadd.f32 %v2888_v56, %v6646_v58 }
 0x283   : > { %v4494_v8 = vadd.f32 %v4493_v47, %v4463_v11 }
 0x284   : > { %v3883_v10 = vpop.f32.mrf.mxu3 }
 0x285   : > { %v3936_v21 = vadd.f32 %v3883_v10, %v3254_v57 }
 0x287   : > { %v4362_v43 = vadd.f32 %v4309_v12, %v3936_v21  ;;  %v3203_v5 = vpop.f32.mrf.mxu2 }
 0x288   : > { %v3255_v46 = vadd.f32 %v3203_v5, %v2940_v61 }
 0x289   : > { %4394 = vst [vmem:[%s6893_s30 + $0x90] sm:$0xff] %v4362_v43  ;;  %v4425_v13 = vadd.f32 %v4424_v40, %v4362_v43  ;;  %v4464_v34 = vmul.f32 %v4362_v43, %v4362_v43  ;;  %v2891_v29 = vpop.f32.mrf.mxu1 }
 0x28a   : > { %v4311_v9 = vpop.f32.mrf.mxu0  ;;  %v2941_v16 = vadd.f32 %v2891_v29, %v6661_v26 }
 0x28b   : > { %v4495_v19 = vadd.f32 %v4494_v8, %v4464_v34 }
 0x28c   : > { %v3885_v36 = vpop.f32.mrf.mxu3 }
 0x28d   : > { %v3937_v23 = vadd.f32 %v3885_v36, %v3255_v46 }
 0x28f   : > { %v4363_v31 = vadd.f32 %v4311_v9, %v3937_v23  ;;  %v3206_v38 = vpop.f32.mrf.mxu2 }
 0x290   : > { %v3256_v52 = vadd.f32 %v3206_v38, %v2941_v16 }
 0x291   : > { %4395 = vst [vmem:[%s6893_s30 + $0x98] sm:$0xff] %v4363_v31  ;;  %v4426_v41 = vadd.f32 %v4425_v13, %v4363_v31  ;;  %v4465_v27 = vmul.f32 %v4363_v31, %v4363_v31  ;;  %v2893_v58 = vpop.f32.mrf.mxu1 }
 0x292   : > { %v4314_v0 = vpop.f32.mrf.mxu0  ;;  %v2942_v22 = vadd.f32 %v2893_v58, %v6687_v53 }
 0x293   : > { %v4496_v49 = vadd.f32 %v4495_v19, %v4465_v27 }
 0x294   : > { %v3888_v24 = vpop.f32.mrf.mxu3 }
 0x295   : > { %v3938_v3 = vadd.f32 %v3888_v24, %v3256_v52 }
 0x297   : > { %v4364_v25 = vadd.f32 %v4314_v0, %v3938_v3  ;;  %v3208_v48 = vpop.f32.mrf.mxu2 }
 0x298   : > { %v3257_v7 = vadd.f32 %v3208_v48, %v2942_v22 }
 0x299   : > { %4396 = vst [vmem:[%s6893_s30 + $0xa0] sm:$0xff] %v4364_v25  ;;  %v4427_v17 = vadd.f32 %v4426_v41, %v4364_v25  ;;  %v4466_v15 = vmul.f32 %v4364_v25, %v4364_v25  ;;  %v2896_v26 = vpop.f32.mrf.mxu1 }
 0x29a   : > { %v4316_v59 = vpop.f32.mrf.mxu0  ;;  %v2943_v60 = vadd.f32 %v2896_v26, %v6701_v2 }
 0x29b   : > { %v4497_v37 = vadd.f32 %v4496_v49, %v4466_v15 }
 0x29c   : > { %v3890_v1 = vpop.f32.mrf.mxu3 }
 0x29d   : > { %v3939_v4 = vadd.f32 %v3890_v1, %v3257_v7 }
 0x29f   : > { %v4365_v42 = vadd.f32 %v4316_v59, %v3939_v4  ;;  %v3211_v51 = vpop.f32.mrf.mxu2 }
 0x2a0   : > { %v3258_v33 = vadd.f32 %v3211_v51, %v2943_v60 }
 0x2a1   : > { %4397 = vst [vmem:[%s6893_s30 + $0xa8] sm:$0xff] %v4365_v42  ;;  %v4428_v30 = vadd.f32 %v4427_v17, %v4365_v42  ;;  %v4467_v20 = vmul.f32 %v4365_v42, %v4365_v42  ;;  %v2898_v53 = vpop.f32.mrf.mxu1 }
 0x2a2   : > { %v4319_v47 = vpop.f32.mrf.mxu0  ;;  %v2944_v44 = vadd.f32 %v2898_v53, %v6724_v50 }
 0x2a3   : > { %v4498_v28 = vadd.f32 %v4497_v37, %v4467_v20 }
 0x2a4   : > { %v3893_v45 = vpop.f32.mrf.mxu3 }
 0x2a5   : > { %v3940_v32 = vadd.f32 %v3893_v45, %v3258_v33 }
 0x2a7   : > { %v4366_v54 = vadd.f32 %v4319_v47, %v3940_v32  ;;  %v3213_v40 = vpop.f32.mrf.mxu2 }
 0x2a8   : > { %v3259_v56 = vadd.f32 %v3213_v40, %v2944_v44 }
 0x2a9   : > { %4398 = vst [vmem:[%s6893_s30 + $0xb0] sm:$0xff] %v4366_v54  ;;  %v4429_v11 = vadd.f32 %v4428_v30, %v4366_v54  ;;  %v4468_v57 = vmul.f32 %v4366_v54, %v4366_v54  ;;  %v2901_v2 = vpop.f32.mrf.mxu1 }
 0x2aa   : > { %v4321_v12 = vpop.f32.mrf.mxu0  ;;  %v2945_v61 = vadd.f32 %v2901_v2, %v6739_v35 }
 0x2ab   : > { %v4499_v8 = vadd.f32 %v4498_v28, %v4468_v57 }
 0x2ac   : > { %v3895_v10 = vpop.f32.mrf.mxu3 }
 0x2ad   : > { %v3941_v21 = vadd.f32 %v3895_v10, %v3259_v56 }
 0x2af   : > { %v4367_v43 = vadd.f32 %v4321_v12, %v3941_v21  ;;  %v3216_v5 = vpop.f32.mrf.mxu2 }
 0x2b0   : > { %v3260_v46 = vadd.f32 %v3216_v5, %v2945_v61 }
 0x2b1   : > { %4399 = vst [vmem:[%s6893_s30 + $0xb8] sm:$0xff] %v4367_v43  ;;  %v4430_v13 = vadd.f32 %v4429_v11, %v4367_v43  ;;  %v4469_v34 = vmul.f32 %v4367_v43, %v4367_v43  ;;  %v2903_v50 = vpop.f32.mrf.mxu1 }
 0x2b2   : > { %v4324_v29 = vpop.f32.mrf.mxu0  ;;  %v2946_v31 = vadd.f32 %v2903_v50, %v6765_v18 }
 0x2b3   : > { %v4500_v9 = vadd.f32 %v4499_v8, %v4469_v34 }
 0x2b4   : > { %v3898_v19 = vpop.f32.mrf.mxu3 }
 0x2b5   : > { %v3942_v36 = vadd.f32 %v3898_v19, %v3260_v46 }
 0x2b7   : > { %v4368_v23 = vadd.f32 %v4324_v29, %v3942_v36  ;;  %v3218_v16 = vpop.f32.mrf.mxu2 }
 0x2b8   : > { %v3261_v27 = vadd.f32 %v3218_v16, %v2946_v31 }
 0x2b9   : > { %4400 = vst [vmem:[%s6893_s30 + $0xc0] sm:$0xff] %v4368_v23  ;;  %v4431_v38 = vadd.f32 %v4430_v13, %v4368_v23  ;;  %v4470_v41 = vmul.f32 %v4368_v23, %v4368_v23  ;;  %v2906_v35 = vpop.f32.mrf.mxu1 }
 0x2ba   : > { %v4326_v52 = vpop.f32.mrf.mxu0  ;;  %v2947_v3 = vadd.f32 %v2906_v35, %v6779_v14 }
 0x2bb   : > { %v4501_v58 = vadd.f32 %v4500_v9, %v4470_v41 }
 0x2bc   : > { %v3900_v0 = vpop.f32.mrf.mxu3 }
 0x2bd   : > { %v3943_v49 = vadd.f32 %v3900_v0, %v3261_v27 }
 0x2bf   : > { %v4369_v24 = vadd.f32 %v4326_v52, %v3943_v49  ;;  %v3221_v25 = vpop.f32.mrf.mxu2 }
 0x2c0   : > { %v3262_v17 = vadd.f32 %v3221_v25, %v2947_v3 }
 0x2c1   : > { %4401 = vst [vmem:[%s6893_s30 + $0xc8] sm:$0xff] %v4369_v24  ;;  %v4432_v22 = vadd.f32 %v4431_v38, %v4369_v24  ;;  %v4471_v48 = vmul.f32 %v4369_v24, %v4369_v24  ;;  %v2908_v18 = vpop.f32.mrf.mxu1 }
 0x2c2   : > { %v4329_v15 = vpop.f32.mrf.mxu0  ;;  %v2948_v1 = vadd.f32 %v2908_v18, %v6802_v63 }
 0x2c3   : > { %v4502_v7 = vadd.f32 %v4501_v58, %v4471_v48 }
 0x2c4   : > { %v3903_v26 = vpop.f32.mrf.mxu3 }
 0x2c5   : > { %v3944_v59 = vadd.f32 %v3903_v26, %v3262_v17 }
 0x2c7   : > { %v4370_v37 = vadd.f32 %v4329_v15, %v3944_v59  ;;  %v3223_v4 = vpop.f32.mrf.mxu2 }
 0x2c8   : > { %v3263_v51 = vadd.f32 %v3223_v4, %v2948_v1 }
 0x2c9   : > { %4402 = vst [vmem:[%s6893_s30 + $0xd0] sm:$0xff] %v4370_v37  ;;  %v4433_v42 = vadd.f32 %v4432_v22, %v4370_v37  ;;  %v4472_v60 = vmul.f32 %v4370_v37, %v4370_v37  ;;  %v2911_v14 = vpop.f32.mrf.mxu1 }
 0x2ca   : > { %v4331_v30 = vpop.f32.mrf.mxu0  ;;  %v2949_v28 = vadd.f32 %v2911_v14, %v6817_v55 }
 0x2cb   : > { %v4503_v20 = vadd.f32 %v4502_v7, %v4472_v60 }
 0x2cc   : > { %v3905_v33 = vpop.f32.mrf.mxu3 }
 0x2cd   : > { %v3945_v53 = vadd.f32 %v3905_v33, %v3263_v51 }
 0x2cf   : > { %v4371_v47 = vadd.f32 %v4331_v30, %v3945_v53  ;;  %v3226_v45 = vpop.f32.mrf.mxu2 }
 0x2d0   : > { %v3264_v44 = vadd.f32 %v3226_v45, %v2949_v28 }
 0x2d1   : > { %4403 = vst [vmem:[%s6893_s30 + $0xd8] sm:$0xff] %v4371_v47  ;;  %v4434_v32 = vadd.f32 %v4433_v42, %v4371_v47  ;;  %v4473_v54 = vmul.f32 %v4371_v47, %v4371_v47  ;;  %v2913_v63 = vpop.f32.mrf.mxu1 }
 0x2d2   : > { %v4334_v40 = vpop.f32.mrf.mxu0  ;;  %v2950_v12 = vadd.f32 %v2913_v63, %v6840_v62 }
 0x2d3   : > { %v4504_v11 = vadd.f32 %v4503_v20, %v4473_v54 }
 0x2d4   : > { %v3908_v57 = vpop.f32.mrf.mxu3 }
 0x2d5   : > { %v3946_v56 = vadd.f32 %v3908_v57, %v3264_v44 }
 0x2d7   : > { %v4372_v2 = vadd.f32 %v4334_v40, %v3946_v56  ;;  %v3228_v8 = vpop.f32.mrf.mxu2 }
 0x2d8   : > { %v3265_v43 = vadd.f32 %v3228_v8, %v2950_v12 }
 0x2d9   : > { %4404 = vst [vmem:[%s6893_s30 + $0xe0] sm:$0xff] %v4372_v2  ;;  %v4435_v10 = vadd.f32 %v4434_v32, %v4372_v2  ;;  %v4474_v21 = vmul.f32 %v4372_v2, %v4372_v2  ;;  %v2916_v55 = vpop.f32.mrf.mxu1 }
 0x2da   : > { %v4336_v61 = vpop.f32.mrf.mxu0  ;;  %v2951_v50 = vadd.f32 %v2916_v55, %v6853_v6 }
 0x2db   : > { %v4505_v5 = vadd.f32 %v4504_v11, %v4474_v21 }
 0x2dc   : > { %v3910_v13 = vpop.f32.mrf.mxu3 }
 0x2dd   : > { %v3947_v34 = vadd.f32 %v3910_v13, %v3265_v43 }
 0x2df   : > { %v4373_v46 = vadd.f32 %v4336_v61, %v3947_v34  ;;  %v3231_v29 = vpop.f32.mrf.mxu2 }
 0x2e0   : > { %v3266_v36 = vadd.f32 %v3231_v29, %v2951_v50 }
 0x2e1   : > { %4405 = vst [vmem:[%s6893_s30 + $0xe8] sm:$0xff] %v4373_v46  ;;  %v4436_v9 = vadd.f32 %v4435_v10, %v4373_v46  ;;  %v4475_v19 = vmul.f32 %v4373_v46, %v4373_v46  ;;  %v2918_v23 = vpop.f32.mrf.mxu1 }
 0x2e2   : > { %v4339_v31 = vpop.f32.mrf.mxu0  ;;  %v2952_v27 = vadd.f32 %v2918_v23, %v6876_v39 }
 0x2e3   : > { %v4506_v62 = vadd.f32 %v4505_v5, %v4475_v19 }
 0x2e4   : > { %v3913_v16 = vpop.f32.mrf.mxu3 }
 0x2e5   : > { %v3948_v38 = vadd.f32 %v3913_v16, %v3266_v36 }
 0x2e7   : > { %v4374_v41 = vadd.f32 %v4339_v31, %v3948_v38  ;;  %v3233_v35 = vpop.f32.mrf.mxu2 }
 0x2e8   : > { %v3267_v0 = vadd.f32 %v3233_v35, %v2952_v27 }
 0x2e9   : > { %4406 = vst [vmem:[%s6893_s30 + $0xf0] sm:$0xff] %v4374_v41  ;;  %v4437_v52 = vadd.f32 %v4436_v9, %v4374_v41  ;;  %v4476_v58 = vmul.f32 %v4374_v41, %v4374_v41 }
 0x2ea   : > { %v4341_v3 = vpop.f32.mrf.mxu0 }
 0x2eb   : > { %v4507_v6 = vadd.f32 %v4506_v62, %v4476_v58 }
 0x2ec   : > { %v3915_v49 = vpop.f32.mrf.mxu3 }
 0x2ed   : > { %v3949_v24 = vadd.f32 %v3915_v49, %v3267_v0 }
 0x2ef   : > { %v4375_v25 = vadd.f32 %v4341_v3, %v3949_v24 }
 0x2f1   : > { %4407 = vst [vmem:[%s6893_s30 + $0xf8] sm:$0xff] %v4375_v25  ;;  %v4438_v22 = vadd.f32 %v4437_v52, %v4375_v25  ;;  %v4477_v48 = vmul.f32 %v4375_v25, %v4375_v25 }
 0x2f3   : > { %v4439_v17 = vrot.slane %v4438_v22, 4  ;;  %v4508_v18 = vadd.f32 %v4507_v6, %v4477_v48 }
 0x2f5   : > { %v4440_v15 = vadd.f32 %v4439_v17, %v4438_v22  ;;  %v4509_v7 = vrot.slane %v4508_v18, 4 }
 0x2f7   : > { %v4441_v39 = vrot.slane %v4440_v15, 2  ;;  %v4510_v26 = vadd.f32 %v4509_v7, %v4508_v18 }
 0x2f9   : > { %v4442_v59 = vadd.f32 %v4441_v39, %v4440_v15  ;;  %v4511_v37 = vrot.slane %v4510_v26, 2 }
 0x2fb   : > { %v4443_v1 = vrot.slane %v4442_v59, 1  ;;  %v4512_v4 = vadd.f32 %v4511_v37, %v4510_v26 }
 0x2fd   : > { %v4444_v42 = vadd.f32 %v4443_v1, %v4442_v59  ;;  %v4513_v60 = vrot.slane %v4512_v4, 1 }
 0x2ff   : > { %4445 = vst [vmem:[%s211_s6] sm:$0x1] %v4444_v42  ;;  %v4514_v51 = vadd.f32 %v4513_v60, %v4512_v4 }
 0x301   : > { %4515 = vst [vmem:[%s214_s9] sm:$0x1] %v4514_v51 }
 0x302 PF: > { %s15_s15 = sadd.s32 1, %s5692_s15  }
 0x303   : > { %p12_p4 = scmp.ge.s32.totalorder %s15_s15, 4  }
 0x305   :  { %14 = sbr.rel (!%p12_p4) target bundleno = 1 (0x1), region = 92 }

</bundles_post_ra>
